<compile_context>
chip_gen: v7x
topology: tpu7x:2x2x1
jax: 0.10.0
libtpu: 0.0.40
codegen_flags: <defaults>
</compile_context>

<pallas_src>
import math

import jax
import jax.numpy as jnp
from jax import lax
from jax.experimental import pallas as pl
from jax.experimental.pallas import tpu as pltpu

DROP_P = 0.33628640918691904                     # torch.dropout prob (train=True)
_INV_KEEP = 1.0 / (1.0 - DROP_P)
_DROP_THRESHOLD_32 = int(round(DROP_P * (1 << 32)))   # uniform u32 >= thr -> keep


def _mix32(x):
    """Murmur3-finalizer style 32-bit integer mix (uint32, wrapping)."""
    x = x ^ (x >> jnp.uint32(16))
    x = x * jnp.uint32(0x7FEB352D)
    x = x ^ (x >> jnp.uint32(15))
    x = x * jnp.uint32(0x846CA68B)
    x = x ^ (x >> jnp.uint32(16))
    return x


def _pick_head_blocks(H, S, D, itemsize=4):
    """Return (HBLK, HSUB): heads per grid step / per inner-loop iteration."""
    # HSUB: enough heads per inner iteration that the output slab (S, HSUB*D)
    # is lane-dense (>=128 lanes) while (HSUB,S,S) temporaries stay vreg-sized.
    hsub = min(H, max(1, -(-128 // max(D, 1))))
    while H % hsub:
        hsub -= 1
    # HBLK: heads per grid step.  Blocks are tiny at S~48, so size from a
    # ~2 MiB/operand budget (amortizes per-step overhead), cap at 16 so the
    # grid still shards across cores; must be a multiple of HSUB dividing H.
    budget = 2 * 1024 * 1024
    per_head = S * D * itemsize
    cap = min(16, H, max(hsub, budget // max(per_head, 1)))
    hblk = hsub
    for cand in range(hsub, cap + 1, hsub):
        if H % cand == 0:
            hblk = cand
    return hblk, hsub


def _make_attn_kernel(HBLK, HSUB, S, D, mh_blk, on_tpu):
    scale = 1.0 / math.sqrt(D)
    nsub = HBLK // HSUB

    def kernel(seed_ref, q_ref, k_ref, v_ref, m_ref, o_ref):
        b = pl.program_id(0)
        g = pl.program_id(1)

        if on_tpu:
            # One hardware-PRNG seed per (batch, head-block) grid step; the
            # successive prng_random_bits draws below give independent bits
            # per head sub-block.
            pltpu.prng_seed(seed_ref[0], b, g)

        # Unrolled inner loop over head sub-blocks (equivalent to
        # lax.fori_loop(..., unroll=True)): bounds live (HSUB,S,S) temporaries
        # instead of materializing (HBLK,S,S) and spilling.
        for i in range(nsub):
            h0 = i * HSUB

            # bf16 MXU operands, f32 accumulation; 1/sqrt(D) folded into q
            # (an SxD multiply instead of an SxS one).
            q = (q_ref[0, h0:h0 + HSUB] * scale).astype(jnp.bfloat16)   # (HSUB,S,D)
            k = k_ref[0, h0:h0 + HSUB].astype(jnp.bfloat16)             # (HSUB,S,D)
            v = v_ref[0, h0:h0 + HSUB].astype(jnp.bfloat16)             # (HSUB,S,D)
            if mh_blk == 1:
                m = m_ref[0, 0].astype(jnp.float32)[None, :, :]          # (1,S,S)
            else:
                m = m_ref[0, h0:h0 + HSUB].astype(jnp.float32)           # (HSUB,S,S)

            # q @ k^T (batched over heads, contraction on un-transposed k).
            s = lax.dot_general(
                q, k,
                dimension_numbers=(((2,), (2,)), ((0,), (0,))),
                preferred_element_type=jnp.float32)                      # (HSUB,S,S)
            s = s + m

            # Numerically stable softmax numerator; denominator applied
            # post-PV.  Softmax math stays f32 (v5e has no bf16 VPU/EUP).
            # (Fully -inf-masked rows produce NaN, same as PyTorch SDPA.)
            s_max = jnp.max(s, axis=-1, keepdims=True)
            e = jnp.exp(s - s_max)                                       # (HSUB,S,S)
            denom = jnp.sum(e, axis=-1, keepdims=True)                   # (HSUB,S,1)

            if on_tpu:
                bits = pltpu.prng_random_bits((HSUB * S, S))
                if bits.dtype != jnp.uint32:
                    bits = pltpu.bitcast(bits, jnp.uint32)
                bits = bits.reshape(HSUB, S, S)
            else:
                # Interpret-mode fallback: cheap single-round counter hash
                # keyed on (seed, batch, head, q_idx, k_idx).
                shp = (HSUB, S, S)
                hh = lax.broadcasted_iota(jnp.uint32, shp, 0)
                qq = lax.broadcasted_iota(jnp.uint32, shp, 1)
                kk = lax.broadcasted_iota(jnp.uint32, shp, 2)
                head0 = g.astype(jnp.uint32) * jnp.uint32(HBLK) + jnp.uint32(h0)
                lin = ((head0 + hh) * jnp.uint32(S) + qq) * jnp.uint32(S) + kk
                base = _mix32(seed_ref[0].astype(jnp.uint32) * jnp.uint32(0x9E3779B9)
                              + b.astype(jnp.uint32) * jnp.uint32(0x85EBCA6B))
                bits = _mix32(lin ^ base)

            keep = bits >= jnp.uint32(_DROP_THRESHOLD_32)    # P(keep) = 1 - DROP_P
            # Drop on the numerator; denominator stays the un-dropped sum, so
            # keep*e/denom == dropout(softmax(s)) exactly (up to RNG stream).
            p = jnp.where(keep, e, 0.0).astype(jnp.bfloat16)             # (HSUB,S,S)

            o = lax.dot_general(
                p, v,
                dimension_numbers=(((2,), (1,)), ((0,), (0,))),
                preferred_element_type=jnp.float32)                      # (HSUB,S,D)

            # Softmax denominator + dropout 1/(1-p) folded into one row scale;
            # the approximate reciprocal runs on the otherwise-idle EUP slot.
            if on_tpu:
                inv = pl.reciprocal(denom, approx=True)
            else:
                inv = 1.0 / denom
            o = o * (inv * _INV_KEEP)

            # Lane-dense (S, HSUB*D) slab: heads concatenated along lanes so
            # the store is a full-width vst rather than masked 32-lane stores.
            o_wide = jnp.concatenate([o[h] for h in range(HSUB)], axis=-1)
            o_ref[0, i] = o_wide.astype(o_ref.dtype)

    return kernel


def attention_dropout(query, key, value, attn_mask, seed=0):
    """softmax(q @ k^T / sqrt(D) + mask) -> dropout(DROP_P, train=True) -> @ v.

    query/key/value: [B, H, S, D].  If the surrounding model runs in bf16, pass
        bf16 end-to-end (the kernel casts MXU operands itself; do NOT add a
        wrapper-side f32->bf16 cast).
    attn_mask: additive float mask, [S, S] or [Mb, Mh, S, S] with Mb in {1, B},
        Mh in {1, H}.  Broadcasting over batch/heads happens in the BlockSpec
        index_map; the mask is never materialized as [B, H, S, S].
    """
    B, H, S, D = query.shape
    assert key.shape == (B, H, S, D) and value.shape == (B, H, S, D)

    if attn_mask.ndim == 2:
        attn_mask = attn_mask[None, None, :, :]
    Mb, Mh, Ms0, Ms1 = attn_mask.shape
    assert (Ms0, Ms1) == (S, S) and Mb in (1, B) and Mh in (1, H)
    assert jnp.issubdtype(attn_mask.dtype, jnp.floating), (
        "attn_mask must be an additive float mask; convert boolean masks to "
        "0 / -inf before calling")

    HBLK, HSUB = _pick_head_blocks(H, S, D, itemsize=query.dtype.itemsize)
    NSUB = HBLK // HSUB
    mh_blk = 1 if Mh == 1 else HBLK

    # Hardware PRNG / approx reciprocal on real TPUs; pure-jnp fallback when
    # interpreting on CPU.
    on_tpu = jax.devices()[0].platform == "tpu"

    seed_arr = jnp.asarray([seed], dtype=jnp.int32)

    qkv_spec = pl.BlockSpec((1, HBLK, S, D), lambda b, g, sd: (b, g, 0, 0))
    msk_spec = pl.BlockSpec(
        (1, mh_blk, S, S),
        lambda b, g, sd: (b if Mb != 1 else 0, g if Mh != 1 else 0, 0, 0))
    # Lane-dense output layout: (S, HSUB*D) slabs per head sub-block.
    out_spec = pl.BlockSpec((1, NSUB, S, HSUB * D), lambda b, g, sd: (b, g, 0, 0))

    kernel = _make_attn_kernel(HBLK, HSUB, S, D, mh_blk, on_tpu)

    out_wide = pl.pallas_call(
        kernel,
        out_shape=jax.ShapeDtypeStruct((B, H // HSUB, S, HSUB * D), query.dtype),
        grid_spec=pltpu.PrefetchScalarGridSpec(
            num_scalar_prefetch=1,
            grid=(B, H // HBLK),
            in_specs=[qkv_spec, qkv_spec, qkv_spec, msk_spec],
            out_specs=out_spec,
        ),
        # No vmem_limit override: the per-step footprint is well under 1 MiB
        # (q/k/v blocks ~100 KiB each, double-buffered), so the default scoped
        # VMEM limit is plenty on v5e/v6e and on v7x's 64 MiB VMEM.
        compiler_params=pltpu.CompilerParams(
            dimension_semantics=("parallel", "parallel")),
    )(seed_arr, query, key, value, attn_mask)

    # Undo the lane-dense kernel layout (pure layout plumbing on the wrapper
    # side): [B, H/HSUB, S, HSUB*D] -> [B, H, S, D].
    out = out_wide.reshape(B, H // HSUB, S, HSUB, D)
    out = out.transpose(0, 1, 3, 2, 4).reshape(B, H, S, D)
    return out


if __name__ == "__main__":
    # Small shapes consistent with the module's attention pattern
    # (module: heads=128, seq_len=48 -- heads scaled down; S kept at 48).
    B, H, S, D = 2, 8, 48, 32

    key0 = jax.random.PRNGKey(0)
    kq, kk, kv, km = jax.random.split(key0, 4)

    query = jax.random.normal(kq, (B, H, S, D), dtype=jnp.float32)
    key_ = jax.random.normal(kk, (B, H, S, D), dtype=jnp.float32)
    value = jax.random.normal(kv, (B, H, S, D), dtype=jnp.float32)
    # Mask shared across batch & heads; broadcast handled by the index_map.
    attn_mask = 0.1 * jax.random.normal(km, (1, 1, S, S), dtype=jnp.float32)

    out = attention_dropout(query, key_, value, attn_mask, seed=0)
    jax.block_until_ready(out)

    assert out.shape == (B, H, S, D)
    assert out.dtype == jnp.float32
    assert bool(jnp.isfinite(out).all())
    print("KERNEL_OK")
</pallas_src>

<mosaic_0001>
module attributes {stable_mosaic.version = 11 : i64} {
  func.func @kernel(%arg0: i32, %arg1: i32, %arg2: memref<1xi32, #tpu.memory_space<smem>>, %arg3: memref<1x8x48x32xf32, #tpu.memory_space<vmem>>, %arg4: memref<1x8x48x32xf32, #tpu.memory_space<vmem>>, %arg5: memref<1x8x48x32xf32, #tpu.memory_space<vmem>>, %arg6: memref<1x1x48x48xf32, #tpu.memory_space<vmem>>, %arg7: memref<1x2x48x128xf32, #tpu.memory_space<vmem>>) attributes {dimension_semantics = [#tpu.dimension_semantics<parallel>, #tpu.dimension_semantics<parallel>], iteration_bounds = array<i64: 2, 1>, scalar_prefetch = 1 : i64, scratch_operands = 0 : i64, tpu.core_type = #tpu.core_type<tc>, window_params = [{transform_indices = @transform_0, window_bounds = array<i64: 1, 8, 48, 32>}, {transform_indices = @transform_1, window_bounds = array<i64: 1, 8, 48, 32>}, {transform_indices = @transform_2, window_bounds = array<i64: 1, 8, 48, 32>}, {pipeline_mode = #tpu.pipeline_mode<synchronous>, transform_indices = @transform_3, window_bounds = array<i64: 1, 1, 48, 48>}, {transform_indices = @transform_4, window_bounds = array<i64: 1, 2, 48, 128>}]} {
    %c0 = arith.constant 0 : index
    %c0_0 = arith.constant 0 : index
    %c0_1 = arith.constant 0 : index
    %c0_2 = arith.constant 0 : index
    %0 = vector.load %arg3[%c0, %c0_0, %c0_1, %c0_2] : memref<1x8x48x32xf32, #tpu.memory_space<vmem>>, vector<1x4x48x32xf32>
    %1 = vector.shape_cast %0 : vector<1x4x48x32xf32> to vector<4x48x32xf32>
    %cst = arith.constant 0.176776692 : f32
    %2 = vector.broadcast %cst : f32 to vector<4x48x32xf32>
    %3 = arith.mulf %1, %2 : vector<4x48x32xf32>
    %4 = arith.truncf %3 : vector<4x48x32xf32> to vector<4x48x32xbf16>
    %c0_3 = arith.constant 0 : index
    %c0_4 = arith.constant 0 : index
    %c0_5 = arith.constant 0 : index
    %c0_6 = arith.constant 0 : index
    %5 = vector.load %arg4[%c0_3, %c0_4, %c0_5, %c0_6] : memref<1x8x48x32xf32, #tpu.memory_space<vmem>>, vector<1x4x48x32xf32>
    %6 = vector.shape_cast %5 : vector<1x4x48x32xf32> to vector<4x48x32xf32>
    %7 = arith.truncf %6 : vector<4x48x32xf32> to vector<4x48x32xbf16>
    %c0_7 = arith.constant 0 : index
    %c0_8 = arith.constant 0 : index
    %c0_9 = arith.constant 0 : index
    %c0_10 = arith.constant 0 : index
    %8 = vector.load %arg5[%c0_7, %c0_8, %c0_9, %c0_10] : memref<1x8x48x32xf32, #tpu.memory_space<vmem>>, vector<1x4x48x32xf32>
    %9 = vector.shape_cast %8 : vector<1x4x48x32xf32> to vector<4x48x32xf32>
    %10 = arith.truncf %9 : vector<4x48x32xf32> to vector<4x48x32xbf16>
    %c0_11 = arith.constant 0 : index
    %c0_12 = arith.constant 0 : index
    %c0_13 = arith.constant 0 : index
    %c0_14 = arith.constant 0 : index
    %11 = vector.load %arg6[%c0_11, %c0_12, %c0_13, %c0_14] : memref<1x1x48x48xf32, #tpu.memory_space<vmem>>, vector<1x1x48x48xf32>
    %12 = vector.shape_cast %11 : vector<1x1x48x48xf32> to vector<48x48xf32>
    %13 = vector.shape_cast %12 : vector<48x48xf32> to vector<1x48x48xf32>
    %cst_15 = arith.constant dense<0.000000e+00> : vector<4x48x48xf32>
    %14 = tpu.matmul %4, %7, %cst_15 {dimension_numbers = #tpu.dot_dimension_numbers<[2], [2], [1], [1], [0, 0, 0, 1, 1, 1], [0], [0]>} : vector<4x48x32xbf16>, vector<4x48x32xbf16>, vector<4x48x48xf32> -> vector<4x48x48xf32>
    %15 = vector.broadcast %13 : vector<1x48x48xf32> to vector<4x48x48xf32>
    %16 = arith.addf %14, %15 : vector<4x48x48xf32>
    %cst_16 = arith.constant dense<0xFF800000> : vector<4x48xf32>
    %17 = vector.multi_reduction <maximumf>, %16, %cst_16 [2] : vector<4x48x48xf32> to vector<4x48xf32>
    %18 = vector.shape_cast %17 : vector<4x48xf32> to vector<4x48x1xf32>
    %19 = vector.broadcast %18 : vector<4x48x1xf32> to vector<4x48x48xf32>
    %20 = arith.subf %16, %19 : vector<4x48x48xf32>
    %21 = math.exp %20 : vector<4x48x48xf32>
    %cst_17 = arith.constant dense<0.000000e+00> : vector<4x48xf32>
    %22 = vector.multi_reduction <add>, %21, %cst_17 [2] : vector<4x48x48xf32> to vector<4x48xf32>
    %23 = vector.shape_cast %22 : vector<4x48xf32> to vector<4x48x1xf32>
    %24 = tpu.iota {dimensions = array<i32: 0>} : vector<4x48x48xi32>
    %25 = tpu.iota {dimensions = array<i32: 1>} : vector<4x48x48xi32>
    %26 = tpu.iota {dimensions = array<i32: 2>} : vector<4x48x48xi32>
    %c8_i32 = arith.constant 8 : i32
    %27 = arith.muli %arg1, %c8_i32 : i32
    %c0_i32 = arith.constant 0 : i32
    %28 = arith.addi %27, %c0_i32 : i32
    %29 = vector.broadcast %28 : i32 to vector<4x48x48xi32>
    %30 = arith.addi %29, %24 : vector<4x48x48xi32>
    %c48_i32 = arith.constant 48 : i32
    %31 = vector.broadcast %c48_i32 : i32 to vector<4x48x48xi32>
    %32 = arith.muli %30, %31 : vector<4x48x48xi32>
    %33 = arith.addi %32, %25 : vector<4x48x48xi32>
    %c48_i32_18 = arith.constant 48 : i32
    %34 = vector.broadcast %c48_i32_18 : i32 to vector<4x48x48xi32>
    %35 = arith.muli %33, %34 : vector<4x48x48xi32>
    %36 = arith.addi %35, %26 : vector<4x48x48xi32>
    %c0_19 = arith.constant 0 : index
    %37 = memref.load %arg2[%c0_19] : memref<1xi32, #tpu.memory_space<smem>>
    %c-1640531527_i32 = arith.constant -1640531527 : i32
    %38 = arith.muli %37, %c-1640531527_i32 : i32
    %c-2048144789_i32 = arith.constant -2048144789 : i32
    %39 = arith.muli %arg0, %c-2048144789_i32 : i32
    %40 = arith.addi %38, %39 : i32
    %c16_i32 = arith.constant 16 : i32
    %41 = arith.shrui %40, %c16_i32 : i32
    %42 = arith.xori %40, %41 : i32
    %c2146121005_i32 = arith.constant 2146121005 : i32
    %43 = arith.muli %42, %c2146121005_i32 : i32
    %c15_i32 = arith.constant 15 : i32
    %44 = arith.shrui %43, %c15_i32 : i32
    %45 = arith.xori %43, %44 : i32
    %c-2073254261_i32 = arith.constant -2073254261 : i32
    %46 = arith.muli %45, %c-2073254261_i32 : i32
    %c16_i32_20 = arith.constant 16 : i32
    %47 = arith.shrui %46, %c16_i32_20 : i32
    %48 = arith.xori %46, %47 : i32
    %49 = vector.broadcast %48 : i32 to vector<4x48x48xi32>
    %50 = arith.xori %36, %49 : vector<4x48x48xi32>
    %c16_i32_21 = arith.constant 16 : i32
    %51 = vector.broadcast %c16_i32_21 : i32 to vector<4x48x48xi32>
    %52 = arith.shrui %50, %51 : vector<4x48x48xi32>
    %53 = arith.xori %50, %52 : vector<4x48x48xi32>
    %c2146121005_i32_22 = arith.constant 2146121005 : i32
    %54 = vector.broadcast %c2146121005_i32_22 : i32 to vector<4x48x48xi32>
    %55 = arith.muli %53, %54 : vector<4x48x48xi32>
    %c15_i32_23 = arith.constant 15 : i32
    %56 = vector.broadcast %c15_i32_23 : i32 to vector<4x48x48xi32>
    %57 = arith.shrui %55, %56 : vector<4x48x48xi32>
    %58 = arith.xori %55, %57 : vector<4x48x48xi32>
    %c-2073254261_i32_24 = arith.constant -2073254261 : i32
    %59 = vector.broadcast %c-2073254261_i32_24 : i32 to vector<4x48x48xi32>
    %60 = arith.muli %58, %59 : vector<4x48x48xi32>
    %c16_i32_25 = arith.constant 16 : i32
    %61 = vector.broadcast %c16_i32_25 : i32 to vector<4x48x48xi32>
    %62 = arith.shrui %60, %61 : vector<4x48x48xi32>
    %63 = arith.xori %60, %62 : vector<4x48x48xi32>
    %c1444339130_i32 = arith.constant 1444339130 : i32
    %64 = vector.broadcast %c1444339130_i32 : i32 to vector<4x48x48xi32>
    %65 = arith.cmpi uge, %63, %64 : vector<4x48x48xi32>
    %cst_26 = arith.constant 0.000000e+00 : f32
    %66 = vector.broadcast %cst_26 : f32 to vector<4x48x48xf32>
    %67 = arith.select %65, %21, %66 : vector<4x48x48xi1>, vector<4x48x48xf32>
    %68 = arith.truncf %67 : vector<4x48x48xf32> to vector<4x48x48xbf16>
    %cst_27 = arith.constant dense<0.000000e+00> : vector<4x48x32xf32>
    %69 = tpu.matmul %68, %10, %cst_27 {dimension_numbers = #tpu.dot_dimension_numbers<[2], [1], [1], [2], [0, 0, 0, 1, 1, 2], [0], [0]>} : vector<4x48x48xbf16>, vector<4x48x32xbf16>, vector<4x48x32xf32> -> vector<4x48x32xf32>
    %cst_28 = arith.constant 1.000000e+00 : f32
    %70 = vector.broadcast %cst_28 : f32 to vector<4x48x1xf32>
    %71 = arith.divf %70, %23 : vector<4x48x1xf32>
    %cst_29 = arith.constant 1.50667393 : f32
    %72 = vector.broadcast %cst_29 : f32 to vector<4x48x1xf32>
    %73 = arith.mulf %71, %72 : vector<4x48x1xf32>
    %74 = vector.broadcast %73 : vector<4x48x1xf32> to vector<4x48x32xf32>
    %75 = arith.mulf %69, %74 : vector<4x48x32xf32>
    %76 = vector.extract_strided_slice %75 {offsets = [0, 0, 0], sizes = [1, 48, 32], strides = [1, 1, 1]} : vector<4x48x32xf32> to vector<1x48x32xf32>
    %77 = vector.shape_cast %76 : vector<1x48x32xf32> to vector<48x32xf32>
    %78 = vector.extract_strided_slice %75 {offsets = [1, 0, 0], sizes = [1, 48, 32], strides = [1, 1, 1]} : vector<4x48x32xf32> to vector<1x48x32xf32>
    %79 = vector.shape_cast %78 : vector<1x48x32xf32> to vector<48x32xf32>
    %80 = vector.extract_strided_slice %75 {offsets = [2, 0, 0], sizes = [1, 48, 32], strides = [1, 1, 1]} : vector<4x48x32xf32> to vector<1x48x32xf32>
    %81 = vector.shape_cast %80 : vector<1x48x32xf32> to vector<48x32xf32>
    %82 = vector.extract_strided_slice %75 {offsets = [3, 0, 0], sizes = [1, 48, 32], strides = [1, 1, 1]} : vector<4x48x32xf32> to vector<1x48x32xf32>
    %83 = vector.shape_cast %82 : vector<1x48x32xf32> to vector<48x32xf32>
    %84 = tpu.concatenate %77, %79, %81, %83 in 1 : vector<48x32xf32>, vector<48x32xf32>, vector<48x32xf32>, vector<48x32xf32> -> vector<48x128xf32>
    %c0_30 = arith.constant 0 : index
    %c0_31 = arith.constant 0 : index
    %c0_32 = arith.constant 0 : index
    %c0_33 = arith.constant 0 : index
    %85 = vector.load %arg7[%c0_30, %c0_31, %c0_32, %c0_33] : memref<1x2x48x128xf32, #tpu.memory_space<vmem>>, vector<1x1x48x128xf32>
    %86 = vector.shape_cast %85 : vector<1x1x48x128xf32> to vector<48x128xf32>
    %87 = vector.shape_cast %84 : vector<48x128xf32> to vector<1x1x48x128xf32>
    tpu.vector_store %arg7[%c0_30, %c0_31, %c0_32, %c0_33], %87 {strides = array<i32>} : memref<1x2x48x128xf32, #tpu.memory_space<vmem>>, vector<1x1x48x128xf32>,
    %c0_34 = arith.constant 0 : index
    %c4 = arith.constant 4 : index
    %c0_35 = arith.constant 0 : index
    %c0_36 = arith.constant 0 : index
    %88 = vector.load %arg3[%c0_34, %c4, %c0_35, %c0_36] : memref<1x8x48x32xf32, #tpu.memory_space<vmem>>, vector<1x4x48x32xf32>
    %89 = vector.shape_cast %88 : vector<1x4x48x32xf32> to vector<4x48x32xf32>
    %cst_37 = arith.constant 0.176776692 : f32
    %90 = vector.broadcast %cst_37 : f32 to vector<4x48x32xf32>
    %91 = arith.mulf %89, %90 : vector<4x48x32xf32>
    %92 = arith.truncf %91 : vector<4x48x32xf32> to vector<4x48x32xbf16>
    %c0_38 = arith.constant 0 : index
    %c4_39 = arith.constant 4 : index
    %c0_40 = arith.constant 0 : index
    %c0_41 = arith.constant 0 : index
    %93 = vector.load %arg4[%c0_38, %c4_39, %c0_40, %c0_41] : memref<1x8x48x32xf32, #tpu.memory_space<vmem>>, vector<1x4x48x32xf32>
    %94 = vector.shape_cast %93 : vector<1x4x48x32xf32> to vector<4x48x32xf32>
    %95 = arith.truncf %94 : vector<4x48x32xf32> to vector<4x48x32xbf16>
    %c0_42 = arith.constant 0 : index
    %c4_43 = arith.constant 4 : index
    %c0_44 = arith.constant 0 : index
    %c0_45 = arith.constant 0 : index
    %96 = vector.load %arg5[%c0_42, %c4_43, %c0_44, %c0_45] : memref<1x8x48x32xf32, #tpu.memory_space<vmem>>, vector<1x4x48x32xf32>
    %97 = vector.shape_cast %96 : vector<1x4x48x32xf32> to vector<4x48x32xf32>
    %98 = arith.truncf %97 : vector<4x48x32xf32> to vector<4x48x32xbf16>
    %c0_46 = arith.constant 0 : index
    %c0_47 = arith.constant 0 : index
    %c0_48 = arith.constant 0 : index
    %c0_49 = arith.constant 0 : index
    %99 = vector.load %arg6[%c0_46, %c0_47, %c0_48, %c0_49] : memref<1x1x48x48xf32, #tpu.memory_space<vmem>>, vector<1x1x48x48xf32>
    %100 = vector.shape_cast %99 : vector<1x1x48x48xf32> to vector<48x48xf32>
    %101 = vector.shape_cast %100 : vector<48x48xf32> to vector<1x48x48xf32>
    %cst_50 = arith.constant dense<0.000000e+00> : vector<4x48x48xf32>
    %102 = tpu.matmul %92, %95, %cst_50 {dimension_numbers = #tpu.dot_dimension_numbers<[2], [2], [1], [1], [0, 0, 0, 1, 1, 1], [0], [0]>} : vector<4x48x32xbf16>, vector<4x48x32xbf16>, vector<4x48x48xf32> -> vector<4x48x48xf32>
    %103 = vector.broadcast %101 : vector<1x48x48xf32> to vector<4x48x48xf32>
    %104 = arith.addf %102, %103 : vector<4x48x48xf32>
    %cst_51 = arith.constant dense<0xFF800000> : vector<4x48xf32>
    %105 = vector.multi_reduction <maximumf>, %104, %cst_51 [2] : vector<4x48x48xf32> to vector<4x48xf32>
    %106 = vector.shape_cast %105 : vector<4x48xf32> to vector<4x48x1xf32>
    %107 = vector.broadcast %106 : vector<4x48x1xf32> to vector<4x48x48xf32>
    %108 = arith.subf %104, %107 : vector<4x48x48xf32>
    %109 = math.exp %108 : vector<4x48x48xf32>
    %cst_52 = arith.constant dense<0.000000e+00> : vector<4x48xf32>
    %110 = vector.multi_reduction <add>, %109, %cst_52 [2] : vector<4x48x48xf32> to vector<4x48xf32>
    %111 = vector.shape_cast %110 : vector<4x48xf32> to vector<4x48x1xf32>
    %112 = tpu.iota {dimensions = array<i32: 0>} : vector<4x48x48xi32>
    %113 = tpu.iota {dimensions = array<i32: 1>} : vector<4x48x48xi32>
    %114 = tpu.iota {dimensions = array<i32: 2>} : vector<4x48x48xi32>
    %c8_i32_53 = arith.constant 8 : i32
    %115 = arith.muli %arg1, %c8_i32_53 : i32
    %c4_i32 = arith.constant 4 : i32
    %116 = arith.addi %115, %c4_i32 : i32
    %117 = vector.broadcast %116 : i32 to vector<4x48x48xi32>
    %118 = arith.addi %117, %112 : vector<4x48x48xi32>
    %c48_i32_54 = arith.constant 48 : i32
    %119 = vector.broadcast %c48_i32_54 : i32 to vector<4x48x48xi32>
    %120 = arith.muli %118, %119 : vector<4x48x48xi32>
    %121 = arith.addi %120, %113 : vector<4x48x48xi32>
    %c48_i32_55 = arith.constant 48 : i32
    %122 = vector.broadcast %c48_i32_55 : i32 to vector<4x48x48xi32>
    %123 = arith.muli %121, %122 : vector<4x48x48xi32>
    %124 = arith.addi %123, %114 : vector<4x48x48xi32>
    %c0_56 = arith.constant 0 : index
    %125 = memref.load %arg2[%c0_56] : memref<1xi32, #tpu.memory_space<smem>>
    %c-1640531527_i32_57 = arith.constant -1640531527 : i32
    %126 = arith.muli %125, %c-1640531527_i32_57 : i32
    %c-2048144789_i32_58 = arith.constant -2048144789 : i32
    %127 = arith.muli %arg0, %c-2048144789_i32_58 : i32
    %128 = arith.addi %126, %127 : i32
    %c16_i32_59 = arith.constant 16 : i32
    %129 = arith.shrui %128, %c16_i32_59 : i32
    %130 = arith.xori %128, %129 : i32
    %c2146121005_i32_60 = arith.constant 2146121005 : i32
    %131 = arith.muli %130, %c2146121005_i32_60 : i32
    %c15_i32_61 = arith.constant 15 : i32
    %132 = arith.shrui %131, %c15_i32_61 : i32
    %133 = arith.xori %131, %132 : i32
    %c-2073254261_i32_62 = arith.constant -2073254261 : i32
    %134 = arith.muli %133, %c-2073254261_i32_62 : i32
    %c16_i32_63 = arith.constant 16 : i32
    %135 = arith.shrui %134, %c16_i32_63 : i32
    %136 = arith.xori %134, %135 : i32
    %137 = vector.broadcast %136 : i32 to vector<4x48x48xi32>
    %138 = arith.xori %124, %137 : vector<4x48x48xi32>
    %c16_i32_64 = arith.constant 16 : i32
    %139 = vector.broadcast %c16_i32_64 : i32 to vector<4x48x48xi32>
    %140 = arith.shrui %138, %139 : vector<4x48x48xi32>
    %141 = arith.xori %138, %140 : vector<4x48x48xi32>
    %c2146121005_i32_65 = arith.constant 2146121005 : i32
    %142 = vector.broadcast %c2146121005_i32_65 : i32 to vector<4x48x48xi32>
    %143 = arith.muli %141, %142 : vector<4x48x48xi32>
    %c15_i32_66 = arith.constant 15 : i32
    %144 = vector.broadcast %c15_i32_66 : i32 to vector<4x48x48xi32>
    %145 = arith.shrui %143, %144 : vector<4x48x48xi32>
    %146 = arith.xori %143, %145 : vector<4x48x48xi32>
    %c-2073254261_i32_67 = arith.constant -2073254261 : i32
    %147 = vector.broadcast %c-2073254261_i32_67 : i32 to vector<4x48x48xi32>
    %148 = arith.muli %146, %147 : vector<4x48x48xi32>
    %c16_i32_68 = arith.constant 16 : i32
    %149 = vector.broadcast %c16_i32_68 : i32 to vector<4x48x48xi32>
    %150 = arith.shrui %148, %149 : vector<4x48x48xi32>
    %151 = arith.xori %148, %150 : vector<4x48x48xi32>
    %c1444339130_i32_69 = arith.constant 1444339130 : i32
    %152 = vector.broadcast %c1444339130_i32_69 : i32 to vector<4x48x48xi32>
    %153 = arith.cmpi uge, %151, %152 : vector<4x48x48xi32>
    %cst_70 = arith.constant 0.000000e+00 : f32
    %154 = vector.broadcast %cst_70 : f32 to vector<4x48x48xf32>
    %155 = arith.select %153, %109, %154 : vector<4x48x48xi1>, vector<4x48x48xf32>
    %156 = arith.truncf %155 : vector<4x48x48xf32> to vector<4x48x48xbf16>
    %cst_71 = arith.constant dense<0.000000e+00> : vector<4x48x32xf32>
    %157 = tpu.matmul %156, %98, %cst_71 {dimension_numbers = #tpu.dot_dimension_numbers<[2], [1], [1], [2], [0, 0, 0, 1, 1, 2], [0], [0]>} : vector<4x48x48xbf16>, vector<4x48x32xbf16>, vector<4x48x32xf32> -> vector<4x48x32xf32>
    %cst_72 = arith.constant 1.000000e+00 : f32
    %158 = vector.broadcast %cst_72 : f32 to vector<4x48x1xf32>
    %159 = arith.divf %158, %111 : vector<4x48x1xf32>
    %cst_73 = arith.constant 1.50667393 : f32
    %160 = vector.broadcast %cst_73 : f32 to vector<4x48x1xf32>
    %161 = arith.mulf %159, %160 : vector<4x48x1xf32>
    %162 = vector.broadcast %161 : vector<4x48x1xf32> to vector<4x48x32xf32>
    %163 = arith.mulf %157, %162 : vector<4x48x32xf32>
    %164 = vector.extract_strided_slice %163 {offsets = [0, 0, 0], sizes = [1, 48, 32], strides = [1, 1, 1]} : vector<4x48x32xf32> to vector<1x48x32xf32>
    %165 = vector.shape_cast %164 : vector<1x48x32xf32> to vector<48x32xf32>
    %166 = vector.extract_strided_slice %163 {offsets = [1, 0, 0], sizes = [1, 48, 32], strides = [1, 1, 1]} : vector<4x48x32xf32> to vector<1x48x32xf32>
    %167 = vector.shape_cast %166 : vector<1x48x32xf32> to vector<48x32xf32>
    %168 = vector.extract_strided_slice %163 {offsets = [2, 0, 0], sizes = [1, 48, 32], strides = [1, 1, 1]} : vector<4x48x32xf32> to vector<1x48x32xf32>
    %169 = vector.shape_cast %168 : vector<1x48x32xf32> to vector<48x32xf32>
    %170 = vector.extract_strided_slice %163 {offsets = [3, 0, 0], sizes = [1, 48, 32], strides = [1, 1, 1]} : vector<4x48x32xf32> to vector<1x48x32xf32>
    %171 = vector.shape_cast %170 : vector<1x48x32xf32> to vector<48x32xf32>
    %172 = tpu.concatenate %165, %167, %169, %171 in 1 : vector<48x32xf32>, vector<48x32xf32>, vector<48x32xf32>, vector<48x32xf32> -> vector<48x128xf32>
    %c0_74 = arith.constant 0 : index
    %c1 = arith.constant 1 : index
    %c0_75 = arith.constant 0 : index
    %c0_76 = arith.constant 0 : index
    %173 = vector.load %arg7[%c0_74, %c1, %c0_75, %c0_76] : memref<1x2x48x128xf32, #tpu.memory_space<vmem>>, vector<1x1x48x128xf32>
    %174 = vector.shape_cast %173 : vector<1x1x48x128xf32> to vector<48x128xf32>
    %175 = vector.shape_cast %172 : vector<48x128xf32> to vector<1x1x48x128xf32>
    tpu.vector_store %arg7[%c0_74, %c1, %c0_75, %c0_76], %175 {strides = array<i32>} : memref<1x2x48x128xf32, #tpu.memory_space<vmem>>, vector<1x1x48x128xf32>,
    return
  }
  func.func @transform_0(%arg0: i32, %arg1: i32, %arg2: memref<1xi32, #tpu.memory_space<smem>>) -> (i32, i32, i32, i32) {
    %c0_i32 = arith.constant 0 : i32
    %c0_i32_0 = arith.constant 0 : i32
    %c0_i32_1 = arith.constant 0 : i32
    return %arg0, %arg1, %c0_i32, %c0_i32_0 : i32, i32, i32, i32
  }
  func.func @transform_1(%arg0: i32, %arg1: i32, %arg2: memref<1xi32, #tpu.memory_space<smem>>) -> (i32, i32, i32, i32) {
    %c0_i32 = arith.constant 0 : i32
    %c0_i32_0 = arith.constant 0 : i32
    %c0_i32_1 = arith.constant 0 : i32
    return %arg0, %arg1, %c0_i32, %c0_i32_0 : i32, i32, i32, i32
  }
  func.func @transform_2(%arg0: i32, %arg1: i32, %arg2: memref<1xi32, #tpu.memory_space<smem>>) -> (i32, i32, i32, i32) {
    %c0_i32 = arith.constant 0 : i32
    %c0_i32_0 = arith.constant 0 : i32
    %c0_i32_1 = arith.constant 0 : i32
    return %arg0, %arg1, %c0_i32, %c0_i32_0 : i32, i32, i32, i32
  }
  func.func @transform_3(%arg0: i32, %arg1: i32, %arg2: memref<1xi32, #tpu.memory_space<smem>>) -> (i32, i32, i32, i32) {
    %c0_i32 = arith.constant 0 : i32
    %c0_i32_0 = arith.constant 0 : i32
    %c0_i32_1 = arith.constant 0 : i32
    %c0_i32_2 = arith.constant 0 : i32
    %c0_i32_3 = arith.constant 0 : i32
    return %c0_i32, %c0_i32_0, %c0_i32_1, %c0_i32_2 : i32, i32, i32, i32
  }
  func.func @transform_4(%arg0: i32, %arg1: i32, %arg2: memref<1xi32, #tpu.memory_space<smem>>) -> (i32, i32, i32, i32) {
    %c0_i32 = arith.constant 0 : i32
    %c0_i32_0 = arith.constant 0 : i32
    %c0_i32_1 = arith.constant 0 : i32
    return %arg0, %arg1, %c0_i32, %c0_i32_0 : i32, i32, i32, i32
  }
}

</mosaic_0001>

<bundles_post_ra>
// kernel: tpu_custom_call.1
= control target key start
LH: loop header
LB: loop body
LE: loop exit
PB: predicated region body
PF: predicated region fallthrough
CT: control target
= control target key end

     0   :  { %s6327_s0 = inlined_call_operand.<no memory space> [shape: s32[1], index: 0, kind: input, shape index: {}]   ;;  %s6328_s1 = inlined_call_operand.vmem [shape: f32[2,8,48,32], index: 1, kind: input, shape index: {}]   ;;  %s6329_s2 = inlined_call_operand.vmem [shape: f32[2,8,48,32], index: 2, kind: input, shape index: {}]   ;;  %s6330_s3 = inlined_call_operand.vmem [shape: f32[2,8,48,32], index: 3, kind: input, shape index: {}]   ;;  %s6331_s4 = inlined_call_operand.vmem [shape: f32[1,1,48,48], index: 4, kind: input, shape index: {}]   ;;  %s6332_s5 = inlined_call_operand.hbm [shape: f32[2,2,48,128], index: 5, kind: output, shape index: {}]  }
   0x1   :  { %10 = sst [smem:[#allocation3]] %s6327_s0 }
   0x2   :  { %11 = vsyncpa [#allocation5], 0 }
   0x3   :  { %13 = vsyncpa [#allocation5 + $0x1], 0  ;;  %s4327_s20 = smov 0   ;;  %s4329_s21 = smov 0  }
   0x4   :  { %s4331_s22 = smov 0   ;;  %s4333_s23 = smov 0  }
   0x5   :  { %s4335_s24 = smov 0   ;;  %s4337_s25 = smov 0  }
   0x6 LB: > { %s3428_s0 = sadd.s32 4294967295, %s4284_s25   ;;  %s3429_s26 = sadd.s32 4294967294, %s4284_s25   ;;  %s4284_s25 = sphi %s4337_s25, %s19_s25   ;;  %s4280_s24 = sphi %s4335_s24, %s6523_s24   ;;  %s4276_s23 = sphi %s4333_s23, %s6522_s23   ;;  %s4272_s22 = sphi %s4331_s22, %s6521_s22   ;;  %s4268_s21 = sphi %s4329_s21, %s6520_s21   ;;  %s4264_s20 = sphi %s4327_s20, %s6519_s20  }
   0x7   : > { %s31_s27 = sadd.s32 1, %s4280_s24  ;;  %s145_s28 = sadd.s32 1, %s4272_s22 }
   0x8   : > { %p33_p0 = scmp.ge.s32.totalorder %s31_s27, 2  ;;  %p155_p1 = scmp.ne.s32.totalorder %s4272_s22, %s4268_s21 }
   0x9   : > { %p156_p2 = scmp.eq.s32.totalorder %s3428_s0, 1  ;;  %p161_p3 = scmp.ne.s32.totalorder %s4268_s21, %s4264_s20 }
   0xa   : > { %s6525_s27 = smov (%p33_p0, %s31_s27), 0  ;;  %p162_p5 = scmp.eq.s32.totalorder %s3429_s26, 1 }
   0xb   : > { %p4367_p4 = por %p156_p2, %p155_p1  ;;  %s140_s30 = ssub.s32 %s4280_s24, %s6525_s27 }
   0xc   : > { %p3432_p6 = scmp.ge.s32.totalorder %s4284_s25, 1  ;;  %p143_p7 = scmp.eq.s32.totalorder %s140_s30, 0 }
   0xd   : > { %p4374_p8 = por %p162_p5, %p161_p3  ;;  %p225_p9 = scmp.lt.s32.totalorder %s4284_s25, 3 }
   0xe   : > { %s4380_s7 = scalar_select %p143_p7, %s4272_s22, %s145_s28  }
   0xf   : > { %p226_p10 = pnand %p3432_p6, %p225_p9 }
  0x11   : > { %229 = sbr.rel (%p226_p10) target bundleno = 1329 (0x531), region = 36 }
  0x18   : > { %p277_p11 = scmp.lt.s32.totalorder %s4276_s23, 1  ;;  %v6333_v0 = vmov 0.0   ;;  %vm4287_vm0 = vmmov 0   ;;  %vm449_vm1 = vcmask 261120   ;;  %vm750_vm2 = vcmask 392192   ;;  %s1057_s17 = sld [smem:[#allocation3]] }
  0x19   : > { %3661 = vmatprep.subr.bf16.mxu0 %v6333_v0  ;;  %3679 = vmatprep.subr.bf16.mxu1 %v6333_v0  ;;  %s1059_s19 = smul.u32 2246822507, %s4276_s23 }
  0x1a   : > { %s278_s8 = scalar_select %p277_p11, %s4276_s23, 1  ;;  %3667 = vmatprep.mubr.msk.bf16.mxu0 %vm4287_vm0, %v6333_v0  ;;  %3685 = vmatprep.mubr.msk.bf16.mxu1 %vm4287_vm0, %v6333_v0 }
  0x1c   : > { %s4390_s9 = smul.u32 384, %s278_s8 }
  0x1e   : > { %s4396_s12 = scalar_lea.vmem %s6329_s2, %s4390_s9  ;;  %s4421_s15 = scalar_lea.vmem %s6328_s1, %s4390_s9 }
  0x1f   : > { %v371_v1 = vld [vmem:[%s4396_s12] sm:$0xff]  ;;  %v372_v2 = vld [vmem:[%s4396_s12 + $0x8] sm:$0xff]  ;;  %v377_v3 = vld [vmem:[%s4396_s12 + $0x30] sm:$0xff]  ;;  %s4516_s18 = scalar_lea.vmem %s6330_s3, %s4390_s9  ;;  %s1058_s0 = smul.u32 2654435769, %s1057_s17 }
  0x20   : > { %v395_v4 = vpack.c.bf16 %v372_v2, %v371_v1  ;;  %v378_v5 = vld [vmem:[%s4396_s12 + $0x38] sm:$0xff]  ;;  %v373_v7 = vld [vmem:[%s4396_s12 + $0x10] sm:$0xff]  ;;  %v379_v10 = vld [vmem:[%s4396_s12 + $0x40] sm:$0xff] }
  0x21   : > { %v398_v6 = vpack.c.bf16 %v378_v5, %v377_v3  ;;  %v374_v8 = vld [vmem:[%s4396_s12 + $0x18] sm:$0xff]  ;;  %v380_v11 = vld [vmem:[%s4396_s12 + $0x48] sm:$0xff]  ;;  %v375_v17 = vld [vmem:[%s4396_s12 + $0x20] sm:$0xff]  ;;  %s1060_s26 = sadd.s32 %s1059_s19, %s1058_s0 }
  0x22   : > { %v460_v9 = vsel %vm449_vm1, %v395_v4, 0  ;;  %v396_v13 = vpack.c.bf16 %v374_v8, %v373_v7  ;;  %v399_v14 = vpack.c.bf16 %v380_v11, %v379_v10  ;;  %v376_v18 = vld [vmem:[%s4396_s12 + $0x28] sm:$0xff]  ;;  %v381_v19 = vld [vmem:[%s4396_s12 + $0x50] sm:$0xff]  ;;  %v382_v20 = vld [vmem:[%s4396_s12 + $0x58] sm:$0xff]  ;;  %s1061_s28 = sshrl.u32 %s1060_s26, 16 }
  0x23   : > { %3662 = vmatpush3.bf16.xpose.msra.mxu0 %v460_v9  ;;  %v535_v12 = vsel %vm449_vm1, %v398_v6, 0  ;;  %v397_v21 = vpack.c.bf16 %v376_v18, %v375_v17  ;;  %v400_v22 = vpack.c.bf16 %v382_v20, %v381_v19  ;;  %v311_v23 = vld [vmem:[%s4421_s15] sm:$0xff]  ;;  %v312_v24 = vld [vmem:[%s4421_s15 + $0x8] sm:$0xff]  ;;  %v317_v26 = vld [vmem:[%s4421_s15 + $0x30] sm:$0xff]  ;;  %s1062_s30 = sxor.u32 %s1061_s28, %s1060_s26 }
  0x24   : > { %3680 = vmatpush3.bf16.xpose.msra.mxu1 %v535_v12  ;;  %3663 = vmatprep.subr.bf16.mxu0 %v6333_v0  ;;  %v463_v15 = vsel %vm449_vm1, %v396_v13, 0  ;;  %v538_v16 = vsel %vm449_vm1, %v399_v14, 0  ;;  %v318_v27 = vld [vmem:[%s4421_s15 + $0x38] sm:$0xff]  ;;  %v383_v29 = vld [vmem:[%s4396_s12 + $0x60] sm:$0xff]  ;;  %v384_v30 = vld [vmem:[%s4396_s12 + $0x68] sm:$0xff] }
  0x25   : > { %3681 = vmatprep.subr.bf16.mxu1 %v6333_v0  ;;  %v466_v25 = vsel %vm449_vm1, %v397_v21, 0  ;;  %v541_v28 = vsel %vm449_vm1, %v400_v22, 0  ;;  %v335_v31 = vmul.f32 0.17677669, %v311_v23  ;;  %v336_v32 = vmul.f32 0.17677669, %v312_v24 }
  0x26   : > { %v389_v33 = vld [vmem:[%s4396_s12 + $0x90] sm:$0xff]  ;;  %v390_v34 = vld [vmem:[%s4396_s12 + $0x98] sm:$0xff]  ;;  %v341_v35 = vmul.f32 0.17677669, %v317_v26  ;;  %v342_v36 = vmul.f32 0.17677669, %v318_v27  ;;  %v401_v37 = vpack.c.bf16 %v384_v30, %v383_v29 }
  0x27   : > { %v404_v38 = vpack.c.bf16 %v390_v34, %v389_v33  ;;  %v359_v39 = vpack.c.bf16 %v336_v32, %v335_v31  ;;  %v313_v41 = vld [vmem:[%s4421_s15 + $0x10] sm:$0xff]  ;;  %v314_v42 = vld [vmem:[%s4421_s15 + $0x18] sm:$0xff]  ;;  %v319_v44 = vld [vmem:[%s4421_s15 + $0x40] sm:$0xff]  ;;  %s1063_s8 = smul.u32 2146121005, %s1062_s30 }
  0x28   : > { %v362_v40 = vpack.c.bf16 %v342_v36, %v341_v35  ;;  %v610_v43 = vsel %vm449_vm1, %v401_v37, 0  ;;  %v320_v45 = vld [vmem:[%s4421_s15 + $0x48] sm:$0xff]  ;;  %v385_v47 = vld [vmem:[%s4396_s12 + $0x70] sm:$0xff]  ;;  %v386_v48 = vld [vmem:[%s4396_s12 + $0x78] sm:$0xff]  ;;  %v337_v49 = vmul.f32 0.17677669, %v313_v41 }
  0x29   : > { %v685_v46 = vsel %vm449_vm1, %v404_v38, 0  ;;  %v338_v50 = vmul.f32 0.17677669, %v314_v42  ;;  %v391_v51 = vld [vmem:[%s4396_s12 + $0xa0] sm:$0xff]  ;;  %v392_v52 = vld [vmem:[%s4396_s12 + $0xa8] sm:$0xff]  ;;  %v402_v55 = vpack.c.bf16 %v386_v48, %v385_v47  ;;  %v321_v62 = vld [vmem:[%s4421_s15 + $0x50] sm:$0xff] }
  0x2a   : > { %v343_v53 = vmul.f32 0.17677669, %v319_v44  ;;  %v344_v54 = vmul.f32 0.17677669, %v320_v45  ;;  %v405_v56 = vpack.c.bf16 %v392_v52, %v391_v51  ;;  %v315_v59 = vld [vmem:[%s4421_s15 + $0x20] sm:$0xff]  ;;  %v316_v60 = vld [vmem:[%s4421_s15 + $0x28] sm:$0xff] }
  0x2b   : > { %3664 = vmatpush3.bf16.xpose.msra.mxu0 %v463_v15  ;;  %v360_v57 = vpack.c.bf16 %v338_v50, %v337_v49  ;;  %v613_v61 = vsel %vm449_vm1, %v402_v55, 0  ;;  %v322_v63 = vld [vmem:[%s4421_s15 + $0x58] sm:$0xff]  ;;  %v387_v2 = vld [vmem:[%s4396_s12 + $0x80] sm:$0xff]  ;;  %v388_v3 = vld [vmem:[%s4396_s12 + $0x88] sm:$0xff]  ;;  %v339_v4 = vmul.f32 0.17677669, %v315_v59 }
  0x2c   : > { %3682 = vmatpush3.bf16.xpose.msra.mxu1 %v538_v16  ;;  %3665 = vmatprep.subr.bf16.mxu0 %v6333_v0  ;;  %v363_v58 = vpack.c.bf16 %v344_v54, %v343_v53  ;;  %v688_v1 = vsel %vm449_vm1, %v405_v56, 0  ;;  %v340_v5 = vmul.f32 0.17677669, %v316_v60  ;;  %v393_v6 = vld [vmem:[%s4396_s12 + $0xb0] sm:$0xff]  ;;  %v394_v7 = vld [vmem:[%s4396_s12 + $0xb8] sm:$0xff]  ;;  %v403_v10 = vpack.c.bf16 %v388_v3, %v387_v2  ;;  %v323_v14 = vld [vmem:[%s4421_s15 + $0x60] sm:$0xff] }
  0x2d   : > { %3683 = vmatprep.subr.bf16.mxu1 %v6333_v0  ;;  %v345_v8 = vmul.f32 0.17677669, %v321_v62  ;;  %v346_v9 = vmul.f32 0.17677669, %v322_v63  ;;  %v406_v11 = vpack.c.bf16 %v394_v7, %v393_v6  ;;  %v324_v15 = vld [vmem:[%s4421_s15 + $0x68] sm:$0xff]  ;;  %v329_v17 = vld [vmem:[%s4421_s15 + $0x90] sm:$0xff] }
  0x2e   : > { %v361_v12 = vpack.c.bf16 %v340_v5, %v339_v4  ;;  %v616_v16 = vsel %vm449_vm1, %v403_v10, 0  ;;  %v330_v18 = vld [vmem:[%s4421_s15 + $0x98] sm:$0xff]  ;;  %v347_v20 = vmul.f32 0.17677669, %v323_v14  ;;  %v348_v21 = vmul.f32 0.17677669, %v324_v15 }
  0x2f   : > { %v364_v13 = vpack.c.bf16 %v346_v9, %v345_v8  ;;  %v691_v19 = vsel %vm449_vm1, %v406_v11, 0  ;;  %v353_v22 = vmul.f32 0.17677669, %v329_v17  ;;  %v354_v23 = vmul.f32 0.17677669, %v330_v18  ;;  %v325_v26 = vld [vmem:[%s4421_s15 + $0x70] sm:$0xff] }
  0x30   : > { %v365_v24 = vpack.c.bf16 %v348_v21, %v347_v20  ;;  %v326_v27 = vld [vmem:[%s4421_s15 + $0x78] sm:$0xff]  ;;  %v332_v29 = vld [vmem:[%s4421_s15 + $0xa8] sm:$0xff]  ;;  %v349_v30 = vmul.f32 0.17677669, %v325_v26  ;;  %v327_v36 = vld [vmem:[%s4421_s15 + $0x80] sm:$0xff]  ;;  %s1064_s9 = sshrl.u32 %s1063_s8, 15 }
  0x31   : > { %v350_v31 = vmul.f32 0.17677669, %v326_v27  ;;  %v356_v33 = vmul.f32 0.17677669, %v332_v29  ;;  %v328_v37 = vld [vmem:[%s4421_s15 + $0x88] sm:$0xff]  ;;  %v333_v38 = vld [vmem:[%s4421_s15 + $0xb0] sm:$0xff]  ;;  %s1065_s10 = sxor.u32 %s1064_s9, %s1063_s8 }
  0x32   : > { %v352_v41 = vmul.f32 0.17677669, %v328_v37  ;;  %v357_v42 = vmul.f32 0.17677669, %v333_v38  ;;  %v408_v47 = vld [vmem:[%s4516_s18 + $0x8] sm:$0xff]  ;;  %v4524_v49 = vld [vmem:[%s6331_s4] sm:$0xff] }
  0x33   : > { %3666 = vmatpush3.bf16.xpose.msra.mxu0 %v466_v25  ;;  %v368_v25 = vpack.c.bf16 %v354_v23, %v353_v22  ;;  %v366_v34 = vpack.c.bf16 %v350_v31, %v349_v30  ;;  %v4529_v51 = vld [vmem:[%s6331_s4 + $0x8] sm:$0xff]  ;;  %v4552_v3 = vld [vmem:[%s6331_s4 + $0x10] sm:$0xff]  ;;  %v4559_v6 = vld [vmem:[%s6331_s4 + $0x18] sm:$0xff]  ;;  %s1066_s11 = smul.u32 2221713035, %s1065_s10  ;;  %s4289_s8 = smov 64  }
  0x34   : > { %3684 = vmatpush3.bf16.xpose.msra.mxu1 %v541_v28  ;;  %3697 = vmatprep.subr.bf16.mxu0 %v6333_v0  ;;  %v331_v28 = vld [vmem:[%s4421_s15 + $0xa0] sm:$0xff]  ;;  %s4290_s9 = smov 96   ;;  %s273_s10 = sand.u32 1, %s4268_s21  }
  0x35   : > { %3715 = vmatprep.subr.bf16.mxu1 %v6333_v0  ;;  %v355_v32 = vmul.f32 0.17677669, %v331_v28  ;;  %v4582_v21 = vld [vmem:[%s6331_s4 + $0x20] sm:$0xff]  ;;  %s1067_s13 = sshrl.u32 %s1066_s11, 16 }
  0x36   : > { %s1068_s14 = sxor.u32 %s1067_s13, %s1066_s11  ;;  %s2542_s13 = sld [smem:[#allocation3]] }
  0x37   : > { %v369_v35 = vpack.c.bf16 %v356_v33, %v355_v32  ;;  %s3949_s11 = smul.u32 96, %s273_s10 }
  0x3a   : > { %3668 = vmatmul.mubr.msk.bf16.vlgmr.msra.gmra.mrb[0].mxu0 %vm449_vm1, %v359_v39  ;;  %v334_v39 = vld [vmem:[%s4421_s15 + $0xb8] sm:$0xff] }
  0x3b   : > { %3686 = vmatmul.mubr.msk.bf16.vlgmr.msra.gmra.mrb[0].mxu1 %vm449_vm1, %v362_v40  ;;  %3698 = vmatpush3.bf16.xpose.msra.mxu0 %v610_v43  ;;  %v351_v40 = vmul.f32 0.17677669, %v327_v36  ;;  %v358_v43 = vmul.f32 0.17677669, %v334_v39 }
  0x3c   : > { %3716 = vmatpush3.bf16.xpose.msra.mxu1 %v685_v46  ;;  %3671 = vmatprep.mubr.msk.bf16.mxu0 %vm4287_vm0, %v6333_v0  ;;  %v407_v46 = vld [vmem:[%s4516_s18] sm:$0xff] }
  0x3d   : > { %3699 = vmatprep.subr.bf16.mxu0 %v6333_v0  ;;  %3689 = vmatprep.mubr.msk.bf16.mxu1 %vm4287_vm0, %v6333_v0  ;;  %v367_v44 = vpack.c.bf16 %v352_v41, %v351_v40  ;;  %v370_v45 = vpack.c.bf16 %v358_v43, %v357_v42  ;;  %v431_v48 = vpack.c.bf16 %v408_v47, %v407_v46 }
  0x3e   : > { %3717 = vmatprep.subr.bf16.mxu1 %v6333_v0 }
  0x42   : > { %3672 = vmatmul.mubr.msk.bf16.gmra.mrb[4].mxu0 %vm449_vm1, %v360_v57 }
  0x43   : > { %3700 = vmatpush3.bf16.xpose.msra.mxu0 %v613_v61  ;;  %3690 = vmatmul.mubr.msk.bf16.gmra.mrb[4].mxu1 %vm449_vm1, %v363_v58 }
  0x44   : > { %3718 = vmatpush3.bf16.xpose.msra.mxu1 %v688_v1  ;;  %3675 = vmatprep.mubr.msk.bf16.mxu0 %vm4287_vm0, %v6333_v0 }
  0x45   : > { %3701 = vmatprep.subr.bf16.mxu0 %v6333_v0  ;;  %3693 = vmatprep.mubr.msk.bf16.mxu1 %vm4287_vm0, %v6333_v0 }
  0x46   : > { %3719 = vmatprep.subr.bf16.mxu1 %v6333_v0 }
  0x4a   : > { %3676 = vmatmul.mubr.msk.bf16.gmra.mrb[8].mxu0 %vm449_vm1, %v361_v12 }
  0x4b   : > { %3702 = vmatpush3.bf16.xpose.msra.mxu0 %v616_v16  ;;  %3694 = vmatmul.mubr.msk.bf16.gmra.mrb[8].mxu1 %vm449_vm1, %v364_v13 }
  0x4c   : > { %3720 = vmatpush3.bf16.xpose.msra.mxu1 %v691_v19  ;;  %3703 = vmatprep.mubr.msk.bf16.mxu0 %vm4287_vm0, %v6333_v0 }
  0x4d   : > { %3721 = vmatprep.mubr.msk.bf16.mxu1 %vm4287_vm0, %v6333_v0  ;;  %3733 = vmatprep.subr.bf16.mxu0 %v6333_v0 }
  0x4e   : > { %3751 = vmatprep.subr.bf16.mxu1 %v6333_v0 }
  0x52   : > { %3704 = vmatmul.mubr.msk.bf16.vlgmr.msra.gmra.mrb[12].mxu0 %vm449_vm1, %v365_v24  ;;  %v4589_v24 = vld [vmem:[%s6331_s4 + $0x28] sm:$0xff] }
  0x53   : > { %3722 = vmatmul.mubr.msk.bf16.vlgmr.msra.gmra.mrb[12].mxu1 %vm449_vm1, %v368_v25  ;;  %3707 = vmatprep.mubr.msk.bf16.mxu0 %vm4287_vm0, %v6333_v0 }
  0x54   : > { %3725 = vmatprep.mubr.msk.bf16.mxu1 %vm4287_vm0, %v6333_v0  ;;  %3734 = vmatpush3.bf16.msra.mxu0 %v431_v48 }
  0x55   : > { %3735 = vmatprep.subr.bf16.mxu0 %v6333_v0 }
  0x5a   : > { %3708 = vmatmul.mubr.msk.bf16.gmra.mrb[16].mxu0 %vm449_vm1, %v366_v34 }
  0x5b   : > { %3726 = vmatmul.mubr.msk.bf16.gmra.mrb[16].mxu1 %vm449_vm1, %v369_v35  ;;  %3711 = vmatprep.mubr.msk.bf16.mxu0 %vm4287_vm0, %v6333_v0 }
  0x5c   : > { %3729 = vmatprep.mubr.msk.bf16.mxu1 %vm4287_vm0, %v6333_v0 }
  0x62   : > { %3712 = vmatmul.mubr.msk.bf16.gmra.mrb[20].mxu0 %vm449_vm1, %v367_v44 }
  0x63   : > { %3730 = vmatmul.mubr.msk.bf16.gmra.mrb[20].mxu1 %vm449_vm1, %v370_v45  ;;  %3739 = vmatprep.mubr.msk.bf16.mxu0 %vm4287_vm0, %v6333_v0 }
  0x64   : > { %3757 = vmatprep.mubr.msk.bf16.mxu1 %vm4287_vm0, %v6333_v0 }
 0x10d   : > { %v502_v50 = vpop.f32.mrb[0].mxu0 }
 0x10e   : > { %v4532_v52 = vadd.f32 %v502_v50, %v4524_v49  ;;  %v577_v53 = vpop.f32.mrb[0].mxu1  ;;  %v3669_v54 = vpop.f32.mrb[1].mxu0 }
 0x10f   : > { %v4535_v55 = vadd.f32 %v577_v53, %v4524_v49  ;;  %v505_v56 = vpop.f32.mrb[2].mxu0  ;;  %v3687_v57 = vpop.f32.mrb[1].mxu1  ;;  %v413_v54 = vld [vmem:[%s4516_s18 + $0x30] sm:$0xff] }
 0x110   : > { %v4538_v58 = vadd.f32 %v505_v56, %v4529_v51  ;;  %v3670_v59 = vpop.f32.mrb[3].mxu0  ;;  %v580_v60 = vpop.f32.mrb[2].mxu1  ;;  %v751_v61 = vsel %vm750_vm2, %v4532_v52, -inf  ;;  %v414_v57 = vld [vmem:[%s4516_s18 + $0x38] sm:$0xff] }
 0x111   : > { %v4543_v62 = vadd.f32 %v580_v60, %v4529_v51  ;;  %v769_v63 = vsel %vm750_vm2, %v4535_v55, -inf  ;;  %v3688_v1 = vpop.f32.mrb[3].mxu1  ;;  %752 = vmax.xlane.f32.xlu0 %v751_v61  ;;  %v434_v61 = vpack.c.bf16 %v414_v57, %v413_v54 }
 0x112   : > { %770 = vmax.xlane.f32.xlu1 %v769_v63  ;;  %v754_v4 = vsel %vm750_vm2, %v4538_v58, -inf  ;;  %v409_v1 = vld [vmem:[%s4516_s18 + $0x10] sm:$0xff] }
 0x113   : > { %v772_v2 = vsel %vm750_vm2, %v4543_v62, -inf  ;;  %3752 = vmatpush3.bf16.msra.mxu1 %v434_v61 }
 0x114   : > { %3753 = vmatprep.subr.bf16.mxu1 %v6333_v0 }
 0x115   : > { %755 = vmax.xlane.f32.xlu0 %v754_v4  ;;  %v510_v5 = vpop.f32.mrb[4].mxu0  ;;  %v415_v4 = vld [vmem:[%s4516_s18 + $0x40] sm:$0xff] }
 0x116   : > { %773 = vmax.xlane.f32.xlu1 %v772_v2  ;;  %v4562_v7 = vadd.f32 %v510_v5, %v4552_v3  ;;  %v3673_v8 = vpop.f32.mrb[5].mxu0  ;;  %v585_v9 = vpop.f32.mrb[4].mxu1  ;;  %v410_v2 = vld [vmem:[%s4516_s18 + $0x18] sm:$0xff] }
 0x117   : > { %v513_v10 = vpop.f32.mrb[6].mxu0  ;;  %v4565_v11 = vadd.f32 %v585_v9, %v4552_v3  ;;  %v3691_v12 = vpop.f32.mrb[5].mxu1  ;;  %v432_v5 = vpack.c.bf16 %v410_v2, %v409_v1  ;;  %v416_v8 = vld [vmem:[%s4516_s18 + $0x48] sm:$0xff] }
 0x118   : > { %v4568_v13 = vadd.f32 %v513_v10, %v4559_v6  ;;  %v3674_v14 = vpop.f32.mrb[7].mxu0  ;;  %v757_v15 = vsel %vm750_vm2, %v4562_v7, -inf  ;;  %v588_v16 = vpop.f32.mrb[6].mxu1 }
 0x119   : > { %758 = vmax.xlane.f32.xlu0 %v757_v15  ;;  %v4573_v17 = vadd.f32 %v588_v16, %v4559_v6  ;;  %v3692_v18 = vpop.f32.mrb[7].mxu1  ;;  %v775_v20 = vsel %vm750_vm2, %v4565_v11, -inf  ;;  %v435_v14 = vpack.c.bf16 %v416_v8, %v415_v4  ;;  %3736 = vmatpush3.bf16.msra.mxu0 %v432_v5 }
 0x11a   : > { %v760_v19 = vsel %vm750_vm2, %v4568_v13, -inf  ;;  %3737 = vmatprep.subr.bf16.mxu0 %v6333_v0 }
 0x11b   : > { %761 = vmax.xlane.f32.xlu1 %v760_v19  ;;  %v778_v22 = vsel %vm750_vm2, %v4573_v17, -inf  ;;  %3754 = vmatpush3.bf16.msra.mxu1 %v435_v14 }
 0x11c   : > { %3755 = vmatprep.subr.bf16.mxu1 %v6333_v0 }
 0x11d   : > { %776 = vmax.xlane.f32.xlu0 %v775_v20  ;;  %v518_v23 = vpop.f32.mrb[8].mxu0 }
 0x11e   : > { %v4592_v25 = vadd.f32 %v518_v23, %v4582_v21  ;;  %v3677_v26 = vpop.f32.mrb[9].mxu0  ;;  %v593_v27 = vpop.f32.mrb[8].mxu1 }
 0x11f   : > { %779 = vmax.xlane.f32.xlu1 %v778_v22  ;;  %v521_v28 = vpop.f32.mrb[10].mxu0  ;;  %v4595_v29 = vadd.f32 %v593_v27, %v4582_v21  ;;  %v3695_v30 = vpop.f32.mrb[9].mxu1  ;;  %v411_v26 = vld [vmem:[%s4516_s18 + $0x20] sm:$0xff]  ;;  %v412_v27 = vld [vmem:[%s4516_s18 + $0x28] sm:$0xff] }
 0x120   : > { %v4598_v31 = vadd.f32 %v521_v28, %v4589_v24  ;;  %v3678_v32 = vpop.f32.mrb[11].mxu0  ;;  %v763_v33 = vsel %vm750_vm2, %v4592_v25, -inf  ;;  %v596_v34 = vpop.f32.mrb[10].mxu1  ;;  %v417_v28 = vld [vmem:[%s4516_s18 + $0x50] sm:$0xff] }
 0x121   : > { %764 = vmax.xlane.f32.xlu0 %v763_v33  ;;  %v4603_v35 = vadd.f32 %v596_v34, %v4589_v24  ;;  %v3696_v36 = vpop.f32.mrb[11].mxu1  ;;  %v781_v38 = vsel %vm750_vm2, %v4595_v29, -inf  ;;  %v418_v32 = vld [vmem:[%s4516_s18 + $0x58] sm:$0xff] }
 0x122   : > { %v766_v37 = vsel %vm750_vm2, %v4598_v31, -inf  ;;  %v433_v36 = vpack.c.bf16 %v412_v27, %v411_v26 }
 0x123   : > { %767 = vmax.xlane.f32.xlu1 %v766_v37  ;;  %v784_v39 = vsel %vm750_vm2, %v4603_v35, -inf  ;;  %v436_v37 = vpack.c.bf16 %v418_v32, %v417_v28 }
 0x124   : > { %3738 = vmatpush3.bf16.msra.mxu0 %v433_v36 }
 0x125   : > { %782 = vmax.xlane.f32.xlu0 %v781_v38  ;;  %v652_v40 = vpop.f32.mrb[12].mxu0  ;;  %3756 = vmatpush3.bf16.msra.mxu1 %v436_v37 }
 0x126   : > { %v4612_v41 = vadd.f32 %v652_v40, %v4524_v49  ;;  %v3705_v42 = vpop.f32.mrb[13].mxu0  ;;  %v727_v43 = vpop.f32.mrb[12].mxu1  ;;  %3769 = vmatprep.subr.bf16.mxu0 %v6333_v0  ;;  %3787 = vmatprep.subr.bf16.mxu1 %v6333_v0 }
 0x127   : > { %785 = vmax.xlane.f32.xlu1 %v784_v39  ;;  %v655_v44 = vpop.f32.mrb[14].mxu0  ;;  %v4615_v45 = vadd.f32 %v727_v43, %v4524_v49  ;;  %v3723_v46 = vpop.f32.mrb[13].mxu1 }
 0x128   : > { %v4618_v47 = vadd.f32 %v655_v44, %v4529_v51  ;;  %v3706_v48 = vpop.f32.mrb[15].mxu0  ;;  %v787_v50 = vsel %vm750_vm2, %v4612_v41, -inf  ;;  %v730_v53 = vpop.f32.mrb[14].mxu1 }
 0x129   : > { %6380 = vst [vmem:[#allocation7_spill] sm:$0xff] %v4615_v45  ;;  %788 = vmax.xlane.f32.xlu0 %v787_v50  ;;  %v4624_v56 = vadd.f32 %v730_v53, %v4529_v51  ;;  %v3724_v49 = vpop.f32.mrb[15].mxu1  ;;  %v805_v60 = vsel %vm750_vm2, %v4615_v45, -inf  ;;  %v4825_v45 = vld [vmem:[%s4516_s18 + $0xb8] sm:$0xff] }
 0x12a   : > { %v790_v59 = vsel %vm750_vm2, %v4618_v47, -inf }
 0x12b   : > { %6381 = vst [vmem:[#allocation8_spill] sm:$0xff] %v4624_v56  ;;  %791 = vmax.xlane.f32.xlu1 %v790_v59  ;;  %v808_v63 = vsel %vm750_vm2, %v4624_v56, -inf }
 0x12d   : > { %806 = vmax.xlane.f32.xlu0 %v805_v60  ;;  %v660_v51 = vpop.f32.mrb[16].mxu0 }
 0x12e   : > { %v4639_v9 = vadd.f32 %v660_v51, %v4552_v3  ;;  %v3709_v10 = vpop.f32.mrb[17].mxu0  ;;  %v735_v12 = vpop.f32.mrb[16].mxu1 }
 0x12f   : > { %809 = vmax.xlane.f32.xlu1 %v808_v63  ;;  %v663_v15 = vpop.f32.mrb[18].mxu0  ;;  %v4642_v16 = vadd.f32 %v735_v12, %v4552_v3  ;;  %v3727_v18 = vpop.f32.mrb[17].mxu1  ;;  %v4700_v10 = vstv %s1068_s14  ;;  %s2543_s14 = smul.u32 2654435769, %s2542_s13  ;;  %s6176_s13 = scalar_lea.vmem [#allocation4], %s3949_s11 }
 0x130   : > { %6382 = vst [vmem:[#allocation9_spill] sm:$0xff] %v4639_v9  ;;  %v4645_v19 = vadd.f32 %v663_v15, %v4559_v6  ;;  %v3710_v20 = vpop.f32.mrb[19].mxu0  ;;  %v793_v22 = vsel %vm750_vm2, %v4639_v9, -inf  ;;  %v738_v23 = vpop.f32.mrb[18].mxu1  ;;  %v4813_v9 = vld [vmem:[%s4516_s18 + $0x88] sm:$0xff] }
 0x131   : > { %6383 = vst [vmem:[#allocation10_spill] sm:$0xff] %v4642_v16  ;;  %794 = vmax.xlane.f32.xlu0 %v793_v22  ;;  %v4654_v3 = vadd.f32 %v738_v23, %v4559_v6  ;;  %v3728_v30 = vpop.f32.mrb[19].mxu1  ;;  %v811_v34 = vsel %vm750_vm2, %v4642_v16, -inf }
 0x132   : > { %6384 = vst [vmem:[#allocation11_spill] sm:$0xff] %v4645_v19  ;;  %v796_v33 = vsel %vm750_vm2, %v4645_v19, -inf }
 0x133   : > { %6385 = vst [vmem:[#allocation12_spill] sm:$0xff] %v4654_v3  ;;  %797 = vmax.xlane.f32.xlu1 %v796_v33  ;;  %v814_v38 = vsel %vm750_vm2, %v4654_v3, -inf }
 0x135   : > { %812 = vmax.xlane.f32.xlu0 %v811_v34  ;;  %v668_v6 = vpop.f32.mrb[20].mxu0 }
 0x136   : > { %v4666_v39 = vadd.f32 %v668_v6, %v4582_v21  ;;  %v3713_v40 = vpop.f32.mrb[21].mxu0  ;;  %v743_v42 = vpop.f32.mrb[20].mxu1 }
 0x137   : > { %815 = vmax.xlane.f32.xlu1 %v814_v38  ;;  %v671_v43 = vpop.f32.mrb[22].mxu0  ;;  %v4670_v44 = vadd.f32 %v743_v42, %v4582_v21  ;;  %v3731_v46 = vpop.f32.mrb[21].mxu1 }
 0x138   : > { %6386 = vst [vmem:[#allocation13_spill] sm:$0xff] %v4666_v39  ;;  %v4673_v48 = vadd.f32 %v671_v43, %v4589_v24  ;;  %v3714_v50 = vpop.f32.mrb[23].mxu0  ;;  %v799_v53 = vsel %vm750_vm2, %v4666_v39, -inf  ;;  %v746_v54 = vpop.f32.mrb[22].mxu1 }
 0x139   : > { %6387 = vst [vmem:[#allocation14_spill] sm:$0xff] %v4670_v44  ;;  %800 = vmax.xlane.f32.xlu0 %v799_v53  ;;  %v4678_v49 = vadd.f32 %v746_v54, %v4589_v24  ;;  %v3732_v57 = vpop.f32.mrb[23].mxu1  ;;  %v817_v59 = vsel %vm750_vm2, %v4670_v44, -inf  ;;  %v967_v24 = vlaneseq }
 0x13a   : > { %6388 = vst [vmem:[#allocation15_spill] sm:$0xff] %v4673_v48  ;;  %v802_v21 = vsel %vm750_vm2, %v4673_v48, -inf }
 0x13b   : > { %6389 = vst [vmem:[#allocation16_spill] sm:$0xff] %v4678_v49  ;;  %803 = vmax.xlane.f32.xlu1 %v802_v21  ;;  %v820_v60 = vsel %vm750_vm2, %v4678_v49, -inf  ;;  %v4689_v61 = vshrl.u32 %v967_v24, 7  ;;  %v4695_v2 = vand.u32 127, %v967_v24 }
 0x13d   : > { %818 = vmax.xlane.f32.xlu0 %v817_v59  ;;  %6390 = vst [vmem:[#allocation17_spill] sm:$0xff] %v4689_v61  ;;  %v991_v63 = vadd.s32 48, %v4689_v61  ;;  %v4693_v1 = vadd.s32 8, %v4689_v61  ;;  %v1009_v51 = vmul.u32 48, %v4689_v61  ;;  %v4709_v26 = vadd.s32 16, %v4689_v61 }
 0x13e   : > { %v4712_v28 = vadd.s32 24, %v4689_v61  ;;  %v997_v37 = vadd.s32 96, %v4689_v61  ;;  %v1003_v6 = vadd.s32 144, %v4689_v61 }
 0x13f   : > { %821 = vmax.xlane.f32.xlu1 %v820_v60  ;;  %6391 = vst [vmem:[#allocation18_spill] sm:$0xff] %v4693_v1  ;;  %v1015_v4 = vmul.u32 48, %v991_v63  ;;  %v992_v5 = vadd.s32 48, %v4693_v1  ;;  %v1033_v12 = vadd.s32 %v1009_v51, %v4695_v2  ;;  %v1010_v15 = vmul.u32 48, %v4693_v1  ;;  %6392 = vst [vmem:[#allocation19_spill] sm:$0xff] %v4709_v26 }
 0x140   : > { %6393 = vst [vmem:[#allocation20_spill] sm:$0xff] %v4712_v28  ;;  %v1011_v34 = vmul.u32 48, %v4709_v26  ;;  %v998_v38 = vadd.s32 96, %v4693_v1  ;;  %v1012_v40 = vmul.u32 48, %v4712_v28  ;;  %v1004_v46 = vadd.s32 144, %v4693_v1 }
 0x141   : > { %v1039_v8 = vadd.s32 %v1015_v4, %v4695_v2  ;;  %v1016_v14 = vmul.u32 48, %v992_v5  ;;  %v1070_v20 = vxor.u32 %v4700_v10, %v1033_v12  ;;  %v1034_v23 = vadd.s32 %v1010_v15, %v4695_v2 }
 0x142   : > { %v1035_v53 = vadd.s32 %v1011_v34, %v4695_v2  ;;  %v993_v54 = vadd.s32 48, %v4709_v26  ;;  %v994_v57 = vadd.s32 48, %v4712_v28  ;;  %v1021_v59 = vmul.u32 48, %v997_v37 }
 0x143   : > { %v1076_v18 = vxor.u32 %v4700_v10, %v1039_v8  ;;  %v1040_v22 = vadd.s32 %v1016_v14, %v4695_v2  ;;  %v1094_v30 = vshrl.u32 %v1070_v20, 16  ;;  %v1071_v33 = vxor.u32 %v4700_v10, %v1034_v23 }
 0x144   : > { %v1022_v60 = vmul.u32 48, %v998_v38  ;;  %v1027_v24 = vmul.u32 48, %v1003_v6  ;;  %v1036_v63 = vadd.s32 %v1012_v40, %v4695_v2  ;;  %v1072_v12 = vxor.u32 %v4700_v10, %v1035_v53 }
 0x145   : > { %v1100_v27 = vshrl.u32 %v1076_v18, 16  ;;  %v1077_v32 = vxor.u32 %v4700_v10, %v1040_v22  ;;  %v1118_v42 = vxor.u32 %v1094_v30, %v1070_v20  ;;  %v1095_v50 = vshrl.u32 %v1071_v33, 16 }
 0x146   : > { %v1028_v5 = vmul.u32 48, %v1004_v46  ;;  %v1017_v14 = vmul.u32 48, %v993_v54  ;;  %v4729_v20 = vadd.s32 32, %v4689_v61  ;;  %v1046_v23 = vadd.s32 %v1022_v60, %v4695_v2 }
 0x147   : > { %v1124_v36 = vxor.u32 %v1100_v27, %v1076_v18  ;;  %v1101_v43 = vshrl.u32 %v1077_v32, 16  ;;  %v1142_v4 = vmul.u32 2146121005, %v1118_v42  ;;  %v1119_v8 = vxor.u32 %v1095_v50, %v1071_v33 }
 0x148   : > { %v1018_v15 = vmul.u32 48, %v994_v57  ;;  %v1045_v18 = vadd.s32 %v1021_v59, %v4695_v2  ;;  %v1051_v27 = vadd.s32 %v1027_v24, %v4695_v2  ;;  %v1073_v30 = vxor.u32 %v4700_v10, %v1036_v63 }
 0x149   : > { %v1148_v21 = vmul.u32 2146121005, %v1124_v36  ;;  %v1125_v51 = vxor.u32 %v1101_v43, %v1077_v32  ;;  %v1166_v34 = vshrl.u32 %v1142_v4, 15  ;;  %v1052_v33 = vadd.s32 %v1028_v5, %v4695_v2 }
 0x14a   : > { %v1143_v36 = vmul.u32 2146121005, %v1119_v8  ;;  %v1096_v37 = vshrl.u32 %v1072_v12, 16  ;;  %v1041_v38 = vadd.s32 %v1017_v14, %v4695_v2  ;;  %v1042_v6 = vadd.s32 %v1018_v15, %v4695_v2 }
 0x14b   : > { %v1172_v22 = vshrl.u32 %v1148_v21, 15  ;;  %v1149_v32 = vmul.u32 2146121005, %v1125_v51  ;;  %v1082_v40 = vxor.u32 %v4700_v10, %v1045_v18  ;;  %v4739_v42 = vadd.s32 40, %v4689_v61 }
 0x14c   : > { %v1013_v43 = vmul.u32 48, %v4729_v20  ;;  %v1083_v50 = vxor.u32 %v4700_v10, %v1046_v23  ;;  %v1088_v53 = vxor.u32 %v4700_v10, %v1051_v27  ;;  %v1097_v54 = vshrl.u32 %v1073_v30, 16 }
 0x14d   : > { %6394 = vst [vmem:[#allocation21_spill] sm:$0xff] %v4739_v42  ;;  %v1196_v46 = vxor.u32 %v1172_v22, %v1148_v21  ;;  %v1190_v57 = vxor.u32 %v1166_v34, %v1142_v4  ;;  %v1173_v59 = vshrl.u32 %v1149_v32, 15  ;;  %v1089_v60 = vxor.u32 %v4700_v10, %v1052_v33 }
 0x14e   : > { %v1167_v24 = vshrl.u32 %v1143_v36, 15  ;;  %v1120_v63 = vxor.u32 %v1096_v37, %v1072_v12  ;;  %v1078_v51 = vxor.u32 %v4700_v10, %v1041_v38  ;;  %v1079_v5 = vxor.u32 %v4700_v10, %v1042_v6 }
 0x14f   : > { %v1106_v8 = vshrl.u32 %v1082_v40, 16  ;;  %v1014_v14 = vmul.u32 48, %v4739_v42  ;;  %v1037_v21 = vadd.s32 %v1013_v43, %v4695_v2  ;;  %v1220_v15 = vmul.u32 2221713035, %v1196_v46 }
 0x150   : > { %v1107_v18 = vshrl.u32 %v1083_v50, 16  ;;  %v1112_v22 = vshrl.u32 %v1088_v53, 16  ;;  %v1121_v23 = vxor.u32 %v1097_v54, %v1073_v30  ;;  %v1214_v27 = vmul.u32 2221713035, %v1190_v57 }
 0x151   : > { %v1197_v4 = vxor.u32 %v1173_v59, %v1149_v32  ;;  %v1113_v34 = vshrl.u32 %v1089_v60, 16  ;;  %v1191_v0 = vxor.u32 %v1167_v24, %v1143_v36  ;;  %v1144_v33 = vmul.u32 2146121005, %v1120_v63 }
 0x152   : > { %v1102_v1 = vshrl.u32 %v1078_v51, 16  ;;  %v1103_v12 = vshrl.u32 %v1079_v5, 16  ;;  %v1130_v37 = vxor.u32 %v1106_v8, %v1082_v40  ;;  %v1038_v38 = vadd.s32 %v1014_v14, %v4695_v2 }
 0x153   : > { %v1074_v6 = vxor.u32 %v4700_v10, %v1037_v21  ;;  %v995_v61 = vadd.s32 48, %v4729_v20  ;;  %v1244_v49 = vshrl.u32 %v1220_v15, 16  ;;  %v1131_v43 = vxor.u32 %v1107_v18, %v1083_v50 }
 0x154   : > { %v1136_v46 = vxor.u32 %v1112_v22, %v1088_v53  ;;  %v1145_v44 = vmul.u32 2146121005, %v1121_v23  ;;  %v1238_v48 = vshrl.u32 %v1214_v27, 16  ;;  %v1221_v30 = vmul.u32 2221713035, %v1197_v4 }
 0x155   : > { %v1137_v54 = vxor.u32 %v1113_v34, %v1089_v60  ;;  %v996_v32 = vadd.s32 48, %v4739_v42  ;;  %v1215_v36 = vmul.u32 2221713035, %v1191_v0  ;;  %v1168_v57 = vshrl.u32 %v1144_v33, 15 }
 0x156   : > { %v1126_v59 = vxor.u32 %v1102_v1, %v1078_v51  ;;  %v1127_v24 = vxor.u32 %v1103_v12, %v1079_v5  ;;  %v1154_v40 = vmul.u32 2146121005, %v1130_v37  ;;  %v1075_v63 = vxor.u32 %v4700_v10, %v1038_v38 }
 0x157   : > { %v1098_v8 = vshrl.u32 %v1074_v6, 16  ;;  %v1019_v14 = vmul.u32 48, %v995_v61  ;;  %v1155_v21 = vmul.u32 2146121005, %v1131_v43  ;;  %v1169_v3 = vshrl.u32 %v1145_v44, 15 }
 0x158   : > { %v1160_v39 = vmul.u32 2146121005, %v1136_v46  ;;  %v4754_v50 = vxor.u32 %v1244_v49, %v1220_v15  ;;  %v4756_v53 = vxor.u32 %v1238_v48, %v1214_v27  ;;  %v1161_v18 = vmul.u32 2146121005, %v1137_v54  ;;  %v4765_v54 = vld [vmem:[%s4516_s18 + $0x60] sm:$0xff] }
 0x159   : > { %v1020_v60 = vmul.u32 48, %v996_v32  ;;  %v1245_v22 = vshrl.u32 %v1221_v30, 16  ;;  %v1192_v23 = vxor.u32 %v1168_v57, %v1144_v33  ;;  %v1150_v0 = vmul.u32 2146121005, %v1126_v59  ;;  %v4768_v32 = vld [vmem:[%s4516_s18 + $0x68] sm:$0xff] }
 0x15a   : > { %v1151_v4 = vmul.u32 2146121005, %v1127_v24  ;;  %v1099_v1 = vshrl.u32 %v1075_v63, 16  ;;  %v1122_v51 = vxor.u32 %v1098_v8, %v1074_v6  ;;  %v1043_v5 = vadd.s32 %v1019_v14, %v4695_v2 }
 0x15b   : > { %v1000_v61 = vadd.s32 96, %v4712_v28  ;;  %v1239_v34 = vshrl.u32 %v1215_v36, 16  ;;  %v1178_v12 = vshrl.u32 %v1154_v40, 15  ;;  %v1179_v49 = vshrl.u32 %v1155_v21, 15 }
 0x15c   : > { %v1193_v15 = vxor.u32 %v1169_v3, %v1145_v44  ;;  %v1184_v48 = vshrl.u32 %v1160_v39, 15  ;;  %v1185_v27 = vshrl.u32 %v1161_v18, 15  ;;  %v1044_v37 = vadd.s32 %v1020_v60, %v4695_v2  ;;  %v4774_v60 = vld [vmem:[%s4516_s18 + $0x90] sm:$0xff] }
 0x15d   : > { %v999_v33 = vadd.s32 96, %v4709_v26  ;;  %v4762_v38 = vxor.u32 %v1245_v22, %v1221_v30  ;;  %v1216_v6 = vmul.u32 2221713035, %v1192_v23  ;;  %v1174_v43 = vshrl.u32 %v1150_v0, 15  ;;  %v4777_v22 = vld [vmem:[%s4516_s18 + $0x98] sm:$0xff] }
 0x15e   : > { %v1175_v46 = vshrl.u32 %v1151_v4, 15  ;;  %v1123_v57 = vxor.u32 %v1099_v1, %v1075_v63  ;;  %v1146_v59 = vmul.u32 2146121005, %v1122_v51  ;;  %v1080_v3 = vxor.u32 %v4700_v10, %v1043_v5  ;;  %v4810_v1 = vld [vmem:[%s4516_s18 + $0x80] sm:$0xff] }
 0x15f   : > { %v1024_v44 = vmul.u32 48, %v1000_v61  ;;  %v4771_v24 = vxor.u32 %v1239_v34, %v1215_v36  ;;  %v1202_v8 = vxor.u32 %v1178_v12, %v1154_v40  ;;  %v1203_v14 = vxor.u32 %v1179_v49, %v1155_v21  ;;  %v4783_v36 = vld [vmem:[%s4516_s18 + $0x70] sm:$0xff]  ;;  %v4786_v40 = vld [vmem:[%s4516_s18 + $0x78] sm:$0xff] }
 0x160   : > { %v1217_v30 = vmul.u32 2221713035, %v1193_v15  ;;  %v1208_v23 = vxor.u32 %v1184_v48, %v1160_v39  ;;  %v1209_v16 = vxor.u32 %v1185_v27, %v1161_v18  ;;  %v1081_v19 = vxor.u32 %v4700_v10, %v1044_v37  ;;  %6395 = vst [vmem:[#allocation22_spill] sm:$0xff] %v4783_v36  ;;  %6396 = vst [vmem:[#allocation23_spill] sm:$0xff] %v4786_v40 }
 0x161   : > { %v1023_v63 = vmul.u32 48, %v999_v33  ;;  %v1240_v51 = vshrl.u32 %v1216_v6, 16  ;;  %v1198_v5 = vxor.u32 %v1174_v43, %v1150_v0  ;;  %v1199_v61 = vxor.u32 %v1175_v46, %v1151_v4 }
 0x162   : > { %v1147_v21 = vmul.u32 2146121005, %v1123_v57  ;;  %v1170_v34 = vshrl.u32 %v1146_v59, 15  ;;  %v1104_v12 = vshrl.u32 %v1080_v3, 16  ;;  %v1048_v39 = vadd.s32 %v1024_v44, %v4695_v2  ;;  %v4797_v44 = vld [vmem:[%s4516_s18 + $0xa0] sm:$0xff] }
 0x163   : > { %v1226_v18 = vmul.u32 2221713035, %v1202_v8  ;;  %v1227_v49 = vmul.u32 2221713035, %v1203_v14  ;;  %v1241_v48 = vshrl.u32 %v1217_v30, 16  ;;  %v1105_v4 = vshrl.u32 %v1081_v19, 16 }
 0x164   : > { %v1232_v27 = vmul.u32 2221713035, %v1208_v23  ;;  %v1233_v0 = vmul.u32 2221713035, %v1209_v16  ;;  %v1047_v37 = vadd.s32 %v1023_v63, %v4695_v2  ;;  %v4792_v33 = vxor.u32 %v1240_v51, %v1216_v6  ;;  %6397 = vst [vmem:[#allocation24_spill] sm:$0xff] %v4797_v44  ;;  %v4800_v8 = vld [vmem:[%s4516_s18 + $0xa8] sm:$0xff] }
 0x165   : > { %v1222_v46 = vmul.u32 2221713035, %v1198_v5  ;;  %v1223_v57 = vmul.u32 2221713035, %v1199_v61  ;;  %6398 = vst [vmem:[#allocation25_spill] sm:$0xff] %v4800_v8  ;;  %v1171_v14 = vshrl.u32 %v1147_v21, 15  ;;  %v4802_v15 = vxor.u32 %v1170_v34, %v1146_v59 }
 0x166   : > { %v1128_v16 = vxor.u32 %v1104_v12, %v1080_v3  ;;  %v1085_v23 = vxor.u32 %v4700_v10, %v1048_v39  ;;  %v1250_v6 = vshrl.u32 %v1226_v18, 16  ;;  %v4805_v63 = vxor.u32 %v1241_v48, %v1217_v30  ;;  %v4819_v48 = vld [vmem:[%s4516_s18 + $0xb0] sm:$0xff] }
 0x167   : > { %v1005_v51 = vadd.s32 144, %v4709_v26  ;;  %v1006_v5 = vadd.s32 144, %v4712_v28  ;;  %v1251_v61 = vshrl.u32 %v1227_v49, 16  ;;  %v1256_v43 = vshrl.u32 %v1232_v27, 16 }
 0x168   : > { %v1129_v59 = vxor.u32 %v1105_v4, %v1081_v19  ;;  %v1084_v3 = vxor.u32 %v4700_v10, %v1047_v37  ;;  %v1257_v34 = vshrl.u32 %v1233_v0, 16  ;;  %v1246_v12 = vshrl.u32 %v1222_v46, 16 }
 0x169   : > { %v1247_v39 = vshrl.u32 %v1223_v57, 16  ;;  %v4821_v26 = vxor.u32 %v1171_v14, %v1147_v21  ;;  %v1218_v28 = vmul.u32 2221713035, %v4802_v15  ;;  %v1152_v56 = vmul.u32 2146121005, %v1128_v16 }
 0x16a   : > { %v1109_v19 = vshrl.u32 %v1085_v23, 16  ;;  %v4827_v4 = vxor.u32 %v1250_v6, %v1226_v18  ;;  %v1029_v36 = vmul.u32 48, %v1005_v51  ;;  %v1030_v40 = vmul.u32 48, %v1006_v5  ;;  %v4844_v51 = vld [vmem:[%s4396_s12 + $0xc0] sm:$0xff]  ;;  %v4847_v5 = vld [vmem:[%s4396_s12 + $0xc8] sm:$0xff] }
 0x16b   : > { %v4831_v30 = vxor.u32 %v1251_v61, %v1227_v49  ;;  %v4833_v21 = vxor.u32 %v1256_v43, %v1232_v27  ;;  %v1153_v15 = vmul.u32 2146121005, %v1129_v59  ;;  %v1108_v14 = vshrl.u32 %v1084_v3, 16  ;;  %v4852_v59 = vld [vmem:[%s4396_s12 + $0xf0] sm:$0xff] }
 0x16c   : > { %v4835_v44 = vxor.u32 %v1257_v34, %v1233_v0  ;;  %v4837_v8 = vxor.u32 %v1246_v12, %v1222_v46  ;;  %v4839_v18 = vxor.u32 %v1247_v39, %v1223_v57  ;;  %v1219_v43 = vmul.u32 2221713035, %v4821_v26  ;;  %6401 = vst [vmem:[#allocation28_spill] sm:$0xff] %v4852_v59  ;;  %v4855_v0 = vld [vmem:[%s4396_s12 + $0xf8] sm:$0xff] }
 0x16d   : > { %6399 = vst [vmem:[#allocation26_spill] sm:$0xff] %v4833_v21  ;;  %v1176_v61 = vshrl.u32 %v1152_v56, 15  ;;  %6402 = vst [vmem:[#allocation29_spill] sm:$0xff] %v4855_v0  ;;  %v1133_v46 = vxor.u32 %v1109_v19, %v1085_v23  ;;  %v1242_v34 = vshrl.u32 %v1218_v28, 16  ;;  %v1053_v12 = vadd.s32 %v1029_v36, %v4695_v2 }
 0x16e   : > { %6400 = vst [vmem:[#allocation27_spill] sm:$0xff] %v4835_v44  ;;  %v1054_v39 = vadd.s32 %v1030_v40, %v4695_v2  ;;  %v1177_v37 = vshrl.u32 %v1153_v15, 15  ;;  %v1001_v23 = vadd.s32 96, %v4729_v20  ;;  %v1243_v40 = vshrl.u32 %v1219_v43, 16 }
 0x16f   : > { %vm1286_vm3 = vcmp.ge.u32.totalorder %v4756_v53, 1444339130  ;;  %vm1287_vm4 = vcmp.ge.u32.totalorder %v4771_v24, 1444339130  ;;  %vm1292_vm5 = vcmp.ge.u32.totalorder %v4754_v50, 1444339130 }
 0x170   : > { %v4876_v59 = vxor.u32 %v1177_v37, %v1153_v15  ;;  %vm1293_vm6 = vcmp.ge.u32.totalorder %v4762_v38, 1444339130  ;;  %vm1289_vm7 = vcmp.ge.u32.totalorder %v4805_v63, 1444339130  ;;  %vm1288_vm8 = vcmp.ge.u32.totalorder %v4792_v33, 1444339130 }
 0x171   : > { %vm1294_vm9 = vcmp.ge.u32.totalorder %v4837_v8, 1444339130  ;;  %vm1295_vm10 = vcmp.ge.u32.totalorder %v4839_v18, 1444339130  ;;  %v6410_v33 = vld [vmem:[#allocation25_spill] sm:$0xff]  ;;  %v6414_v18 = vpack.c.bf16 %v4813_v9, %v4810_v1 }
 0x172   : > { %vm1299_vm15 = vcmp.ge.u32.totalorder %v4831_v30, 1444339130 }
 0x19e   : > { %v753_v16 = vpop.xlane.xlu0 %752 }
 0x19f   : > { %v771_v49 = vpop.xlane.xlu1 %770  ;;  %v823_v27 = vsub.f32 %v4532_v52, %v753_v16  ;;  %v4862_v16 = vxor.u32 %v1108_v14, %v1084_v3  ;;  %v4872_v3 = vxor.u32 %v1242_v34, %v1218_v28  ;;  %v1090_v14 = vxor.u32 %v4700_v10, %v1053_v12 }
 0x1a0   : > { %v829_v57 = vsub.f32 %v4535_v55, %v771_v49  ;;  %v1002_v55 = vadd.s32 96, %v4739_v42  ;;  %v4869_v49 = vxor.u32 %v1176_v61, %v1152_v56  ;;  %v1007_v61 = vadd.s32 144, %v4729_v20 }
 0x1a1   : > { %v847_v6 = vmul.f32 1.442695, %v823_v27  ;;  %v1157_v27 = vmul.u32 2146121005, %v1133_v46  ;;  %v1156_v0 = vmul.u32 2146121005, %v4862_v16 }
 0x1a2   : > { %v859_v26 = vmul.f32 1.442695, %v829_v57  ;;  %v756_v44 = vpop.xlane.xlu0 %755  ;;  %v1091_v57 = vxor.u32 %v4700_v10, %v1054_v39  ;;  %v1026_v56 = vmul.u32 48, %v1002_v55  ;;  %v1224_v28 = vmul.u32 2221713035, %v4869_v49 }
 0x1a3   : > { %v774_v19 = vpop.xlane.xlu1 %773  ;;  %v824_v36 = vsub.f32 %v4538_v58, %v756_v44  ;;  %4014 = vpow2.f32 %v847_v6  ;;  %v1181_v6 = vshrl.u32 %v1157_v27, 15  ;;  %v1114_v15 = vshrl.u32 %v1090_v14, 16 }
 0x1a4   : > { %v830_v52 = vsub.f32 %v4543_v62, %v774_v19  ;;  %4016 = vpow2.f32 %v859_v26  ;;  %v1115_v46 = vshrl.u32 %v1091_v57, 16  ;;  %v1008_v34 = vadd.s32 144, %v4739_v42 }
 0x1a5   : > { %v849_v21 = vmul.f32 1.442695, %v824_v36  ;;  %v1225_v16 = vmul.u32 2221713035, %v4876_v59  ;;  %v1180_v26 = vshrl.u32 %v1156_v0, 15  ;;  %v1050_v55 = vadd.s32 %v1026_v56, %v4695_v2 }
 0x1a6   : > { %v861_v58 = vmul.f32 1.442695, %v830_v52  ;;  %v759_v44 = vpop.xlane.xlu0 %758  ;;  %v4888_v52 = vxor.u32 %v1243_v40, %v1219_v43  ;;  %v1031_v19 = vmul.u32 48, %v1007_v61  ;;  %v4895_v42 = vxor.u32 %v1114_v15, %v1090_v14 }
 0x1a7   : > { %4018 = vpow2.f32 %v849_v21  ;;  %v825_v62 = vsub.f32 %v4562_v7, %v759_v44  ;;  %v1025_v21 = vmul.u32 48, %v1001_v23  ;;  %v4893_v44 = vxor.u32 %v1181_v6, %v1157_v27 }
 0x1a8   : > { %4020 = vpow2.f32 %v861_v58  ;;  %v762_v37 = vpop.xlane.xlu1 %761  ;;  %v1248_v58 = vshrl.u32 %v1224_v28, 16  ;;  %v1032_v43 = vmul.u32 48, %v1008_v34  ;;  %v4902_v61 = vxor.u32 %v1180_v26, %v1156_v0 }
 0x1a9   : > { %v851_v12 = vmul.f32 1.442695, %v825_v62  ;;  %v826_v39 = vsub.f32 %v4568_v13, %v762_v37  ;;  %v4897_v13 = vxor.u32 %v1115_v46, %v1091_v57  ;;  %v1049_v40 = vadd.s32 %v1025_v21, %v4695_v2 }
 0x1aa   : > { %v777_v7 = vpop.xlane.xlu0 %776  ;;  %v1087_v27 = vxor.u32 %v4700_v10, %v1050_v55  ;;  %v1055_v14 = vadd.s32 %v1031_v19, %v4695_v2  ;;  %v4913_v34 = vxor.u32 %v1248_v58, %v1224_v28  ;;  %v1162_v0 = vmul.u32 2146121005, %v4895_v42 }
 0x1ab   : > { %v853_v36 = vmul.f32 1.442695, %v826_v39  ;;  %v831_v49 = vsub.f32 %v4565_v11, %v777_v7  ;;  %4022 = vpow2.f32 %v851_v12  ;;  %v1249_v11 = vshrl.u32 %v1225_v16, 16 }
 0x1ac   : > { %v780_v62 = vpop.xlane.xlu1 %779  ;;  %v1163_v12 = vmul.u32 2146121005, %v4897_v13  ;;  %v1056_v39 = vadd.s32 %v1032_v43, %v4695_v2  ;;  %v1086_v26 = vxor.u32 %v4700_v10, %v1049_v40  ;;  %vm1291_vm11 = vcmp.ge.u32.totalorder %v4888_v52, 1444339130  ;;  %v6419_v52 = vld [vmem:[#allocation27_spill] sm:$0xff] }
 0x1ad   : > { %4024 = vpow2.f32 %v853_v36  ;;  %v863_v23 = vmul.f32 1.442695, %v831_v49  ;;  %v832_v59 = vsub.f32 %v4573_v17, %v780_v62  ;;  %v4906_v6 = vpop.eup %4014  ;;  %v1229_v17 = vmul.u32 2221713035, %v4893_v44 }
 0x1ae   : > { %v765_v56 = vpop.xlane.xlu0 %764  ;;  %v4911_v15 = vpop.eup %4016  ;;  %v1310_v42 = vsel %vm1286_vm3, %v4906_v6, 0.0  ;;  %v1111_v36 = vshrl.u32 %v1087_v27, 16  ;;  %v4944_v50 = vxor.u32 %v1249_v11, %v1225_v16  ;;  %v1186_v38 = vshrl.u32 %v1162_v0, 15 }
 0x1af   : > { %4026 = vpow2.f32 %v863_v23  ;;  %v865_v57 = vmul.f32 1.442695, %v832_v59  ;;  %v827_v37 = vsub.f32 %v4592_v25, %v765_v56  ;;  %v1316_v49 = vsel %vm1292_vm5, %v4911_v15, 0.0 }
 0x1b0   : > { %v768_v46 = vpop.xlane.xlu1 %767  ;;  %v1093_v59 = vxor.u32 %v4700_v10, %v1056_v39  ;;  %v6404_v39 = vpack.c.bf16 %v4777_v22, %v4774_v60  ;;  %vm1290_vm12 = vcmp.ge.u32.totalorder %v4872_v3, 1444339130  ;;  %v1253_v60 = vshrl.u32 %v1229_v17, 16 }
 0x1b1   : > { %v4918_v21 = vpop.eup %4018  ;;  %4028 = vpow2.f32 %v865_v57  ;;  %v855_v7 = vmul.f32 1.442695, %v827_v37  ;;  %v828_v25 = vsub.f32 %v4598_v31, %v768_v46  ;;  %v1092_v31 = vxor.u32 %v4700_v10, %v1055_v14 }
 0x1b2   : > { %v4924_v28 = vpop.eup %4020  ;;  %v1311_v55 = vsel %vm1287_vm4, %v4918_v21, 0.0  ;;  %v783_v19 = vpop.xlane.xlu0 %782  ;;  %v1110_v57 = vshrl.u32 %v1086_v26, 16  ;;  %v4954_v37 = vxor.u32 %v1111_v36, %v1087_v27  ;;  %v1117_v22 = vshrl.u32 %v1093_v59, 16 }
 0x1b3   : > { %v1317_v58 = vsel %vm1293_vm6, %v4924_v28, 0.0  ;;  %v1334_v62 = vpack.c.bf16 %v1311_v55, %v1310_v42  ;;  %v857_v43 = vmul.f32 1.442695, %v828_v25  ;;  %4030 = vpow2.f32 %v855_v7 }
 0x1b4   : > { %v1337_v53 = vpack.c.bf16 %v1317_v58, %v1316_v49  ;;  %v833_v23 = vsub.f32 %v4595_v29, %v783_v19  ;;  %v786_v24 = vpop.xlane.xlu1 %785  ;;  %v6403_v29 = vpack.c.bf16 %v4768_v32, %v4765_v54  ;;  %v6405_v7 = vmov 0.0   ;;  %v6406_v49 = vld [vmem:[#allocation23_spill] sm:$0xff]  ;;  %v6407_v58 = vld [vmem:[#allocation22_spill] sm:$0xff] }
 0x1b5   : > { %4032 = vpow2.f32 %v857_v43  ;;  %v834_v40 = vsub.f32 %v4603_v35, %v786_v24  ;;  %3740 = vmatmul.mubr.msk.bf16.vlgmr.msra.gmra.mrb[24].mxu0 %vm750_vm2, %v1334_v62  ;;  %v4946_v56 = vpop.eup %4022  ;;  %v1187_v35 = vshrl.u32 %v1163_v12, 15  ;;  %v1228_v54 = vmul.u32 2221713035, %v4902_v61  ;;  %v6409_v24 = vld [vmem:[#allocation7_spill] sm:$0xff] }
 0x1b6   : > { %v867_v14 = vmul.f32 1.442695, %v833_v23  ;;  %3758 = vmatmul.mubr.msk.bf16.vlgmr.msra.gmra.mrb[24].mxu1 %vm750_vm2, %v1337_v53  ;;  %3770 = vmatpush3.bf16.msra.mxu0 %v6403_v29  ;;  %v789_v10 = vpop.xlane.xlu0 %788  ;;  %v1116_v32 = vshrl.u32 %v1092_v31, 16  ;;  %vm1296_vm13 = vcmp.ge.u32.totalorder %v4913_v34, 1444339130  ;;  %v4980_v63 = vxor.u32 %v1186_v38, %v1162_v0  ;;  %v6423_v34 = vld [vmem:[#allocation29_spill] sm:$0xff] }
 0x1b7   : > { %v4956_v46 = vpop.eup %4024  ;;  %v869_v16 = vmul.f32 1.442695, %v834_v40  ;;  %v835_v11 = vsub.f32 %v4612_v41, %v789_v10  ;;  %3788 = vmatpush3.bf16.msra.mxu1 %v6404_v39  ;;  %3743 = vmatprep.mubr.msk.bf16.mxu0 %vm4287_vm0, %v6405_v7  ;;  %vm1297_vm14 = vcmp.ge.u32.totalorder %v4944_v50, 1444339130  ;;  %v1312_v36 = vsel %vm1288_vm8, %v4946_v56, 0.0 }
 0x1b8   : > { %4034 = vpow2.f32 %v867_v14  ;;  %v792_v27 = vpop.xlane.xlu1 %791  ;;  %3771 = vmatprep.subr.bf16.mxu0 %v6405_v7  ;;  %v1313_v41 = vsel %vm1289_vm7, %v4956_v46, 0.0  ;;  %3761 = vmatprep.mubr.msk.bf16.mxu1 %vm4287_vm0, %v6405_v7  ;;  %v6408_v62 = vpack.c.bf16 %v6406_v49, %v6407_v58  ;;  %v4992_v43 = vxor.u32 %v1110_v57, %v1086_v26  ;;  %v6411_v14 = vld [vmem:[#allocation24_spill] sm:$0xff] }
 0x1b9   : > { %v4974_v25 = vpop.eup %4026  ;;  %4036 = vpow2.f32 %v869_v16  ;;  %v871_v42 = vmul.f32 1.442695, %v835_v11  ;;  %v836_v55 = vsub.f32 %v4618_v47, %v792_v27  ;;  %3789 = vmatprep.subr.bf16.mxu1 %v6405_v7  ;;  %v4990_v47 = vxor.u32 %v1187_v35, %v1163_v12 }
 0x1ba   : > { %v807_v19 = vpop.xlane.xlu0 %806  ;;  %3772 = vmatpush3.bf16.msra.mxu0 %v6408_v62  ;;  %v1159_v53 = vmul.u32 2146121005, %v4954_v37  ;;  %v1335_v38 = vpack.c.bf16 %v1313_v41, %v1312_v36  ;;  %v6412_v29 = vpack.c.bf16 %v6410_v33, %v6411_v14  ;;  %v5002_v10 = vxor.u32 %v1116_v32, %v1092_v31  ;;  %v6413_v31 = vld [vmem:[#allocation8_spill] sm:$0xff]  ;;  %v6418_v62 = vld [vmem:[#allocation26_spill] sm:$0xff] }
 0x1bb   : > { %v4995_v23 = vpop.eup %4028  ;;  %v873_v0 = vmul.f32 1.442695, %v836_v55  ;;  %v841_v40 = vsub.f32 %v6409_v24, %v807_v19  ;;  %3773 = vmatprep.subr.bf16.mxu0 %v6405_v7  ;;  %4038 = vpow2.f32 %v871_v42  ;;  %v1318_v12 = vsel %vm1294_vm9, %v4974_v25, 0.0  ;;  %v6416_v55 = vld [vmem:[#allocation9_spill] sm:$0xff] }
 0x1bc   : > { %3790 = vmatpush3.bf16.msra.mxu1 %v6412_v29  ;;  %v810_v13 = vpop.xlane.xlu1 %809  ;;  %v1319_v26 = vsel %vm1295_vm10, %v4995_v23, 0.0  ;;  %v5011_v35 = vxor.u32 %v1117_v22, %v1093_v59  ;;  %v6415_v59 = vpack.c.bf16 %v4847_v5, %v4844_v51  ;;  %v1234_v32 = vmul.u32 2221713035, %v4980_v63  ;;  %v6421_v29 = vld [vmem:[#allocation10_spill] sm:$0xff] }
 0x1bd   : > { %3791 = vmatprep.subr.bf16.mxu1 %v6405_v7  ;;  %4040 = vpow2.f32 %v873_v0  ;;  %v883_v57 = vmul.f32 1.442695, %v841_v40  ;;  %v842_v37 = vsub.f32 %v6413_v31, %v810_v13  ;;  %3744 = vmatmul.mubr.msk.bf16.gmra.mrb[28].mxu0 %vm750_vm2, %v1335_v38  ;;  %v1338_v16 = vpack.c.bf16 %v1319_v26, %v1318_v12  ;;  %v5016_v11 = vpop.eup %4030  ;;  %v6420_v0 = vld [vmem:[#allocation11_spill] sm:$0xff]  ;;  %v3487_v63 = vld [vmem:[%s4396_s12 + $0xd8] sm:$0xff] }
 0x1be   : > { %v795_v8 = vpop.xlane.xlu0 %794  ;;  %3747 = vmatprep.mubr.msk.bf16.mxu0 %vm4287_vm0, %v6405_v7  ;;  %3774 = vmatpush3.bf16.msra.mxu0 %v6414_v18  ;;  %v5027_v39 = vsel %vm449_vm1, %v6415_v59, 0  ;;  %v1158_v27 = vmul.u32 2146121005, %v4992_v43  ;;  %v1183_v41 = vshrl.u32 %v1159_v53, 15  ;;  %vm1298_vm3 = vcmp.ge.u32.totalorder %v4827_v4, 1444339130 }
 0x1bf   : > { %v5031_v22 = vpop.eup %4032  ;;  %4042 = vpow2.f32 %v883_v57  ;;  %v885_v42 = vmul.f32 1.442695, %v842_v37  ;;  %v837_v9 = vsub.f32 %v6416_v55, %v795_v8  ;;  %3762 = vmatmul.mubr.msk.bf16.gmra.mrb[28].mxu1 %vm750_vm2, %v1338_v16  ;;  %3805 = vmatprep.subr.bf16.mxu0 %v6405_v7  ;;  %v1164_v1 = vmul.u32 2146121005, %v5002_v10  ;;  %v6422_v57 = vld [vmem:[#allocation12_spill] sm:$0xff] }
 0x1c0   : > { %v798_v51 = vpop.xlane.xlu1 %797  ;;  %v1315_v5 = vsel %vm1291_vm11, %v5031_v22, 0.0  ;;  %3765 = vmatprep.mubr.msk.bf16.mxu1 %vm4287_vm0, %v6405_v7  ;;  %v6417_v19 = vpack.c.bf16 %v4825_v45, %v4819_v48  ;;  %v1252_v36 = vshrl.u32 %v1228_v54, 16  ;;  %v5050_v49 = vxor.u32 %v1253_v60, %v1229_v17  ;;  %v6424_v18 = vld [vmem:[#allocation28_spill] sm:$0xff] }
 0x1c1   : > { %v1165_v58 = vmul.u32 2146121005, %v5011_v35  ;;  %vm1304_vm4 = vcmp.ge.u32.totalorder %v6418_v62, 1444339130  ;;  %vm1305_vm5 = vcmp.ge.u32.totalorder %v6419_v52, 1444339130  ;;  %4044 = vpow2.f32 %v885_v42 }
 0x1c2   : > { %3792 = vmatpush3.bf16.msra.mxu1 %v6417_v19  ;;  %v875_v43 = vmul.f32 1.442695, %v837_v9  ;;  %v838_v24 = vsub.f32 %v6420_v0, %v798_v51  ;;  %v1235_v45 = vmul.u32 2221713035, %v4990_v47  ;;  %v5058_v48 = vpop.eup %4034  ;;  %v813_v40 = vpop.xlane.xlu0 %812  ;;  %v1314_v44 = vsel %vm1290_vm12, %v5016_v11, 0.0 }
 0x1c3   : > { %3823 = vmatprep.subr.bf16.mxu1 %v6405_v7  ;;  %v1258_v17 = vshrl.u32 %v1234_v32, 16  ;;  %v1182_v60 = vshrl.u32 %v1158_v27, 15  ;;  %v5065_v38 = vxor.u32 %v1183_v41, %v1159_v53  ;;  %v5067_v33 = vpop.eup %4036  ;;  %v843_v10 = vsub.f32 %v6421_v29, %v813_v40 }
 0x1c4   : > { %v877_v14 = vmul.f32 1.442695, %v838_v24  ;;  %v1336_v13 = vpack.c.bf16 %v1315_v5, %v1314_v44  ;;  %v1188_v47 = vshrl.u32 %v1164_v1, 15  ;;  %4046 = vpow2.f32 %v875_v43  ;;  %v816_v12 = vpop.xlane.xlu1 %815  ;;  %v6426_v5 = vld [vmem:[#allocation13_spill] sm:$0xff] }
 0x1c5   : > { %v1320_v3 = vsel %vm1296_vm13, %v5058_v48, 0.0  ;;  %v1321_v26 = vsel %vm1297_vm14, %v5067_v33, 0.0  ;;  %v1189_v35 = vshrl.u32 %v1165_v58, 15  ;;  %v887_v53 = vmul.f32 1.442695, %v843_v10  ;;  %v5078_v16 = vpop.eup %4038 }
 0x1c6   : > { %4048 = vpow2.f32 %v877_v14  ;;  %v844_v31 = vsub.f32 %v6422_v57, %v816_v12  ;;  %3748 = vmatmul.mubr.msk.bf16.gmra.mrb[32].mxu0 %vm750_vm2, %v1336_v13  ;;  %v1339_v37 = vpack.c.bf16 %v1321_v26, %v1320_v3  ;;  %v801_v8 = vpop.xlane.xlu0 %800  ;;  %v6425_v59 = vpack.c.bf16 %v6423_v34, %v6424_v18  ;;  %v3486_v3 = vld [vmem:[%s4396_s12 + $0xd0] sm:$0xff]  ;;  %v6429_v57 = vld [vmem:[#allocation16_spill] sm:$0xff] }
 0x1c7   : > { %3775 = vmatprep.mubr.msk.bf16.mxu0 %vm4287_vm0, %v6405_v7  ;;  %v1259_v41 = vshrl.u32 %v1235_v45, 16  ;;  %v5086_v42 = vxor.u32 %v1182_v60, %v1158_v27  ;;  %v1231_v55 = vmul.u32 2221713035, %v5065_v38  ;;  %v5089_v9 = vpop.eup %4040  ;;  %4050 = vpow2.f32 %v887_v53  ;;  %v6427_v60 = vld [vmem:[#allocation15_spill] sm:$0xff] }
 0x1c8   : > { %v2030_v50 = vsel %vm449_vm1, %v6425_v59, 0  ;;  %v889_v51 = vmul.f32 1.442695, %v844_v31  ;;  %v839_v19 = vsub.f32 %v6426_v5, %v801_v8  ;;  %3766 = vmatmul.mubr.msk.bf16.gmra.mrb[32].mxu1 %vm750_vm2, %v1339_v37  ;;  %v5093_v43 = vxor.u32 %v1188_v47, %v1164_v1  ;;  %v804_v24 = vpop.xlane.xlu1 %803  ;;  %v6428_v47 = vld [vmem:[#allocation14_spill] sm:$0xff]  ;;  %v3492_v37 = vld [vmem:[%s4396_s12 + $0x100] sm:$0xff]  ;;  %v3493_v8 = vld [vmem:[%s4396_s12 + $0x108] sm:$0xff] }
 0x1c9   : > { %v1323_v0 = vsel %vm1299_vm15, %v5089_v9, 0.0  ;;  %3793 = vmatprep.mubr.msk.bf16.mxu1 %vm4287_vm0, %v6405_v7  ;;  %v1276_v27 = vxor.u32 %v1252_v36, %v1228_v54  ;;  %vm1301_vm6 = vcmp.ge.u32.totalorder %v5050_v49, 1444339130  ;;  %v5103_v40 = vxor.u32 %v1189_v35, %v1165_v58  ;;  %v5105_v44 = vpop.eup %4042 }
 0x1ca   : > { %4052 = vpow2.f32 %v889_v51  ;;  %v879_v1 = vmul.f32 1.442695, %v839_v19  ;;  %v840_v30 = vsub.f32 %v6427_v60, %v804_v24  ;;  %v1282_v38 = vxor.u32 %v1258_v17, %v1234_v32  ;;  %v819_v54 = vpop.xlane.xlu0 %818  ;;  %v3488_v60 = vld [vmem:[%s4396_s12 + $0xe0] sm:$0xff] }
 0x1cb   : > { %v1322_v61 = vsel %vm1298_vm3, %v5078_v16, 0.0  ;;  %v1283_v36 = vxor.u32 %v1259_v41, %v1235_v45  ;;  %v1230_v14 = vmul.u32 2221713035, %v5086_v42  ;;  %v1255_v58 = vshrl.u32 %v1231_v55, 16  ;;  %v5114_v29 = vpop.eup %4044 }
 0x1cc   : > { %v1340_v10 = vpack.c.bf16 %v1323_v0, %v1322_v61  ;;  %v881_v13 = vmul.f32 1.442695, %v840_v30  ;;  %v845_v12 = vsub.f32 %v6428_v47, %v819_v54  ;;  %v1236_v32 = vmul.u32 2221713035, %v5093_v43  ;;  %v822_v17 = vpop.xlane.xlu1 %821 }
 0x1cd   : > { %v1328_v4 = vsel %vm1304_vm4, %v5105_v44, 0.0  ;;  %v1329_v45 = vsel %vm1305_vm5, %v5114_v29, 0.0  ;;  %4054 = vpow2.f32 %v879_v1  ;;  %v1237_v26 = vmul.u32 2221713035, %v5103_v40 }
 0x1ce   : > { %v1343_v35 = vpack.c.bf16 %v1329_v45, %v1328_v4  ;;  %4056 = vpow2.f32 %v881_v13  ;;  %v891_v53 = vmul.f32 1.442695, %v845_v12  ;;  %v846_v31 = vsub.f32 %v6429_v57, %v822_v17  ;;  %3776 = vmatmul.mubr.msk.bf16.vlgmr.msra.gmra.mrb[36].mxu0 %vm750_vm2, %v1340_v10  ;;  %v5131_v34 = vpop.eup %4046  ;;  %v3497_v57 = vld [vmem:[%s4396_s12 + $0x128] sm:$0xff] }
 0x1cf   : > { %3806 = vmatpush3.bf16.xpose.msra.mxu0 %v5027_v39  ;;  %3779 = vmatprep.mubr.msk.bf16.mxu0 %vm4287_vm0, %v6405_v7  ;;  %v1891_v62 = vpack.c.bf16 %v3487_v63, %v3486_v3  ;;  %vm1300_vm7 = vcmp.ge.u32.totalorder %v1276_v27, 1444339130  ;;  %v1254_v59 = vshrl.u32 %v1230_v14, 16  ;;  %vm1306_vm8 = vcmp.ge.u32.totalorder %v1282_v38, 1444339130  ;;  %v3460_v63 = vld [vmem:[%s4421_s15 + $0xc0] sm:$0xff] }
 0x1d0   : > { %v5136_v52 = vpop.eup %4048  ;;  %4058 = vpow2.f32 %v891_v53  ;;  %v893_v18 = vmul.f32 1.442695, %v846_v31  ;;  %3794 = vmatmul.mubr.msk.bf16.vlgmr.msra.gmra.mrb[36].mxu1 %vm750_vm2, %v1343_v35  ;;  %3807 = vmatprep.subr.bf16.mxu0 %v6405_v7  ;;  %vm1307_vm9 = vcmp.ge.u32.totalorder %v1283_v36, 1444339130  ;;  %v1894_v39 = vpack.c.bf16 %v3493_v8, %v3492_v37  ;;  %v3494_v36 = vld [vmem:[%s4396_s12 + $0x110] sm:$0xff]  ;;  %v3467_v37 = vld [vmem:[%s4421_s15 + $0xf8] sm:$0xff] }
 0x1d1   : > { %3824 = vmatpush3.bf16.xpose.msra.mxu1 %v2030_v50  ;;  %v1325_v41 = vsel %vm1301_vm6, %v5136_v52, 0.0  ;;  %3797 = vmatprep.mubr.msk.bf16.mxu1 %vm4287_vm0, %v6405_v7  ;;  %v5145_v42 = vpop.eup %4050  ;;  %v1279_v51 = vxor.u32 %v1255_v58, %v1231_v55  ;;  %v1260_v5 = vshrl.u32 %v1236_v32, 16  ;;  %v1261_v50 = vshrl.u32 %v1237_v26, 16  ;;  %v3489_v55 = vld [vmem:[%s4396_s12 + $0xe8] sm:$0xff]  ;;  %v3466_v31 = vld [vmem:[%s4421_s15 + $0xf0] sm:$0xff] }
 0x1d2   : > { %4060 = vpow2.f32 %v893_v18  ;;  %3825 = vmatprep.subr.bf16.mxu1 %v6405_v7  ;;  %v1324_v19 = vsel %vm1300_vm7, %v5131_v34, 0.0  ;;  %v1958_v0 = vsel %vm449_vm1, %v1891_v62, 0  ;;  %v1278_v24 = vxor.u32 %v1254_v59, %v1230_v14  ;;  %v3495_v14 = vld [vmem:[%s4396_s12 + $0x118] sm:$0xff] }
 0x1d3   : > { %v1341_v43 = vpack.c.bf16 %v1325_v41, %v1324_v19  ;;  %v1330_v27 = vsel %vm1306_vm8, %v5145_v42, 0.0  ;;  %v2033_v1 = vsel %vm449_vm1, %v1894_v39, 0  ;;  %vm1303_vm10 = vcmp.ge.u32.totalorder %v1279_v51, 1444339130  ;;  %v3502_v41 = vld [vmem:[%s4396_s12 + $0x150] sm:$0xff]  ;;  %v3503_v39 = vld [vmem:[%s4396_s12 + $0x158] sm:$0xff] }
 0x1d4   : > { %v5149_v49 = vpop.eup %4052  ;;  %v1284_v38 = vxor.u32 %v1260_v5, %v1236_v32  ;;  %v1285_v61 = vxor.u32 %v1261_v50, %v1237_v26  ;;  %vm1302_vm11 = vcmp.ge.u32.totalorder %v1278_v24, 1444339130  ;;  %v1892_v10 = vpack.c.bf16 %v3489_v55, %v3488_v60  ;;  %v3461_v32 = vld [vmem:[%s4421_s15 + $0xc8] sm:$0xff]  ;;  %v3496_v26 = vld [vmem:[%s4396_s12 + $0x120] sm:$0xff]  ;;  %v3463_v24 = vld [vmem:[%s4421_s15 + $0xd8] sm:$0xff] }
 0x1d5   : > { %v1331_v40 = vsel %vm1307_vm9, %v5149_v49, 0.0  ;;  %v1895_v12 = vpack.c.bf16 %v3495_v14, %v3494_v36  ;;  %v1829_v18 = vmul.f32 0.17677669, %v3460_v63  ;;  %v1830_v59 = vmul.f32 0.17677669, %v3461_v32  ;;  %v3499_v60 = vld [vmem:[%s4396_s12 + $0x138] sm:$0xff] }
 0x1d6   : > { %3780 = vmatmul.mubr.msk.bf16.gmra.mrb[40].mxu0 %vm750_vm2, %v1341_v43  ;;  %v1344_v30 = vpack.c.bf16 %v1331_v40, %v1330_v27  ;;  %vm1308_vm12 = vcmp.ge.u32.totalorder %v1284_v38, 1444339130  ;;  %vm1309_vm13 = vcmp.ge.u32.totalorder %v1285_v61, 1444339130  ;;  %v1961_v17 = vsel %vm449_vm1, %v1892_v10, 0  ;;  %v3468_v55 = vld [vmem:[%s4421_s15 + $0x100] sm:$0xff] }
 0x1d7   : > { %v5158_v54 = vpop.eup %4054  ;;  %3808 = vmatpush3.bf16.xpose.msra.mxu0 %v1958_v0  ;;  %3783 = vmatprep.mubr.msk.bf16.mxu0 %vm4287_vm0, %v6405_v7  ;;  %v2036_v62 = vsel %vm449_vm1, %v1895_v12, 0  ;;  %v1896_v51 = vpack.c.bf16 %v3497_v57, %v3496_v26  ;;  %v1835_v5 = vmul.f32 0.17677669, %v3466_v31  ;;  %v1836_v50 = vmul.f32 0.17677669, %v3467_v37  ;;  %v3462_v0 = vld [vmem:[%s4421_s15 + $0xd0] sm:$0xff] }
 0x1d8   : > { %v5164_v58 = vpop.eup %4056  ;;  %3798 = vmatmul.mubr.msk.bf16.gmra.mrb[40].mxu1 %vm750_vm2, %v1344_v30  ;;  %3809 = vmatprep.subr.bf16.mxu0 %v6405_v7  ;;  %v1326_v3 = vsel %vm1302_vm11, %v5158_v54, 0.0  ;;  %v1853_v19 = vpack.c.bf16 %v1830_v59, %v1829_v18  ;;  %v1899_v43 = vpack.c.bf16 %v3503_v39, %v3502_v41  ;;  %v3469_v30 = vld [vmem:[%s4421_s15 + $0x108] sm:$0xff]  ;;  %v1831_v61 = vmul.f32 0.17677669, %v3462_v0  ;;  %v3504_v14 = vld [vmem:[%s4396_s12 + $0x160] sm:$0xff]  ;;  %v3470_v31 = vld [vmem:[%s4421_s15 + $0x110] sm:$0xff] }
 0x1d9   : > { %3826 = vmatpush3.bf16.xpose.msra.mxu1 %v2033_v1  ;;  %v1327_v13 = vsel %vm1303_vm10, %v5164_v58, 0.0  ;;  %3801 = vmatprep.mubr.msk.bf16.mxu1 %vm4287_vm0, %v6405_v7  ;;  %v2105_v27 = vsel %vm449_vm1, %v1896_v51, 0  ;;  %v1856_v40 = vpack.c.bf16 %v1836_v50, %v1835_v5  ;;  %v3498_v1 = vld [vmem:[%s4396_s12 + $0x130] sm:$0xff]  ;;  %v1832_v36 = vmul.f32 0.17677669, %v3463_v24  ;;  %v3505_v10 = vld [vmem:[%s4396_s12 + $0x168] sm:$0xff] }
 0x1da   : > { %v5171_v47 = vpop.eup %4058  ;;  %3827 = vmatprep.subr.bf16.mxu1 %v6405_v7  ;;  %v1342_v45 = vpack.c.bf16 %v1327_v13, %v1326_v3  ;;  %v2180_v38 = vsel %vm449_vm1, %v1899_v43, 0  ;;  %v1897_v13 = vpack.c.bf16 %v3499_v60, %v3498_v1  ;;  %v1837_v12 = vmul.f32 0.17677669, %v3468_v55  ;;  %v3501_v57 = vld [vmem:[%s4396_s12 + $0x148] sm:$0xff]  ;;  %v3471_v37 = vld [vmem:[%s4421_s15 + $0x118] sm:$0xff]  ;;  %v3506_v59 = vld [vmem:[%s4396_s12 + $0x170] sm:$0xff] }
 0x1db   : > { %v1332_v35 = vsel %vm1308_vm12, %v5171_v47, 0.0  ;;  %v1838_v3 = vmul.f32 0.17677669, %v3469_v30  ;;  %v1854_v63 = vpack.c.bf16 %v1832_v36, %v1831_v61  ;;  %v1900_v32 = vpack.c.bf16 %v3505_v10, %v3504_v14  ;;  %v3507_v41 = vld [vmem:[%s4396_s12 + $0x178] sm:$0xff]  ;;  %v3472_v43 = vld [vmem:[%s4421_s15 + $0x120] sm:$0xff]  ;;  %v3473_v0 = vld [vmem:[%s4421_s15 + $0x128] sm:$0xff] }
 0x1dc   : > { %v5177_v4 = vpop.eup %4060  ;;  %v2108_v26 = vsel %vm449_vm1, %v1897_v13, 0  ;;  %v1839_v51 = vmul.f32 0.17677669, %v3470_v31  ;;  %v1840_v5 = vmul.f32 0.17677669, %v3471_v37  ;;  %v3479_v1 = vld [vmem:[%s4421_s15 + $0x158] sm:$0xff] }
 0x1dd   : > { %v1333_v53 = vsel %vm1309_vm13, %v5177_v4, 0.0  ;;  %v1841_v55 = vmul.f32 0.17677669, %v3472_v43  ;;  %v1842_v30 = vmul.f32 0.17677669, %v3473_v0  ;;  %v3474_v14 = vld [vmem:[%s4421_s15 + $0x130] sm:$0xff] }
 0x1de   : > { %3784 = vmatmul.mubr.msk.bf16.gmra.mrb[44].mxu0 %vm750_vm2, %v1342_v45  ;;  %v1345_v8 = vpack.c.bf16 %v1333_v53, %v1332_v35  ;;  %v3464_v45 = vld [vmem:[%s4421_s15 + $0xe0] sm:$0xff]  ;;  %v1857_v35 = vpack.c.bf16 %v1838_v3, %v1837_v12  ;;  %v1848_v61 = vmul.f32 0.17677669, %v3479_v1  ;;  %v3475_v10 = vld [vmem:[%s4421_s15 + $0x138] sm:$0xff]  ;;  %v3481_v3 = vld [vmem:[%s4421_s15 + $0x168] sm:$0xff] }
 0x1df   : > { %3810 = vmatpush3.bf16.xpose.msra.mxu0 %v1961_v17  ;;  %3811 = vmatprep.mubr.msk.bf16.mxu0 %vm4287_vm0, %v6405_v7  ;;  %v3465_v17 = vld [vmem:[%s4421_s15 + $0xe8] sm:$0xff]  ;;  %v3500_v53 = vld [vmem:[%s4396_s12 + $0x140] sm:$0xff]  ;;  %v1859_v36 = vpack.c.bf16 %v1842_v30, %v1841_v55  ;;  %v3482_v31 = vld [vmem:[%s4421_s15 + $0x170] sm:$0xff]  ;;  %s2544_s12 = sadd.s32 %s2543_s14, %s1059_s19  ;;  %s3951_s14 = smul.u32 1536, %s4276_s23 }
 0x1e0   : > { %3802 = vmatmul.mubr.msk.bf16.gmra.mrb[44].mxu1 %vm750_vm2, %v1345_v8  ;;  %3841 = vmatprep.subr.bf16.mxu0 %v6405_v7  ;;  %v2183_v8 = vsel %vm449_vm1, %v1900_v32, 0  ;;  %v1834_v18 = vmul.f32 0.17677669, %v3465_v17  ;;  %v1898_v39 = vpack.c.bf16 %v3501_v57, %v3500_v53  ;;  %v3480_v12 = vld [vmem:[%s4421_s15 + $0x160] sm:$0xff]  ;;  %v1844_v32 = vmul.f32 0.17677669, %v3475_v10 }
 0x1e1   : > { %3828 = vmatpush3.bf16.xpose.msra.mxu1 %v2036_v62  ;;  %3829 = vmatprep.mubr.msk.bf16.mxu1 %vm4287_vm0, %v6405_v7  ;;  %v1833_v62 = vmul.f32 0.17677669, %v3464_v45  ;;  %v1849_v45 = vmul.f32 0.17677669, %v3480_v12  ;;  %v1850_v17 = vmul.f32 0.17677669, %v3481_v3 }
 0x1e2   : > { %3859 = vmatprep.subr.bf16.mxu1 %v6405_v7  ;;  %v2111_v24 = vsel %vm449_vm1, %v1898_v39, 0  ;;  %v3477_v53 = vld [vmem:[%s4421_s15 + $0x148] sm:$0xff]  ;;  %v3483_v37 = vld [vmem:[%s4421_s15 + $0x178] sm:$0xff]  ;;  %s6281_s23 = scalar_lea.sflag [#allocation5], %s273_s10 }
 0x1e3   : > { %v1855_v50 = vpack.c.bf16 %v1834_v18, %v1833_v62  ;;  %v1863_v57 = vpack.c.bf16 %v1850_v17, %v1849_v45  ;;  %v1846_v62 = vmul.f32 0.17677669, %v3477_v53  ;;  %v1851_v18 = vmul.f32 0.17677669, %v3482_v31 }
 0x1e6   : > { %3812 = vmatmul.mubr.msk.bf16.vlgmr.msra.gmra.mrb[48].mxu0 %vm449_vm1, %v1853_v19  ;;  %v1901_v19 = vpack.c.bf16 %v3507_v41, %v3506_v59  ;;  %v1852_v59 = vmul.f32 0.17677669, %v3483_v37 }
 0x1e7   : > { %3842 = vmatpush3.bf16.xpose.msra.mxu0 %v2105_v27  ;;  %3815 = vmatprep.mubr.msk.bf16.mxu0 %vm4287_vm0, %v6405_v7  ;;  %v1858_v27 = vpack.c.bf16 %v1840_v5, %v1839_v51 }
 0x1e8   : > { %3830 = vmatmul.mubr.msk.bf16.vlgmr.msra.gmra.mrb[48].mxu1 %vm449_vm1, %v1856_v40  ;;  %3843 = vmatprep.subr.bf16.mxu0 %v6405_v7  ;;  %v3478_v40 = vld [vmem:[%s4421_s15 + $0x150] sm:$0xff]  ;;  %v2186_v60 = vsel %vm449_vm1, %v1901_v19, 0  ;;  %v1864_v39 = vpack.c.bf16 %v1852_v59, %v1851_v18 }
 0x1e9   : > { %3860 = vmatpush3.bf16.xpose.msra.mxu1 %v2180_v38  ;;  %3833 = vmatprep.mubr.msk.bf16.mxu1 %vm4287_vm0, %v6405_v7  ;;  %v1847_v38 = vmul.f32 0.17677669, %v3478_v40 }
 0x1ea   : > { %3861 = vmatprep.subr.bf16.mxu1 %v6405_v7 }
 0x1eb   : > { %v1862_v13 = vpack.c.bf16 %v1848_v61, %v1847_v38 }
 0x1ee   : > { %3816 = vmatmul.mubr.msk.bf16.gmra.mrb[52].mxu0 %vm449_vm1, %v1854_v63  ;;  %v1843_v63 = vmul.f32 0.17677669, %v3474_v14 }
 0x1ef   : > { %3844 = vmatpush3.bf16.xpose.msra.mxu0 %v2108_v26  ;;  %3819 = vmatprep.mubr.msk.bf16.mxu0 %vm4287_vm0, %v6405_v7 }
 0x1f0   : > { %3834 = vmatmul.mubr.msk.bf16.gmra.mrb[52].mxu1 %vm449_vm1, %v1857_v35  ;;  %3845 = vmatprep.subr.bf16.mxu0 %v6405_v7  ;;  %v1860_v26 = vpack.c.bf16 %v1844_v32, %v1843_v63  ;;  %v3476_v35 = vld [vmem:[%s4421_s15 + $0x140] sm:$0xff]  ;;  %s2545_s15 = sshrl.u32 %s2544_s12, 16 }
 0x1f1   : > { %3862 = vmatpush3.bf16.xpose.msra.mxu1 %v2183_v8  ;;  %3837 = vmatprep.mubr.msk.bf16.mxu1 %vm4287_vm0, %v6405_v7  ;;  %v1845_v8 = vmul.f32 0.17677669, %v3476_v35  ;;  %s2546_s16 = sxor.u32 %s2545_s15, %s2544_s12  ;;  %s3304_s12 = sshll.u32 %s6176_s13, 4  ;;  %s6269_s12 = int_to_ptr.vmem [resolvable:$true] %s3304_s12 }
 0x1f2   : > { %3863 = vmatprep.subr.bf16.mxu1 %v6405_v7  ;;  %s2547_s19 = smul.u32 2146121005, %s2546_s16 }
 0x1f3   : > { %v1861_v41 = vpack.c.bf16 %v1846_v62, %v1845_v8 }
 0x1f4   : > { %s2548_s17 = sshrl.u32 %s2547_s19, 15 }
 0x1f5   : > { %s2549_s0 = sxor.u32 %s2548_s17, %s2547_s19  ;;  %s6275_s19 = scalar_lea.hbm %s6332_s5, %s3951_s14 }
 0x1f6   : > { %3820 = vmatmul.mubr.msk.bf16.gmra.mrb[56].mxu0 %vm449_vm1, %v1855_v50  ;;  %s2550_s26 = smul.u32 2221713035, %s2549_s0  ;;  %s4206_s17 = scalar_lea.vmem %s6269_s12, 1536 }
 0x1f7   : > { %3846 = vmatpush3.bf16.xpose.msra.mxu0 %v2111_v24  ;;  %3847 = vmatprep.mubr.msk.bf16.mxu0 %vm4287_vm0, %v6405_v7  ;;  %p4207_p12 = scmp.ne.s32.totalorder %s6269_s12, %s4206_s17  ;;  %s4291_s0 = smov [#allocation4]  }
 0x1f8   : > { %3838 = vmatmul.mubr.msk.bf16.gmra.mrb[56].mxu1 %vm449_vm1, %v1858_v27  ;;  %3877 = vmatprep.subr.bf16.mxu0 %v6405_v7  ;;  %s2551_s28 = sshrl.u32 %s2550_s26, 16 }
 0x1f9   : > { %3864 = vmatpush3.bf16.xpose.msra.mxu1 %v2186_v60  ;;  %3865 = vmatprep.mubr.msk.bf16.mxu1 %vm4287_vm0, %v6405_v7  ;;  %s2552_s30 = sxor.u32 %s2551_s28, %s2550_s26  ;;  %p4208_p13 = pnand %p4207_p12, %p4367_p4 }
 0x1fa   : > { %3895 = vmatprep.subr.bf16.mxu1 %v6405_v7  ;;  %s4210_s26 = sshll.u32 %s4291_s0, 4  ;;  %s4211_s26 = int_to_ptr.vmem [resolvable:$false] %s4210_s26 }
 0x1fb   : > { %p4209_p0 = pneg %p4208_p13  ;;  %s4212_s28 = scalar_lea.vmem %s4211_s26, 3072 }
 0x1fc   : > { %p4213_p1 = scmp.lt.s32.totalorder %s6269_s12, %s4211_s26  ;;  %p4214_p2 = scmp.lt.s32.totalorder %s4212_s28, %s4206_s17 }
 0x1fe   : > { %3848 = vmatmul.mubr.msk.bf16.vlgmr.msra.gmra.mrb[60].mxu0 %vm449_vm1, %v1859_v36  ;;  %p4215_p3 = por %p4214_p2, %p4213_p1 }
 0x1ff   : > { %3851 = vmatprep.mubr.msk.bf16.mxu0 %vm4287_vm0, %v6405_v7 }
 0x200   : > { %3866 = vmatmul.mubr.msk.bf16.vlgmr.msra.gmra.mrb[60].mxu1 %vm449_vm1, %v1862_v13  ;;  %p4216_p5 = pnand %p4215_p3, %p4209_p0 }
 0x201   : > { %3869 = vmatprep.mubr.msk.bf16.mxu1 %vm4287_vm0, %v6405_v7 }
 0x206   : > { %3852 = vmatmul.mubr.msk.bf16.gmra.mrb[64].mxu0 %vm449_vm1, %v1860_v26 }
 0x207   : > { %3855 = vmatprep.mubr.msk.bf16.mxu0 %vm4287_vm0, %v6405_v7 }
 0x208   : > { %3870 = vmatmul.mubr.msk.bf16.gmra.mrb[64].mxu1 %vm449_vm1, %v1863_v57 }
 0x209   : > { %3873 = vmatprep.mubr.msk.bf16.mxu1 %vm4287_vm0, %v6405_v7 }
 0x20e   : > { %3856 = vmatmul.mubr.msk.bf16.gmra.mrb[68].mxu0 %vm449_vm1, %v1861_v41 }
 0x20f   : > { %3883 = vmatprep.mubr.msk.bf16.mxu0 %vm4287_vm0, %v6405_v7 }
 0x210   : > { %3874 = vmatmul.mubr.msk.bf16.gmra.mrb[68].mxu1 %vm449_vm1, %v1864_v39 }
 0x211   : > { %3901 = vmatprep.mubr.msk.bf16.mxu1 %vm4287_vm0, %v6405_v7 }
 0x288   : > { %v5273_v51 = vpop.f32.mrb[24].mxu0 }
 0x289   : > { %6430 = vst [vmem:[#allocation23_spill] sm:$0xff] %v5273_v51  ;;  %v5275_v5 = vpop.f32.mrb[24].mxu1  ;;  %v3741_v50 = vpop.f32.mrb[25].mxu0 }
 0x28a   : > { %6431 = vst [vmem:[#allocation22_spill] sm:$0xff] %v5275_v5  ;;  %v3759_v19 = vpop.f32.mrb[25].mxu1  ;;  %v5277_v43 = vpop.f32.mrb[26].mxu0 }
 0x28b   : > { %6432 = vst [vmem:[#allocation7_spill] sm:$0xff] %v5277_v43  ;;  %v5279_v0 = vpop.f32.mrb[26].mxu1  ;;  %v3742_v24 = vpop.f32.mrb[27].mxu0  ;;  %v3519_v43 = vld [vmem:[%s4516_s18 + $0x118] sm:$0xff] }
 0x28c   : > { %6433 = vst [vmem:[#allocation25_spill] sm:$0xff] %v5279_v0  ;;  %v3760_v27 = vpop.f32.mrb[27].mxu1 }
 0x290   : > { %v5281_v40 = vpop.f32.mrb[28].mxu0 }
 0x291   : > { %6434 = vst [vmem:[#allocation24_spill] sm:$0xff] %v5281_v40  ;;  %v3745_v1 = vpop.f32.mrb[29].mxu0  ;;  %v3518_v40 = vld [vmem:[%s4516_s18 + $0x110] sm:$0xff] }
 0x292   : > { %v5283_v60 = vpop.f32.mrb[30].mxu0  ;;  %v5285_v55 = vpop.f32.mrb[28].mxu1 }
 0x293   : > { %6435 = vst [vmem:[#allocation8_spill] sm:$0xff] %v5283_v60  ;;  %6436 = vst [vmem:[#allocation9_spill] sm:$0xff] %v5285_v55  ;;  %v3746_v30 = vpop.f32.mrb[31].mxu0  ;;  %v3763_v38 = vpop.f32.mrb[29].mxu1  ;;  %v3509_v55 = vld [vmem:[%s4516_s18 + $0xc8] sm:$0xff]  ;;  %v3512_v60 = vld [vmem:[%s4516_s18 + $0xe0] sm:$0xff] }
 0x294   : > { %v5287_v61 = vpop.f32.mrb[30].mxu1 }
 0x295   : > { %6437 = vst [vmem:[#allocation26_spill] sm:$0xff] %v5287_v61  ;;  %v3764_v36 = vpop.f32.mrb[31].mxu1 }
 0x299   : > { %v5289_v14 = vpop.f32.mrb[32].mxu0 }
 0x29a   : > { %6438 = vst [vmem:[#allocation27_spill] sm:$0xff] %v5289_v14  ;;  %v3749_v10 = vpop.f32.mrb[33].mxu0 }
 0x29b   : > { %v5291_v13 = vpop.f32.mrb[34].mxu0  ;;  %v5293_v12 = vpop.f32.mrb[32].mxu1 }
 0x29c   : > { %6439 = vst [vmem:[#allocation11_spill] sm:$0xff] %v5291_v13  ;;  %6440 = vst [vmem:[#allocation10_spill] sm:$0xff] %v5293_v12  ;;  %v3750_v3 = vpop.f32.mrb[35].mxu0  ;;  %v3767_v63 = vpop.f32.mrb[33].mxu1  ;;  %v3508_v12 = vld [vmem:[%s4516_s18 + $0xc0] sm:$0xff]  ;;  %v3514_v13 = vld [vmem:[%s4516_s18 + $0xf0] sm:$0xff] }
 0x29d   : > { %v5295_v32 = vpop.f32.mrb[34].mxu1 }
 0x29e   : > { %6441 = vst [vmem:[#allocation12_spill] sm:$0xff] %v5295_v32  ;;  %v3768_v45 = vpop.f32.mrb[35].mxu1 }
 0x29f   : > { %v5324_v45 = vld [vmem:[%s6331_s4] sm:$0xff] }
 0x2a1   : > { %v5297_v17 = vpop.f32.mrb[36].mxu0 }
 0x2a2   : > { %6442 = vst [vmem:[#allocation29_spill] sm:$0xff] %v5297_v17  ;;  %v3777_v26 = vpop.f32.mrb[37].mxu0 }
 0x2a3   : > { %v5299_v35 = vpop.f32.mrb[38].mxu0  ;;  %v5301_v53 = vpop.f32.mrb[36].mxu1 }
 0x2a4   : > { %6443 = vst [vmem:[#allocation28_spill] sm:$0xff] %v5299_v35  ;;  %6444 = vst [vmem:[#allocation13_spill] sm:$0xff] %v5301_v53  ;;  %v3778_v57 = vpop.f32.mrb[39].mxu0  ;;  %v3795_v31 = vpop.f32.mrb[37].mxu1 }
 0x2a5   : > { %v5303_v37 = vpop.f32.mrb[38].mxu1  ;;  %v5329_v57 = vld [vmem:[%s6331_s4 + $0x8] sm:$0xff] }
 0x2a6   : > { %6445 = vst [vmem:[#allocation15_spill] sm:$0xff] %v5303_v37  ;;  %v3796_v8 = vpop.f32.mrb[39].mxu1 }
 0x2a9   : > { %v5305_v62 = vpop.f32.mrb[40].mxu0 }
 0x2aa   : > { %6446 = vst [vmem:[#allocation14_spill] sm:$0xff] %v5305_v62  ;;  %v3781_v18 = vpop.f32.mrb[41].mxu0 }
 0x2ab   : > { %v5307_v59 = vpop.f32.mrb[42].mxu0  ;;  %v5309_v41 = vpop.f32.mrb[40].mxu1 }
 0x2ac   : > { %6447 = vst [vmem:[#allocation16_spill] sm:$0xff] %v5307_v59  ;;  %6448 = vst [vmem:[#allocation30_spill] sm:$0xff] %v5309_v41  ;;  %v3782_v39 = vpop.f32.mrb[43].mxu0  ;;  %v3799_v50 = vpop.f32.mrb[41].mxu1 }
 0x2ad   : > { %v5311_v19 = vpop.f32.mrb[42].mxu1 }
 0x2ae   : > { %6449 = vst [vmem:[#allocation31_spill] sm:$0xff] %v5311_v19  ;;  %v3800_v24 = vpop.f32.mrb[43].mxu1 }
 0x2b1   : > { %v5313_v27 = vpop.f32.mrb[44].mxu0 }
 0x2b2   : > { %6450 = vst [vmem:[#allocation32_spill] sm:$0xff] %v5313_v27  ;;  %v3785_v1 = vpop.f32.mrb[45].mxu0 }
 0x2b3   : > { %v5315_v30 = vpop.f32.mrb[46].mxu0  ;;  %v5317_v38 = vpop.f32.mrb[44].mxu1 }
 0x2b4   : > { %6451 = vst [vmem:[#allocation33_spill] sm:$0xff] %v5315_v30  ;;  %6452 = vst [vmem:[#allocation34_spill] sm:$0xff] %v5317_v38  ;;  %v3786_v36 = vpop.f32.mrb[47].mxu0  ;;  %v3803_v10 = vpop.f32.mrb[45].mxu1 }
 0x2b5   : > { %v5319_v3 = vpop.f32.mrb[46].mxu1 }
 0x2b6   : > { %6453 = vst [vmem:[#allocation35_spill] sm:$0xff] %v5319_v3  ;;  %v3804_v63 = vpop.f32.mrb[47].mxu1 }
 0x2b9   : > { %v1997_v26 = vpop.f32.mrb[48].mxu0 }
 0x2ba   : > { %v5332_v31 = vadd.f32 %v1997_v26, %v5324_v45  ;;  %v3813_v8 = vpop.f32.mrb[49].mxu0 }
 0x2bb   : > { %v2000_v18 = vpop.f32.mrb[50].mxu0  ;;  %v2072_v39 = vpop.f32.mrb[48].mxu1 }
 0x2bc   : > { %v5335_v50 = vadd.f32 %v2000_v18, %v5329_v57  ;;  %v5338_v24 = vadd.f32 %v2072_v39, %v5324_v45  ;;  %v3814_v1 = vpop.f32.mrb[51].mxu0  ;;  %v3831_v36 = vpop.f32.mrb[49].mxu1  ;;  %v2245_v10 = vsel %vm750_vm2, %v5332_v31, -inf  ;;  %v5352_v39 = vld [vmem:[%s6331_s4 + $0x10] sm:$0xff] }
 0x2bd   : > { %v2075_v63 = vpop.f32.mrb[50].mxu1  ;;  %2246 = vmax.xlane.f32.xlu0 %v2245_v10  ;;  %v5357_v36 = vld [vmem:[%s6331_s4 + $0x18] sm:$0xff] }
 0x2be   : > { %v5343_v38 = vadd.f32 %v2075_v63, %v5329_v57  ;;  %v3832_v26 = vpop.f32.mrb[51].mxu1  ;;  %v2248_v8 = vsel %vm750_vm2, %v5335_v50, -inf  ;;  %v2263_v18 = vsel %vm750_vm2, %v5338_v24, -inf }
 0x2bf   : > { %2249 = vmax.xlane.f32.xlu1 %v2248_v8 }
 0x2c0   : > { %v2266_v26 = vsel %vm750_vm2, %v5343_v38, -inf }
 0x2c1   : > { %2264 = vmax.xlane.f32.xlu0 %v2263_v18  ;;  %v2005_v1 = vpop.f32.mrb[52].mxu0 }
 0x2c2   : > { %v5360_v10 = vadd.f32 %v2005_v1, %v5352_v39  ;;  %v3817_v63 = vpop.f32.mrb[53].mxu0 }
 0x2c3   : > { %v2080_v8 = vpop.f32.mrb[52].mxu1  ;;  %2267 = vmax.xlane.f32.xlu1 %v2266_v26  ;;  %v2008_v41 = vpop.f32.mrb[54].mxu0 }
 0x2c4   : > { %v5365_v53 = vadd.f32 %v2080_v8, %v5352_v39  ;;  %v5368_v18 = vadd.f32 %v2008_v41, %v5357_v36  ;;  %v3818_v27 = vpop.f32.mrb[55].mxu0  ;;  %v3835_v62 = vpop.f32.mrb[53].mxu1  ;;  %v2251_v3 = vsel %vm750_vm2, %v5360_v10, -inf }
 0x2c5   : > { %v2083_v1 = vpop.f32.mrb[54].mxu1  ;;  %2252 = vmax.xlane.f32.xlu0 %v2251_v3  ;;  %v5382_v62 = vld [vmem:[%s6331_s4 + $0x20] sm:$0xff]  ;;  %v5387_v27 = vld [vmem:[%s6331_s4 + $0x28] sm:$0xff] }
 0x2c6   : > { %v5373_v63 = vadd.f32 %v2083_v1, %v5357_v36  ;;  %v3836_v19 = vpop.f32.mrb[55].mxu1  ;;  %v2254_v26 = vsel %vm750_vm2, %v5368_v18, -inf  ;;  %v2269_v8 = vsel %vm750_vm2, %v5365_v53, -inf }
 0x2c7   : > { %2255 = vmax.xlane.f32.xlu1 %v2254_v26 }
 0x2c8   : > { %v2272_v1 = vsel %vm750_vm2, %v5373_v63, -inf }
 0x2c9   : > { %2270 = vmax.xlane.f32.xlu0 %v2269_v8  ;;  %v2013_v41 = vpop.f32.mrb[56].mxu0 }
 0x2ca   : > { %v5390_v19 = vadd.f32 %v2013_v41, %v5382_v62  ;;  %v3821_v3 = vpop.f32.mrb[57].mxu0 }
 0x2cb   : > { %v2088_v26 = vpop.f32.mrb[56].mxu1  ;;  %2273 = vmax.xlane.f32.xlu1 %v2272_v1  ;;  %v2016_v37 = vpop.f32.mrb[58].mxu0 }
 0x2cc   : > { %v5395_v30 = vadd.f32 %v2088_v26, %v5382_v62  ;;  %v5398_v8 = vadd.f32 %v2016_v37, %v5387_v27  ;;  %v3822_v59 = vpop.f32.mrb[59].mxu0  ;;  %v3839_v35 = vpop.f32.mrb[57].mxu1  ;;  %v2257_v17 = vsel %vm750_vm2, %v5390_v19, -inf }
 0x2cd   : > { %v2091_v41 = vpop.f32.mrb[58].mxu1  ;;  %2258 = vmax.xlane.f32.xlu0 %v2257_v17 }
 0x2ce   : > { %v5403_v3 = vadd.f32 %v2091_v41, %v5387_v27  ;;  %v3840_v32 = vpop.f32.mrb[59].mxu1  ;;  %v2260_v1 = vsel %vm750_vm2, %v5398_v8, -inf  ;;  %v2275_v26 = vsel %vm750_vm2, %v5395_v30, -inf }
 0x2cf   : > { %2261 = vmax.xlane.f32.xlu1 %v2260_v1 }
 0x2d0   : > { %v2278_v17 = vsel %vm750_vm2, %v5403_v3, -inf }
 0x2d1   : > { %2276 = vmax.xlane.f32.xlu0 %v2275_v26  ;;  %v2147_v35 = vpop.f32.mrb[60].mxu0 }
 0x2d2   : > { %v5410_v37 = vadd.f32 %v2147_v35, %v5324_v45  ;;  %v3849_v59 = vpop.f32.mrb[61].mxu0 }
 0x2d3   : > { %v2222_v41 = vpop.f32.mrb[60].mxu1  ;;  %2279 = vmax.xlane.f32.xlu1 %v2278_v17  ;;  %v2150_v32 = vpop.f32.mrb[62].mxu0  ;;  %v1927_v17 = vpack.c.bf16 %v3509_v55, %v3508_v12  ;;  %v3515_v55 = vld [vmem:[%s4516_s18 + $0xf8] sm:$0xff] }
 0x2d4   : > { %v5416_v61 = vadd.f32 %v2222_v41, %v5324_v45  ;;  %v5419_v1 = vadd.f32 %v2150_v32, %v5329_v57  ;;  %v3850_v26 = vpop.f32.mrb[63].mxu0  ;;  %v3867_v35 = vpop.f32.mrb[61].mxu1  ;;  %v2281_v59 = vsel %vm750_vm2, %v5410_v37, -inf  ;;  %v1930_v12 = vpack.c.bf16 %v3515_v55, %v3514_v13 }
 0x2d5   : > { %v2225_v0 = vpop.f32.mrb[62].mxu1  ;;  %2282 = vmax.xlane.f32.xlu0 %v2281_v59  ;;  %3878 = vmatpush3.bf16.msra.mxu0 %v1927_v17  ;;  %v3510_v26 = vld [vmem:[%s4516_s18 + $0xd0] sm:$0xff]  ;;  %v3511_v35 = vld [vmem:[%s4516_s18 + $0xd8] sm:$0xff] }
 0x2d6   : > { %6454 = vst [vmem:[#allocation36_spill] sm:$0xff] %v5416_v61  ;;  %v5425_v5 = vadd.f32 %v2225_v0, %v5329_v57  ;;  %v3868_v45 = vpop.f32.mrb[63].mxu1  ;;  %v2284_v41 = vsel %vm750_vm2, %v5419_v1, -inf  ;;  %v2299_v32 = vsel %vm750_vm2, %v5416_v61, -inf  ;;  %3879 = vmatprep.subr.bf16.mxu0 %v6405_v7  ;;  %v1928_v59 = vpack.c.bf16 %v3511_v35, %v3510_v26  ;;  %3896 = vmatpush3.bf16.msra.mxu1 %v1930_v12 }
 0x2d7   : > { %2285 = vmax.xlane.f32.xlu1 %v2284_v41  ;;  %3897 = vmatprep.subr.bf16.mxu1 %v6405_v7 }
 0x2d8   : > { %6455 = vst [vmem:[#allocation37_spill] sm:$0xff] %v5425_v5  ;;  %v2302_v17 = vsel %vm750_vm2, %v5425_v5, -inf }
 0x2d9   : > { %2300 = vmax.xlane.f32.xlu0 %v2299_v32  ;;  %v2155_v0 = vpop.f32.mrb[64].mxu0  ;;  %3880 = vmatpush3.bf16.msra.mxu0 %v1928_v59  ;;  %v3517_v59 = vld [vmem:[%s4516_s18 + $0x108] sm:$0xff] }
 0x2da   : > { %v5437_v57 = vadd.f32 %v2155_v0, %v5352_v39  ;;  %v3853_v45 = vpop.f32.mrb[65].mxu0  ;;  %3881 = vmatprep.subr.bf16.mxu0 %v6405_v7  ;;  %v3513_v0 = vld [vmem:[%s4516_s18 + $0xe8] sm:$0xff] }
 0x2db   : > { %v2230_v41 = vpop.f32.mrb[64].mxu1  ;;  %2303 = vmax.xlane.f32.xlu1 %v2302_v17  ;;  %v2158_v14 = vpop.f32.mrb[66].mxu0  ;;  %v3516_v45 = vld [vmem:[%s4516_s18 + $0x100] sm:$0xff] }
 0x2dc   : > { %6456 = vst [vmem:[#allocation38_spill] sm:$0xff] %v5437_v57  ;;  %v5443_v26 = vadd.f32 %v2230_v41, %v5352_v39  ;;  %v5446_v13 = vadd.f32 %v2158_v14, %v5357_v36  ;;  %v3854_v32 = vpop.f32.mrb[67].mxu0  ;;  %v3871_v35 = vpop.f32.mrb[65].mxu1  ;;  %v2287_v55 = vsel %vm750_vm2, %v5437_v57, -inf  ;;  %v1929_v39 = vpack.c.bf16 %v3513_v0, %v3512_v60 }
 0x2dd   : > { %v2233_v17 = vpop.f32.mrb[66].mxu1  ;;  %2288 = vmax.xlane.f32.xlu0 %v2287_v55  ;;  %v1931_v35 = vpack.c.bf16 %v3517_v59, %v3516_v45  ;;  %v1932_v55 = vpack.c.bf16 %v3519_v43, %v3518_v40 }
 0x2de   : > { %6457 = vst [vmem:[#allocation39_spill] sm:$0xff] %v5443_v26  ;;  %6458 = vst [vmem:[#allocation40_spill] sm:$0xff] %v5446_v13  ;;  %v5456_v14 = vadd.f32 %v2233_v17, %v5357_v36  ;;  %v3872_v41 = vpop.f32.mrb[67].mxu1  ;;  %v2290_v32 = vsel %vm750_vm2, %v5446_v13, -inf  ;;  %v2305_v12 = vsel %vm750_vm2, %v5443_v26, -inf  ;;  %3882 = vmatpush3.bf16.msra.mxu0 %v1929_v39  ;;  %v5646_v13 = vld [vmem:[%s4516_s18 + $0x148] sm:$0xff] }
 0x2df   : > { %2291 = vmax.xlane.f32.xlu1 %v2290_v32  ;;  %3898 = vmatpush3.bf16.msra.mxu1 %v1931_v35 }
 0x2e0   : > { %6459 = vst [vmem:[#allocation41_spill] sm:$0xff] %v5456_v14  ;;  %3913 = vmatprep.subr.bf16.mxu0 %v6405_v7  ;;  %3899 = vmatprep.subr.bf16.mxu1 %v6405_v7  ;;  %v2308_v17 = vsel %vm750_vm2, %v5456_v14, -inf }
 0x2e1   : > { %2306 = vmax.xlane.f32.xlu0 %v2305_v12  ;;  %v2163_v60 = vpop.f32.mrb[68].mxu0 }
 0x2e2   : > { %v5467_v36 = vadd.f32 %v2163_v60, %v5382_v62  ;;  %v3857_v0 = vpop.f32.mrb[69].mxu0 }
 0x2e3   : > { %v2238_v45 = vpop.f32.mrb[68].mxu1  ;;  %2309 = vmax.xlane.f32.xlu1 %v2308_v17  ;;  %v2166_v59 = vpop.f32.mrb[70].mxu0  ;;  %3900 = vmatpush3.bf16.msra.mxu1 %v1932_v55  ;;  %v895_v17 = vsel %vm750_vm2, %v4906_v6, 0.0  ;;  %v910_v6 = vsel %vm750_vm2, %v5031_v22, 0.0  ;;  %v925_v22 = vsel %vm750_vm2, %v5058_v48, 0.0  ;;  %v6464_v48 = vld [vmem:[#allocation17_spill] sm:$0xff] }
 0x2e4   : > { %6460 = vst [vmem:[#allocation42_spill] sm:$0xff] %v5467_v36  ;;  %v5472_v39 = vadd.f32 %v2238_v45, %v5382_v62  ;;  %v5475_v43 = vadd.f32 %v2166_v59, %v5387_v27  ;;  %v3858_v40 = vpop.f32.mrb[71].mxu0  ;;  %v3875_v41 = vpop.f32.mrb[69].mxu1  ;;  %v2293_v32 = vsel %vm750_vm2, %v5467_v36, -inf  ;;  %3931 = vmatprep.subr.bf16.mxu1 %v6405_v7  ;;  %v901_v45 = vsel %vm750_vm2, %v4946_v56, 0.0 }
 0x2e5   : > { %v2241_v12 = vpop.f32.mrb[70].mxu1  ;;  %2294 = vmax.xlane.f32.xlu0 %v2293_v32  ;;  %v904_v59 = vsel %vm750_vm2, %v4956_v46, 0.0  ;;  %v907_v40 = vsel %vm750_vm2, %v5016_v11, 0.0  ;;  %v916_v56 = vsel %vm750_vm2, %v4924_v28, 0.0  ;;  %v919_v46 = vsel %vm750_vm2, %v4974_v25, 0.0  ;;  %v6465_v32 = vld [vmem:[#allocation18_spill] sm:$0xff] }
 0x2e6   : > { %6461 = vst [vmem:[#allocation43_spill] sm:$0xff] %v5472_v39  ;;  %6462 = vst [vmem:[#allocation44_spill] sm:$0xff] %v5475_v43  ;;  %v5481_v35 = vadd.f32 %v2241_v12, %v5387_v27  ;;  %v3876_v60 = vpop.f32.mrb[71].mxu1  ;;  %v2296_v62 = vsel %vm750_vm2, %v5475_v43, -inf  ;;  %v2311_v0 = vsel %vm750_vm2, %v5472_v39, -inf  ;;  %v898_v27 = vsel %vm750_vm2, %v4918_v21, 0.0 }
 0x2e7   : > { %2297 = vmax.xlane.f32.xlu1 %v2296_v62  ;;  %v913_v21 = vsel %vm750_vm2, %v4911_v15, 0.0  ;;  %v922_v11 = vsel %vm750_vm2, %v4995_v23, 0.0  ;;  %v928_v15 = vsel %vm750_vm2, %v5067_v33, 0.0  ;;  %v931_v28 = vsel %vm750_vm2, %v5078_v16, 0.0 }
 0x2e8   : > { %6463 = vst [vmem:[#allocation45_spill] sm:$0xff] %v5481_v35  ;;  %v2314_v55 = vsel %vm750_vm2, %v5481_v35, -inf  ;;  %v934_v25 = vsel %vm750_vm2, %v5089_v9, 0.0  ;;  %v937_v23 = vsel %vm750_vm2, %v5131_v34, 0.0  ;;  %v2470_v41 = vadd.s32 192, %v6464_v48 }
 0x2e9   : > { %2312 = vmax.xlane.f32.xlu0 %v2311_v0  ;;  %v940_v33 = vsel %vm750_vm2, %v5136_v52, 0.0  ;;  %v2471_v12 = vadd.s32 192, %v6465_v32  ;;  %v943_v16 = vsel %vm750_vm2, %v5158_v54, 0.0  ;;  %v2476_v9 = vadd.s32 240, %v6464_v48 }
 0x2ea   : > { %v2494_v60 = vmul.u32 48, %v2470_v41  ;;  %v946_v34 = vsel %vm750_vm2, %v5164_v58, 0.0  ;;  %v949_v52 = vsel %vm750_vm2, %v5105_v44, 0.0  ;;  %v952_v54 = vsel %vm750_vm2, %v5114_v29, 0.0 }
 0x2eb   : > { %2315 = vmax.xlane.f32.xlu1 %v2314_v55  ;;  %v2495_v62 = vmul.u32 48, %v2471_v12  ;;  %v2500_v55 = vmul.u32 48, %v2476_v9  ;;  %v955_v58 = vsel %vm750_vm2, %v5145_v42, 0.0  ;;  %v2482_v41 = vadd.s32 288, %v6464_v48 }
 0x2ec   : > { %v2518_v0 = vadd.s32 %v2494_v60, %v4695_v2  ;;  %v2488_v12 = vadd.s32 336, %v6464_v48 }
 0x2ed   : > { %896 = vadd.xlane.f32.xlu0 %v895_v17  ;;  %v5533_v17 = vstv %s2552_s30  ;;  %v2524_v44 = vadd.s32 %v2500_v55, %v4695_v2 }
 0x2ef   : > { %899 = vadd.xlane.f32.xlu1 %v898_v27  ;;  %v2519_v27 = vadd.s32 %v2495_v62, %v4695_v2 }
 0x2f1   : > { %902 = vadd.xlane.f32.xlu0 %v901_v45  ;;  %v2477_v45 = vadd.s32 240, %v6465_v32  ;;  %v2555_v29 = vxor.u32 %v5533_v17, %v2519_v27 }
 0x2f3   : > { %905 = vadd.xlane.f32.xlu1 %v904_v59  ;;  %v2554_v59 = vxor.u32 %v5533_v17, %v2518_v0  ;;  %v2506_v0 = vmul.u32 48, %v2482_v41 }
 0x2f5   : > { %908 = vadd.xlane.f32.xlu0 %v907_v40  ;;  %v6466_v40 = vld [vmem:[#allocation19_spill] sm:$0xff]  ;;  %v2578_v42 = vshrl.u32 %v2554_v59, 16 }
 0x2f7   : > { %911 = vadd.xlane.f32.xlu1 %v910_v6  ;;  %v2472_v6 = vadd.s32 192, %v6466_v40 }
 0x2f9   : > { %914 = vadd.xlane.f32.xlu0 %v913_v21  ;;  %v958_v21 = vsel %vm750_vm2, %v5149_v49, 0.0 }
 0x2fb   : > { %917 = vadd.xlane.f32.xlu1 %v916_v56  ;;  %v2501_v56 = vmul.u32 48, %v2477_v45  ;;  %v2489_v45 = vadd.s32 336, %v6465_v32 }
 0x2fd   : > { %920 = vadd.xlane.f32.xlu0 %v919_v46  ;;  %v6467_v46 = vld [vmem:[#allocation20_spill] sm:$0xff]  ;;  %v2525_v49 = vadd.s32 %v2501_v56, %v4695_v2 }
 0x2fe   : > { %v2479_v62 = vadd.s32 240, %v6467_v46 }
 0x2ff   : > { %923 = vadd.xlane.f32.xlu1 %v922_v11  ;;  %v2473_v11 = vadd.s32 192, %v6467_v46 }
 0x301   : > { %926 = vadd.xlane.f32.xlu0 %v925_v22  ;;  %v961_v22 = vsel %vm750_vm2, %v5171_v47, 0.0  ;;  %v2602_v47 = vxor.u32 %v2578_v42, %v2554_v59 }
 0x303   : > { %929 = vadd.xlane.f32.xlu1 %v928_v15  ;;  %v2560_v15 = vxor.u32 %v5533_v17, %v2524_v44  ;;  %v2626_v48 = vmul.u32 2146121005, %v2602_v47 }
 0x305   : > { %932 = vadd.xlane.f32.xlu0 %v931_v28  ;;  %v2496_v28 = vmul.u32 48, %v2472_v6  ;;  %v2584_v60 = vshrl.u32 %v2560_v15, 16  ;;  %v2503_v6 = vmul.u32 48, %v2479_v62 }
 0x307   : > { %935 = vadd.xlane.f32.xlu1 %v934_v25  ;;  %v964_v25 = vsel %vm750_vm2, %v5177_v4, 0.0  ;;  %v2520_v9 = vadd.s32 %v2496_v28, %v4695_v2  ;;  %v2513_v28 = vmul.u32 48, %v2489_v45  ;;  %v2527_v41 = vadd.s32 %v2503_v6, %v4695_v2 }
 0x309   : > { %938 = vadd.xlane.f32.xlu0 %v937_v23  ;;  %v2579_v23 = vshrl.u32 %v2555_v29, 16  ;;  %v2556_v59 = vxor.u32 %v5533_v17, %v2520_v9 }
 0x30b   : > { %941 = vadd.xlane.f32.xlu1 %v940_v33  ;;  %v2483_v33 = vadd.s32 288, %v6465_v32  ;;  %v2603_v4 = vxor.u32 %v2579_v23, %v2555_v29  ;;  %v2474_v32 = vadd.s32 192, %v4729_v20  ;;  %v2650_v23 = vshrl.u32 %v2626_v48, 15 }
 0x30d   : > { %944 = vadd.xlane.f32.xlu0 %v943_v16  ;;  %v2497_v16 = vmul.u32 48, %v2473_v11  ;;  %v2507_v55 = vmul.u32 48, %v2483_v33  ;;  %v2530_v11 = vadd.s32 %v2506_v0, %v4695_v2 }
 0x30f   : > { %947 = vadd.xlane.f32.xlu1 %v946_v34  ;;  %v2478_v34 = vadd.s32 240, %v6466_v40  ;;  %v2521_v27 = vadd.s32 %v2497_v16, %v4695_v2  ;;  %v2531_v29 = vadd.s32 %v2507_v55, %v4695_v2  ;;  %v2566_v16 = vxor.u32 %v5533_v17, %v2530_v11 }
 0x310   : > { %v2498_v55 = vmul.u32 48, %v2474_v32 }
 0x311   : > { %950 = vadd.xlane.f32.xlu0 %v949_v52  ;;  %v2561_v52 = vxor.u32 %v5533_v17, %v2525_v49  ;;  %v2502_v44 = vmul.u32 48, %v2478_v34  ;;  %v2557_v42 = vxor.u32 %v5533_v17, %v2521_v27  ;;  %v2567_v47 = vxor.u32 %v5533_v17, %v2531_v29 }
 0x312   : > { %v2537_v34 = vadd.s32 %v2513_v28, %v4695_v2  ;;  %v2590_v6 = vshrl.u32 %v2566_v16, 16  ;;  %v2522_v35 = vadd.s32 %v2498_v55, %v4695_v2 }
 0x313   : > { %953 = vadd.xlane.f32.xlu1 %v952_v54  ;;  %v2512_v54 = vmul.u32 48, %v2488_v12  ;;  %v2585_v56 = vshrl.u32 %v2561_v52, 16  ;;  %v2526_v49 = vadd.s32 %v2502_v44, %v4695_v2  ;;  %v2581_v9 = vshrl.u32 %v2557_v42, 16 }
 0x315   : > { %956 = vadd.xlane.f32.xlu0 %v955_v58  ;;  %v2608_v58 = vxor.u32 %v2584_v60, %v2560_v15  ;;  %v2580_v15 = vshrl.u32 %v2556_v59, 16  ;;  %v2609_v12 = vxor.u32 %v2585_v56, %v2561_v52  ;;  %v2562_v45 = vxor.u32 %v5533_v17, %v2526_v49 }
 0x316   : > { %v2591_v56 = vshrl.u32 %v2567_v47, 16  ;;  %v2605_v29 = vxor.u32 %v2581_v9, %v2557_v42  ;;  %v2614_v49 = vxor.u32 %v2590_v6, %v2566_v16  ;;  %v2558_v9 = vxor.u32 %v5533_v17, %v2522_v35 }
 0x317   : > { %959 = vadd.xlane.f32.xlu1 %v958_v21  ;;  %v2627_v21 = vmul.u32 2146121005, %v2603_v4  ;;  %v6468_v4 = vld [vmem:[#allocation21_spill] sm:$0xff]  ;;  %v2604_v27 = vxor.u32 %v2580_v15, %v2556_v59  ;;  %v2633_v44 = vmul.u32 2146121005, %v2609_v12 }
 0x318   : > { %v2475_v0 = vadd.s32 192, %v6468_v4  ;;  %v2481_v16 = vadd.s32 240, %v6468_v4 }
 0x319   : > { %962 = vadd.xlane.f32.xlu0 %v961_v22  ;;  %v2536_v22 = vadd.s32 %v2512_v54, %v4695_v2  ;;  %v2651_v33 = vshrl.u32 %v2627_v21, 15  ;;  %v2674_v54 = vxor.u32 %v2650_v23, %v2626_v48  ;;  %v2628_v32 = vmul.u32 2146121005, %v2604_v27 }
 0x31a   : > { %v2499_v28 = vmul.u32 48, %v2475_v0  ;;  %v2586_v48 = vshrl.u32 %v2562_v45, 16  ;;  %v2657_v15 = vshrl.u32 %v2633_v44, 15 }
 0x31b   : > { %965 = vadd.xlane.f32.xlu1 %v964_v25  ;;  %v2632_v25 = vmul.u32 2146121005, %v2608_v58  ;;  %v2572_v60 = vxor.u32 %v5533_v17, %v2536_v22  ;;  %v2563_v58 = vxor.u32 %v5533_v17, %v2527_v41  ;;  %v2675_v52 = vxor.u32 %v2651_v33, %v2627_v21 }
 0x31c   : > { %v2573_v22 = vxor.u32 %v5533_v17, %v2537_v34  ;;  %v2698_v39 = vmul.u32 2221713035, %v2674_v54  ;;  %v2615_v41 = vxor.u32 %v2591_v56, %v2567_v47  ;;  %v2629_v33 = vmul.u32 2146121005, %v2605_v29 }
 0x31d   : > { %v2656_v62 = vshrl.u32 %v2632_v25, 15  ;;  %v2596_v11 = vshrl.u32 %v2572_v60, 16  ;;  %v2587_v59 = vshrl.u32 %v2563_v58, 16  ;;  %v2699_v23 = vmul.u32 2221713035, %v2675_v52 }
 0x31e   : > { %v2597_v12 = vshrl.u32 %v2573_v22, 16  ;;  %v2523_v42 = vadd.s32 %v2499_v28, %v4695_v2  ;;  %v2722_v34 = vshrl.u32 %v2698_v39, 16  ;;  %v2610_v0 = vxor.u32 %v2586_v48, %v2562_v45 }
 0x31f   : > { %v2680_v51 = vxor.u32 %v2656_v62, %v2632_v25  ;;  %v2620_v21 = vxor.u32 %v2596_v11, %v2572_v60  ;;  %v2480_v25 = vadd.s32 240, %v4729_v20  ;;  %v2652_v62 = vshrl.u32 %v2628_v32, 15 }
 0x320   : > { %v2611_v55 = vxor.u32 %v2587_v59, %v2563_v58  ;;  %v2723_v54 = vshrl.u32 %v2699_v23, 16  ;;  %v2681_v27 = vxor.u32 %v2657_v15, %v2633_v44  ;;  %v2638_v52 = vmul.u32 2146121005, %v2614_v49 }
 0x321   : > { %v2704_v43 = vmul.u32 2221713035, %v2680_v51  ;;  %v2639_v47 = vmul.u32 2146121005, %v2615_v41  ;;  %v2653_v6 = vshrl.u32 %v2629_v33, 15  ;;  %v2621_v56 = vxor.u32 %v2597_v12, %v2573_v22 }
 0x322   : > { %v2644_v60 = vmul.u32 2146121005, %v2620_v21  ;;  %v2559_v11 = vxor.u32 %v5533_v17, %v2523_v42  ;;  %v2582_v29 = vshrl.u32 %v2558_v9, 16  ;;  %v2504_v35 = vmul.u32 48, %v2480_v25 }
 0x323   : > { %v2728_v51 = vshrl.u32 %v2704_v43, 16  ;;  %v5585_v28 = vxor.u32 %v2722_v34, %v2698_v39  ;;  %v2676_v36 = vxor.u32 %v2652_v62, %v2628_v32  ;;  %v2634_v14 = vmul.u32 2146121005, %v2610_v0 }
 0x324   : > { %v2635_v45 = vmul.u32 2146121005, %v2611_v55  ;;  %v5587_v58 = vxor.u32 %v2723_v54, %v2699_v23  ;;  %v2705_v44 = vmul.u32 2221713035, %v2681_v27  ;;  %v2662_v48 = vshrl.u32 %v2638_v52, 15 }
 0x325   : > { %v2505_v59 = vmul.u32 48, %v2481_v16  ;;  %v2663_v15 = vshrl.u32 %v2639_v47, 15  ;;  %v2668_v49 = vshrl.u32 %v2644_v60, 15  ;;  %v2677_v41 = vxor.u32 %v2653_v6, %v2629_v33 }
 0x326   : > { %v2645_v21 = vmul.u32 2146121005, %v2621_v56  ;;  %v5589_v22 = vxor.u32 %v2728_v51, %v2704_v43  ;;  %v2583_v12 = vshrl.u32 %v2559_v11, 16  ;;  %v2606_v42 = vxor.u32 %v2582_v29, %v2558_v9 }
 0x327   : > { %v2528_v25 = vadd.s32 %v2504_v35, %v4695_v2  ;;  %v2700_v39 = vmul.u32 2221713035, %v2676_v36  ;;  %v2658_v34 = vshrl.u32 %v2634_v14, 15  ;;  %v2659_v32 = vshrl.u32 %v2635_v45, 15 }
 0x328   : > { %v2484_v62 = vadd.s32 288, %v6466_v40  ;;  %v2729_v23 = vshrl.u32 %v2705_v44, 16  ;;  %v2686_v0 = vxor.u32 %v2662_v48, %v2638_v52  ;;  %v2529_v55 = vadd.s32 %v2505_v59, %v4695_v2 }
 0x329   : > { %v2485_v54 = vadd.s32 288, %v6467_v46  ;;  %v2687_v27 = vxor.u32 %v2663_v15, %v2639_v47  ;;  %v5595_v33 = vxor.u32 %v2668_v49, %v2644_v60  ;;  %v2701_v43 = vmul.u32 2221713035, %v2677_v41 }
 0x32a   : > { %v2669_v16 = vshrl.u32 %v2645_v21, 15  ;;  %v2607_v6 = vxor.u32 %v2583_v12, %v2559_v11  ;;  %v2630_v9 = vmul.u32 2146121005, %v2606_v42  ;;  %v2564_v56 = vxor.u32 %v5533_v17, %v2528_v25 }
 0x32b   : > { %v2490_v36 = vadd.s32 336, %v6466_v40  ;;  %v2724_v51 = vshrl.u32 %v2700_v39, 16  ;;  %v2682_v29 = vxor.u32 %v2658_v34, %v2634_v14  ;;  %v2683_v35 = vxor.u32 %v2659_v32, %v2635_v45 }
 0x32c   : > { %v2508_v26 = vmul.u32 48, %v2484_v62  ;;  %v2710_v52 = vmul.u32 2221713035, %v2686_v0  ;;  %v2565_v48 = vxor.u32 %v5533_v17, %v2529_v55  ;;  %v2491_v47 = vadd.s32 336, %v6467_v46 }
 0x32d   : > { %v2509_v59 = vmul.u32 48, %v2485_v54  ;;  %v2711_v60 = vmul.u32 2221713035, %v2687_v27  ;;  %v2725_v49 = vshrl.u32 %v2701_v43, 16  ;;  %v2693_v11 = vxor.u32 %v2669_v16, %v2645_v21 }
 0x32e   : > { %v2716_v15 = vmul.u32 2221713035, %v5595_v33  ;;  %v2631_v41 = vmul.u32 2146121005, %v2607_v6  ;;  %v2654_v12 = vshrl.u32 %v2630_v9, 15  ;;  %v2588_v40 = vshrl.u32 %v2564_v56, 16 }
 0x32f   : > { %v2514_v42 = vmul.u32 48, %v2490_v36  ;;  %v5602_v14 = vxor.u32 %v2729_v23, %v2705_v44  ;;  %v2706_v45 = vmul.u32 2221713035, %v2682_v29  ;;  %v2532_v34 = vadd.s32 %v2508_v26, %v4695_v2  ;;  %v5611_v44 = vld [vmem:[%s4516_s18 + $0x120] sm:$0xff]  ;;  %v5614_v23 = vld [vmem:[%s4516_s18 + $0x128] sm:$0xff]  ;;  %v5619_v26 = vld [vmem:[%s4516_s18 + $0x130] sm:$0xff] }
 0x330   : > { %v2707_v25 = vmul.u32 2221713035, %v2683_v35  ;;  %v5605_v46 = vxor.u32 %v2724_v51, %v2700_v39  ;;  %v2589_v32 = vshrl.u32 %v2565_v48, 16  ;;  %v2533_v62 = vadd.s32 %v2509_v59, %v4695_v2  ;;  %v5622_v39 = vld [vmem:[%s4516_s18 + $0x138] sm:$0xff]  ;;  %v5629_v59 = vld [vmem:[%s4516_s18 + $0x150] sm:$0xff] }
 0x331   : > { %v2515_v21 = vmul.u32 48, %v2491_v47  ;;  %v2734_v0 = vshrl.u32 %v2710_v52, 16  ;;  %v2735_v55 = vshrl.u32 %v2711_v60, 16  ;;  %v5608_v54 = vxor.u32 %v2725_v49, %v2701_v43 }
 0x332   : > { %v2717_v27 = vmul.u32 2221713035, %v2693_v11  ;;  %v2655_v33 = vshrl.u32 %v2631_v41, 15  ;;  %v5616_v16 = vxor.u32 %v2654_v12, %v2630_v9  ;;  %v2612_v6 = vxor.u32 %v2588_v40, %v2564_v56  ;;  %v5643_v9 = vld [vmem:[%s4516_s18 + $0x140] sm:$0xff] }
 0x333   : > { %v2538_v36 = vadd.s32 %v2514_v42, %v4695_v2  ;;  %v2740_v43 = vshrl.u32 %v2716_v15, 16  ;;  %v2730_v51 = vshrl.u32 %v2706_v45, 16  ;;  %v2731_v29 = vshrl.u32 %v2707_v25, 16 }
 0x334   : > { %v2568_v35 = vxor.u32 %v5533_v17, %v2532_v34  ;;  %v2613_v47 = vxor.u32 %v2589_v32, %v2565_v48  ;;  %v2569_v49 = vxor.u32 %v5533_v17, %v2533_v62  ;;  %v2539_v56 = vadd.s32 %v2515_v21, %v4695_v2  ;;  %v5640_v34 = vld [vmem:[%s4516_s18 + $0x158] sm:$0xff]  ;;  %v5652_v62 = vld [vmem:[%s4516_s18 + $0x160] sm:$0xff] }
 0x335   : > { %v5633_v11 = vxor.u32 %v2734_v0, %v2710_v52  ;;  %v5635_v12 = vxor.u32 %v2735_v55, %v2711_v60  ;;  %v2741_v40 = vshrl.u32 %v2717_v27, 16  ;;  %v5648_v48 = vxor.u32 %v2655_v33, %v2631_v41  ;;  %6471 = vst [vmem:[#allocation19_spill] sm:$0xff] %v5652_v62  ;;  %v5655_v60 = vld [vmem:[%s4516_s18 + $0x168] sm:$0xff] }
 0x336   : > { %v2702_v32 = vmul.u32 2221713035, %v5616_v16  ;;  %v2636_v52 = vmul.u32 2146121005, %v2612_v6  ;;  %v2574_v21 = vxor.u32 %v5533_v17, %v2538_v36  ;;  %v5658_v0 = vxor.u32 %v2740_v43, %v2716_v15  ;;  %v5667_v16 = vld [vmem:[%s4516_s18 + $0x170] sm:$0xff]  ;;  %v5670_v6 = vld [vmem:[%s4516_s18 + $0x178] sm:$0xff] }
 0x337   : > { %6469 = vst [vmem:[#allocation17_spill] sm:$0xff] %v5633_v11  ;;  %6470 = vst [vmem:[#allocation18_spill] sm:$0xff] %v5635_v12  ;;  %v5660_v55 = vxor.u32 %v2730_v51, %v2706_v45  ;;  %v5662_v42 = vxor.u32 %v2731_v29, %v2707_v25  ;;  %v2592_v57 = vshrl.u32 %v2568_v35, 16  ;;  %v2637_v33 = vmul.u32 2146121005, %v2613_v47  ;;  %s4288_s18 = smov 32  }
 0x338   : > { %6472 = vst [vmem:[#allocation20_spill] sm:$0xff] %v5658_v0  ;;  %v2593_v12 = vshrl.u32 %v2569_v49, 16  ;;  %v2575_v11 = vxor.u32 %v5533_v17, %v2539_v56  ;;  %v5674_v36 = vxor.u32 %v2741_v40, %v2717_v27  ;;  %v2703_v51 = vmul.u32 2221713035, %v5648_v48 }
 0x339   : > { %v2726_v29 = vshrl.u32 %v2702_v32, 16  ;;  %v2660_v47 = vshrl.u32 %v2636_v52, 15  ;;  %v2598_v41 = vshrl.u32 %v2574_v21, 16  ;;  %v2661_v56 = vshrl.u32 %v2637_v33, 15 }
 0x33a   : > { %6473 = vst [vmem:[#allocation21_spill] sm:$0xff] %v5674_v36  ;;  %v5686_v40 = vxor.u32 %v2593_v12, %v2569_v49  ;;  %v2599_v45 = vshrl.u32 %v2575_v11, 16  ;;  %v2486_v25 = vadd.s32 288, %v4729_v20  ;;  %vm2770_vm14 = vcmp.ge.u32.totalorder %v5585_v28, 1444339130 }
 0x33b   : > { %vm2771_vm15 = vcmp.ge.u32.totalorder %v5587_v58, 1444339130  ;;  %v5701_v12 = vxor.u32 %v2661_v56, %v2637_v33  ;;  %v2493_v33 = vadd.s32 336, %v6468_v4  ;;  %vm2776_vm3 = vcmp.ge.u32.totalorder %v5589_v22, 1444339130 }
 0x33c   : > { %vm2777_vm4 = vcmp.ge.u32.totalorder %v5602_v14, 1444339130  ;;  %vm2772_vm5 = vcmp.ge.u32.totalorder %v5605_v46, 1444339130  ;;  %vm2773_vm6 = vcmp.ge.u32.totalorder %v5608_v54, 1444339130  ;;  %v6476_v54 = vpack.c.bf16 %v5640_v34, %v5629_v59 }
 0x33d   : > { %vm2778_vm7 = vcmp.ge.u32.totalorder %v5660_v55, 1444339130  ;;  %vm2779_vm8 = vcmp.ge.u32.totalorder %v5662_v42, 1444339130  ;;  %v6477_v34 = vld [vmem:[#allocation36_spill] sm:$0xff] }
 0x33e   : > { %v6480_v55 = vld [vmem:[#allocation18_spill] sm:$0xff] }
 0x33f   : > { %vm2783_vm13 = vcmp.ge.u32.totalorder %v6480_v55, 1444339130 }
 0x34a   : > { %v2247_v5 = vpop.xlane.xlu0 %2246 }
 0x34b   : > { %v2317_v15 = vsub.f32 %v5332_v31, %v2247_v5  ;;  %v5684_v31 = vxor.u32 %v2592_v57, %v2568_v35  ;;  %v5693_v5 = vxor.u32 %v2660_v47, %v2636_v52  ;;  %v5695_v57 = vxor.u32 %v2598_v41, %v2574_v21 }
 0x34c   : > { %v2250_v43 = vpop.xlane.xlu1 %2249  ;;  %v2510_v52 = vmul.u32 48, %v2486_v25 }
 0x34d   : > { %v2341_v0 = vmul.f32 1.442695, %v2317_v15  ;;  %v2318_v61 = vsub.f32 %v5335_v50, %v2250_v43  ;;  %v2487_v15 = vadd.s32 288, %v6468_v4  ;;  %v2727_v50 = vshrl.u32 %v2703_v51, 16 }
 0x34e   : > { %v2265_v27 = vpop.xlane.xlu0 %2264  ;;  %v5691_v43 = vxor.u32 %v2726_v29, %v2702_v32  ;;  %v2641_v32 = vmul.u32 2146121005, %v5686_v40  ;;  %v2534_v56 = vadd.s32 %v2510_v52, %v4695_v2 }
 0x34f   : > { %4062 = vpow2.f32 %v2341_v0  ;;  %v2343_v48 = vmul.f32 1.442695, %v2318_v61  ;;  %v2323_v36 = vsub.f32 %v5338_v24, %v2265_v27  ;;  %v2640_v24 = vmul.u32 2146121005, %v5684_v31 }
 0x350   : > { %v2268_v62 = vpop.xlane.xlu1 %2267  ;;  %v5704_v0 = vxor.u32 %v2599_v45, %v2575_v11  ;;  %v2511_v29 = vmul.u32 48, %v2487_v15  ;;  %v2709_v31 = vmul.u32 2221713035, %v5701_v12  ;;  %v2665_v27 = vshrl.u32 %v2641_v32, 15 }
 0x351   : > { %4064 = vpow2.f32 %v2343_v48  ;;  %v2353_v35 = vmul.f32 1.442695, %v2323_v36  ;;  %v2324_v61 = vsub.f32 %v5343_v38, %v2268_v62  ;;  %v2708_v36 = vmul.u32 2221713035, %v5693_v5 }
 0x352   : > { %v2253_v49 = vpop.xlane.xlu0 %2252  ;;  %v2646_v38 = vmul.u32 2146121005, %v5695_v57  ;;  %v2492_v62 = vadd.s32 336, %v4729_v20  ;;  %v2664_v25 = vshrl.u32 %v2640_v24, 15  ;;  %v2647_v5 = vmul.u32 2146121005, %v5704_v0 }
 0x353   : > { %4066 = vpow2.f32 %v2353_v35  ;;  %v2355_v21 = vmul.f32 1.442695, %v2324_v61  ;;  %v2319_v41 = vsub.f32 %v5360_v10, %v2253_v49  ;;  %v2535_v40 = vadd.s32 %v2511_v29, %v4695_v2 }
 0x354   : > { %v2256_v47 = vpop.xlane.xlu1 %2255  ;;  %v5719_v15 = vxor.u32 %v2727_v50, %v2703_v51  ;;  %v2670_v57 = vshrl.u32 %v2646_v38, 15  ;;  %v2517_v35 = vmul.u32 48, %v2493_v33  ;;  %v2732_v52 = vshrl.u32 %v2708_v36, 16 }
 0x355   : > { %4068 = vpow2.f32 %v2355_v21  ;;  %v2345_v11 = vmul.f32 1.442695, %v2319_v41  ;;  %v2320_v45 = vsub.f32 %v5368_v18, %v2256_v47  ;;  %v2516_v18 = vmul.u32 48, %v2492_v62 }
 0x356   : > { %v2271_v10 = vpop.xlane.xlu0 %2270  ;;  %v2733_v41 = vshrl.u32 %v2709_v31, 16  ;;  %v5728_v51 = vxor.u32 %v2664_v25, %v2640_v24  ;;  %v5730_v50 = vxor.u32 %v2665_v27, %v2641_v32  ;;  %v2570_v29 = vxor.u32 %v5533_v17, %v2534_v56 }
 0x357   : > { %4070 = vpow2.f32 %v2345_v11  ;;  %v2347_v20 = vmul.f32 1.442695, %v2320_v45  ;;  %v2325_v4 = vsub.f32 %v5365_v53, %v2271_v10  ;;  %v2571_v33 = vxor.u32 %v5533_v17, %v2535_v40 }
 0x358   : > { %v2274_v48 = vpop.xlane.xlu1 %2273  ;;  %v2540_v45 = vadd.s32 %v2516_v18, %v4695_v2  ;;  %v2541_v25 = vadd.s32 %v2517_v35, %v4695_v2  ;;  %v2671_v58 = vshrl.u32 %v2647_v5, 15  ;;  %v2594_v2 = vshrl.u32 %v2570_v29, 16 }
 0x359   : > { %v5721_v61 = vpop.eup %4062  ;;  %4072 = vpow2.f32 %v2347_v20  ;;  %v2357_v49 = vmul.f32 1.442695, %v2325_v4  ;;  %v2326_v21 = vsub.f32 %v5373_v63, %v2274_v48  ;;  %v5750_v20 = vxor.u32 %v2732_v52, %v2708_v36 }
 0x35a   : > { %v2259_v53 = vpop.xlane.xlu0 %2258  ;;  %v2794_v11 = vsel %vm2770_vm14, %v5721_v61, 0.0  ;;  %v5754_v4 = vxor.u32 %v2670_v57, %v2646_v38  ;;  %v6474_v57 = vpack.c.bf16 %v5614_v23, %v5611_v44  ;;  %vm2774_vm9 = vcmp.ge.u32.totalorder %v5691_v43, 1444339130 }
 0x35b   : > { %v5733_v47 = vpop.eup %4064  ;;  %4074 = vpow2.f32 %v2357_v49  ;;  %v2359_v62 = vmul.f32 1.442695, %v2326_v21  ;;  %v2321_v63 = vsub.f32 %v5390_v19, %v2259_v53  ;;  %v2577_v49 = vxor.u32 %v5533_v17, %v2541_v25 }
 0x35c   : > { %v2795_v24 = vsel %vm2771_vm15, %v5733_v47, 0.0  ;;  %v2262_v32 = vpop.xlane.xlu1 %2261  ;;  %vm2775_vm10 = vcmp.ge.u32.totalorder %v5719_v15, 1444339130  ;;  %v5781_v44 = vxor.u32 %v2733_v41, %v2709_v31  ;;  %v2713_v23 = vmul.u32 2221713035, %v5730_v50 }
 0x35d   : > { %v5745_v10 = vpop.eup %4066  ;;  %v2818_v27 = vpack.c.bf16 %v2795_v24, %v2794_v11  ;;  %4076 = vpow2.f32 %v2359_v62  ;;  %v2349_v19 = vmul.f32 1.442695, %v2321_v63  ;;  %v2322_v56 = vsub.f32 %v5398_v8, %v2262_v32 }
 0x35e   : > { %v2277_v28 = vpop.xlane.xlu0 %2276  ;;  %v2595_v8 = vshrl.u32 %v2571_v33, 16  ;;  %v2800_v36 = vsel %vm2776_vm3, %v5745_v10, 0.0  ;;  %v5785_v62 = vxor.u32 %v2594_v2, %v2570_v29  ;;  %v6475_v41 = vpack.c.bf16 %v5622_v39, %v5619_v26 }
 0x35f   : > { %v5756_v40 = vpop.eup %4068  ;;  %4078 = vpow2.f32 %v2349_v19  ;;  %v2351_v48 = vmul.f32 1.442695, %v2322_v56  ;;  %v2327_v18 = vsub.f32 %v5395_v30, %v2277_v28  ;;  %3884 = vmatmul.mubr.msk.bf16.vlgmr.msra.gmra.mrb[72].mxu0 %vm750_vm2, %v2818_v27  ;;  %v2576_v30 = vxor.u32 %v5533_v17, %v2540_v45 }
 0x360   : > { %v2801_v35 = vsel %vm2777_vm4, %v5756_v40, 0.0  ;;  %v2280_v38 = vpop.xlane.xlu1 %2279  ;;  %3887 = vmatprep.mubr.msk.bf16.mxu0 %vm4287_vm0, %v6405_v7  ;;  %3914 = vmatpush3.bf16.msra.mxu0 %v6474_v57  ;;  %v2712_v17 = vmul.u32 2221713035, %v5728_v51  ;;  %v5791_v24 = vxor.u32 %v2595_v8, %v2571_v33  ;;  %v2601_v29 = vshrl.u32 %v2577_v49, 16 }
 0x361   : > { %v5773_v21 = vpop.eup %4070  ;;  %v2821_v22 = vpack.c.bf16 %v2801_v35, %v2800_v36  ;;  %4080 = vpow2.f32 %v2351_v48  ;;  %v2361_v52 = vmul.f32 1.442695, %v2327_v18  ;;  %v2328_v14 = vsub.f32 %v5403_v3, %v2280_v38  ;;  %3915 = vmatprep.subr.bf16.mxu0 %v6405_v7  ;;  %v6479_v36 = vld [vmem:[#allocation17_spill] sm:$0xff] }
 0x362   : > { %v2283_v53 = vpop.xlane.xlu0 %2282  ;;  %v2796_v12 = vsel %vm2772_vm5, %v5773_v21, 0.0  ;;  %vm2780_vm11 = vcmp.ge.u32.totalorder %v5750_v20, 1444339130  ;;  %v5815_v26 = vxor.u32 %v2671_v58, %v2647_v5  ;;  %v2718_v39 = vmul.u32 2221713035, %v5754_v4  ;;  %v6481_v35 = vld [vmem:[#allocation37_spill] sm:$0xff] }
 0x363   : > { %v5787_v63 = vpop.eup %4072  ;;  %4082 = vpow2.f32 %v2361_v52  ;;  %v2363_v3 = vmul.f32 1.442695, %v2328_v14  ;;  %v2329_v11 = vsub.f32 %v5410_v37, %v2283_v53  ;;  %3902 = vmatmul.mubr.msk.bf16.vlgmr.msra.gmra.mrb[72].mxu1 %vm750_vm2, %v2821_v22  ;;  %v2600_v37 = vshrl.u32 %v2576_v30, 16  ;;  %v6482_v22 = vld [vmem:[#allocation19_spill] sm:$0xff] }
 0x364   : > { %v2286_v32 = vpop.xlane.xlu1 %2285  ;;  %v2797_v31 = vsel %vm2773_vm6, %v5787_v63, 0.0  ;;  %3905 = vmatprep.mubr.msk.bf16.mxu1 %vm4287_vm0, %v6405_v7  ;;  %3916 = vmatpush3.bf16.msra.mxu0 %v6475_v41  ;;  %v2643_v28 = vmul.u32 2146121005, %v5791_v24  ;;  %v6478_v58 = vpack.c.bf16 %v5646_v13, %v5643_v9  ;;  %v5837_v18 = vxor.u32 %v2601_v29, %v2577_v49  ;;  %v6486_v29 = vld [vmem:[#allocation21_spill] sm:$0xff] }
 0x365   : > { %v5804_v33 = vpop.eup %4074  ;;  %4084 = vpow2.f32 %v2363_v3  ;;  %v2365_v45 = vmul.f32 1.442695, %v2329_v11  ;;  %v2330_v46 = vsub.f32 %v5419_v1, %v2286_v32  ;;  %v2819_v25 = vpack.c.bf16 %v2797_v31, %v2796_v12  ;;  %3932 = vmatpush3.bf16.msra.mxu1 %v6476_v54  ;;  %3917 = vmatprep.subr.bf16.mxu0 %v6405_v7 }
 0x366   : > { %v2301_v27 = vpop.xlane.xlu0 %2300  ;;  %3933 = vmatprep.subr.bf16.mxu1 %v6405_v7  ;;  %v2642_v1 = vmul.u32 2146121005, %v5785_v62  ;;  %v2802_v0 = vsel %vm2778_vm7, %v5804_v33, 0.0  ;;  %v5835_v48 = vxor.u32 %v2600_v37, %v2576_v30  ;;  %vm2782_vm12 = vcmp.ge.u32.totalorder %v6479_v36, 1444339130  ;;  %v6484_v62 = vld [vmem:[#allocation38_spill] sm:$0xff] }
 0x367   : > { %v5819_v19 = vpop.eup %4076  ;;  %4086 = vpow2.f32 %v2365_v45  ;;  %v2367_v59 = vmul.f32 1.442695, %v2330_v46  ;;  %v2335_v56 = vsub.f32 %v6477_v34, %v2301_v27  ;;  %3888 = vmatmul.mubr.msk.bf16.gmra.mrb[76].mxu0 %vm750_vm2, %v2819_v25  ;;  %v6483_v52 = vpack.c.bf16 %v5655_v60, %v6482_v22  ;;  %v6485_v37 = vld [vmem:[#allocation20_spill] sm:$0xff] }
 0x368   : > { %v2304_v2 = vpop.xlane.xlu1 %2303  ;;  %v2803_v5 = vsel %vm2779_vm8, %v5819_v19, 0.0  ;;  %3891 = vmatprep.mubr.msk.bf16.mxu0 %vm4287_vm0, %v6405_v7  ;;  %3918 = vmatpush3.bf16.msra.mxu0 %v6478_v58  ;;  %vm2781_vm14 = vcmp.ge.u32.totalorder %v5781_v44, 1444339130  ;;  %v2736_v9 = vshrl.u32 %v2712_v17, 16  ;;  %v2737_v30 = vshrl.u32 %v2713_v23, 16  ;;  %v6487_v45 = vld [vmem:[#allocation40_spill] sm:$0xff] }
 0x369   : > { %v5839_v8 = vpop.eup %4078  ;;  %4088 = vpow2.f32 %v2367_v59  ;;  %v2377_v42 = vmul.f32 1.442695, %v2335_v56  ;;  %v2336_v38 = vsub.f32 %v6481_v35, %v2304_v2  ;;  %v2822_v57 = vpack.c.bf16 %v2803_v5, %v2802_v0  ;;  %3934 = vmatpush3.bf16.msra.mxu1 %v6483_v52  ;;  %v6489_v5 = vld [vmem:[#allocation39_spill] sm:$0xff] }
 0x36a   : > { %v2289_v13 = vpop.xlane.xlu0 %2288  ;;  %3935 = vmatprep.subr.bf16.mxu1 %v6405_v7  ;;  %v2666_v49 = vshrl.u32 %v2642_v1, 15  ;;  %v2667_v60 = vshrl.u32 %v2643_v28, 15  ;;  %v2798_v24 = vsel %vm2774_vm9, %v5839_v8, 0.0  ;;  %v2648_v12 = vmul.u32 2146121005, %v5835_v48 }
 0x36b   : > { %v5853_v14 = vpop.eup %4080  ;;  %4090 = vpow2.f32 %v2377_v42  ;;  %v2379_v53 = vmul.f32 1.442695, %v2336_v38  ;;  %v2331_v3 = vsub.f32 %v6484_v62, %v2289_v13  ;;  %3906 = vmatmul.mubr.msk.bf16.gmra.mrb[76].mxu1 %vm750_vm2, %v2822_v57  ;;  %v2649_v31 = vmul.u32 2146121005, %v5837_v18 }
 0x36c   : > { %v2292_v11 = vpop.xlane.xlu1 %2291  ;;  %v2799_v32 = vsel %vm2775_vm10, %v5853_v14, 0.0  ;;  %3909 = vmatprep.mubr.msk.bf16.mxu1 %vm4287_vm0, %v6405_v7  ;;  %vm2788_vm15 = vcmp.ge.u32.totalorder %v6485_v37, 1444339130  ;;  %vm2789_vm3 = vcmp.ge.u32.totalorder %v6486_v29, 1444339130  ;;  %v6488_v15 = vpack.c.bf16 %v5670_v6, %v5667_v16 }
 0x36d   : > { %v5867_v41 = vpop.eup %4082  ;;  %4092 = vpow2.f32 %v2379_v53  ;;  %v2369_v43 = vmul.f32 1.442695, %v2331_v3  ;;  %v2332_v46 = vsub.f32 %v6487_v45, %v2292_v11  ;;  %v2820_v25 = vpack.c.bf16 %v2799_v32, %v2798_v24  ;;  %v6492_v11 = vld [vmem:[#allocation44_spill] sm:$0xff]  ;;  %v6493_v45 = vld [vmem:[#allocation43_spill] sm:$0xff] }
 0x36e   : > { %3936 = vmatpush3.bf16.msra.mxu1 %v6488_v15  ;;  %v2307_v54 = vpop.xlane.xlu0 %2306  ;;  %v5877_v27 = vxor.u32 %v2736_v9, %v2712_v17  ;;  %v2719_v59 = vmul.u32 2221713035, %v5815_v26  ;;  %v2742_v34 = vshrl.u32 %v2718_v39, 16  ;;  %v5882_v56 = vxor.u32 %v2666_v49, %v2642_v1  ;;  %v6491_v9 = vld [vmem:[#allocation42_spill] sm:$0xff] }
 0x36f   : > { %v5884_v2 = vpop.eup %4084  ;;  %4094 = vpow2.f32 %v2369_v43  ;;  %v2371_v0 = vmul.f32 1.442695, %v2332_v46  ;;  %v2337_v58 = vsub.f32 %v6489_v5, %v2307_v54  ;;  %3892 = vmatmul.mubr.msk.bf16.gmra.mrb[80].mxu0 %vm750_vm2, %v2820_v25  ;;  %v5888_v16 = vxor.u32 %v2667_v60, %v2643_v28  ;;  %v6490_v28 = vld [vmem:[#allocation41_spill] sm:$0xff] }
 0x370   : > { %v2310_v6 = vpop.xlane.xlu1 %2309  ;;  %v2804_v51 = vsel %vm2780_vm11, %v5867_v41, 0.0  ;;  %v2805_v17 = vsel %vm2781_vm14, %v5884_v2, 0.0  ;;  %3919 = vmatprep.mubr.msk.bf16.mxu0 %vm4287_vm0, %v6405_v7  ;;  %v2672_v26 = vshrl.u32 %v2648_v12, 15  ;;  %v2673_v1 = vshrl.u32 %v2649_v31, 15 }
 0x371   : > { %v5898_v48 = vpop.eup %4086  ;;  %4096 = vpow2.f32 %v2371_v0  ;;  %v2381_v18 = vmul.f32 1.442695, %v2337_v58  ;;  %v2338_v42 = vsub.f32 %v6490_v28, %v2310_v6  ;;  %v2823_v35 = vpack.c.bf16 %v2805_v17, %v2804_v51  ;;  %v6494_v58 = vld [vmem:[#allocation45_spill] sm:$0xff] }
 0x372   : > { %v2295_v38 = vpop.xlane.xlu0 %2294  ;;  %v2761_v20 = vxor.u32 %v2737_v30, %v2713_v23  ;;  %v2743_v57 = vshrl.u32 %v2719_v59, 16  ;;  %v5905_v44 = vxor.u32 %v2742_v34, %v2718_v39  ;;  %v2714_v22 = vmul.u32 2221713035, %v5882_v56 }
 0x373   : > { %v5908_v52 = vpop.eup %4088  ;;  %4098 = vpow2.f32 %v2381_v18  ;;  %v2383_v13 = vmul.f32 1.442695, %v2338_v42  ;;  %v2333_v49 = vsub.f32 %v6491_v9, %v2295_v38  ;;  %3910 = vmatmul.mubr.msk.bf16.gmra.mrb[80].mxu1 %vm750_vm2, %v2823_v35  ;;  %v2715_v53 = vmul.u32 2221713035, %v5888_v16 }
 0x374   : > { %v2806_v50 = vsel %vm2782_vm12, %v5898_v48, 0.0  ;;  %v2807_v4 = vsel %vm2783_vm13, %v5908_v52, 0.0  ;;  %v2298_v23 = vpop.xlane.xlu1 %2297  ;;  %3937 = vmatprep.mubr.msk.bf16.mxu1 %vm4287_vm0, %v6405_v7  ;;  %v5921_v39 = vxor.u32 %v2672_v26, %v2648_v12  ;;  %v5923_v30 = vxor.u32 %v2673_v1, %v2649_v31 }
 0x375   : > { %v5925_v62 = vpop.eup %4090  ;;  %v2824_v3 = vpack.c.bf16 %v2807_v4, %v2806_v50  ;;  %4100 = vpow2.f32 %v2383_v13  ;;  %v2373_v60 = vmul.f32 1.442695, %v2333_v49  ;;  %v2334_v36 = vsub.f32 %v6492_v11, %v2298_v23 }
 0x376   : > { %v2313_v24 = vpop.xlane.xlu0 %2312  ;;  %vm2784_vm4 = vcmp.ge.u32.totalorder %v5877_v27, 1444339130  ;;  %vm2785_vm5 = vcmp.ge.u32.totalorder %v2761_v20, 1444339130  ;;  %v2767_v55 = vxor.u32 %v2743_v57, %v2719_v59  ;;  %v2738_v32 = vshrl.u32 %v2714_v22, 16 }
 0x377   : > { %v5929_v43 = vpop.eup %4092  ;;  %4102 = vpow2.f32 %v2373_v60  ;;  %v2375_v12 = vmul.f32 1.442695, %v2334_v36  ;;  %v2339_v31 = vsub.f32 %v6493_v45, %v2313_v24  ;;  %3920 = vmatmul.mubr.msk.bf16.vlgmr.msra.gmra.mrb[84].mxu0 %vm750_vm2, %v2824_v3  ;;  %v2739_v46 = vshrl.u32 %v2715_v53, 16 }
 0x378   : > { %v2812_v25 = vsel %vm2788_vm15, %v5925_v62, 0.0  ;;  %v2813_v15 = vsel %vm2789_vm3, %v5929_v43, 0.0  ;;  %v2316_v54 = vpop.xlane.xlu1 %2315  ;;  %3923 = vmatprep.mubr.msk.bf16.mxu0 %vm4287_vm0, %v6405_v7  ;;  %v2720_v59 = vmul.u32 2221713035, %v5921_v39  ;;  %v2721_v34 = vmul.u32 2221713035, %v5923_v30 }
 0x379   : > { %v5943_v56 = vpop.eup %4094  ;;  %v2827_v0 = vpack.c.bf16 %v2813_v15, %v2812_v25  ;;  %4104 = vpow2.f32 %v2375_v12  ;;  %v2385_v5 = vmul.f32 1.442695, %v2339_v31  ;;  %v2340_v37 = vsub.f32 %v6494_v58, %v2316_v54 }
 0x37a   : > { %v897_v16 = vpop.xlane.xlu0 %896  ;;  %vm2790_vm6 = vcmp.ge.u32.totalorder %v5905_v44, 1444339130  ;;  %vm2791_vm7 = vcmp.ge.u32.totalorder %v2767_v55, 1444339130  ;;  %v2762_v51 = vxor.u32 %v2738_v32, %v2714_v22  ;;  %v2808_v26 = vsel %vm2784_vm4, %v5943_v56, 0.0 }
 0x37b   : > { %v5947_v29 = vpop.eup %4096  ;;  %4106 = vpow2.f32 %v2385_v5  ;;  %v2387_v6 = vmul.f32 1.442695, %v2340_v37  ;;  %3938 = vmatmul.mubr.msk.bf16.vlgmr.msra.gmra.mrb[84].mxu1 %vm750_vm2, %v2827_v0  ;;  %v2763_v18 = vxor.u32 %v2739_v46, %v2715_v53  ;;  %v2744_v35 = vshrl.u32 %v2720_v59, 16  ;;  %v6495_v46 = vld [vmem:[#allocation23_spill] sm:$0xff]  ;;  %v6497_v37 = vld [vmem:[#allocation24_spill] sm:$0xff] }
 0x37c   : > { %4108 = vrcp.f32 %v897_v16  ;;  %v900_v17 = vpop.xlane.xlu1 %899  ;;  %v2809_v1 = vsel %vm2785_vm5, %v5947_v29, 0.0  ;;  %3941 = vmatprep.mubr.msk.bf16.mxu1 %vm4287_vm0, %v6405_v7  ;;  %v2745_v38 = vshrl.u32 %v2721_v34, 16  ;;  %vm2786_vm8 = vcmp.ge.u32.totalorder %v2762_v51, 1444339130  ;;  %v6496_v5 = vld [vmem:[#allocation7_spill] sm:$0xff] }
 0x37d   : > { %v5957_v28 = vpop.eup %4098  ;;  %4110 = vpow2.f32 %v2387_v6  ;;  %v2825_v42 = vpack.c.bf16 %v2809_v1, %v2808_v26  ;;  %vm2787_vm9 = vcmp.ge.u32.totalorder %v2763_v18, 1444339130  ;;  %v2768_v53 = vxor.u32 %v2744_v35, %v2720_v59  ;;  %v6498_v26 = vld [vmem:[#allocation8_spill] sm:$0xff] }
 0x37e   : > { %4112 = vrcp.f32 %v900_v17  ;;  %v903_v57 = vpop.xlane.xlu0 %902  ;;  %v2814_v20 = vsel %vm2790_vm6, %v5957_v28, 0.0  ;;  %v2769_v50 = vxor.u32 %v2745_v38, %v2721_v34  ;;  %v6499_v38 = vld [vmem:[#allocation27_spill] sm:$0xff] }
 0x37f   : > { %v5959_v22 = vpop.eup %4100  ;;  %4114 = vrcp.f32 %v903_v57  ;;  %3924 = vmatmul.mubr.msk.bf16.gmra.mrb[88].mxu0 %vm750_vm2, %v2825_v42  ;;  %vm2792_vm10 = vcmp.ge.u32.totalorder %v2768_v53, 1444339130 }
 0x380   : > { %v906_v27 = vpop.xlane.xlu1 %905  ;;  %v2815_v13 = vsel %vm2791_vm7, %v5959_v22, 0.0  ;;  %3927 = vmatprep.mubr.msk.bf16.mxu0 %vm4287_vm0, %v6405_v7  ;;  %vm2793_vm11 = vcmp.ge.u32.totalorder %v2769_v50, 1444339130 }
 0x381   : > { %v5969_v9 = vpop.eup %4102  ;;  %4116 = vrcp.f32 %v906_v27  ;;  %v2828_v49 = vpack.c.bf16 %v2815_v13, %v2814_v20 }
 0x382   : > { %v909_v4 = vpop.xlane.xlu0 %908  ;;  %v2810_v39 = vsel %vm2786_vm8, %v5969_v9, 0.0 }
 0x383   : > { %v5971_v23 = vpop.eup %4104  ;;  %4118 = vrcp.f32 %v909_v4  ;;  %3942 = vmatmul.mubr.msk.bf16.gmra.mrb[88].mxu1 %vm750_vm2, %v2828_v49  ;;  %v6500_v49 = vld [vmem:[#allocation11_spill] sm:$0xff] }
 0x384   : > { %v912_v44 = vpop.xlane.xlu1 %911  ;;  %v2811_v30 = vsel %vm2787_vm9, %v5971_v23, 0.0  ;;  %3945 = vmatprep.mubr.msk.bf16.mxu1 %vm4287_vm0, %v6405_v7  ;;  %vm1784_vm0 = vcmask 523264  }
 0x385   : > { %v5978_v3 = vpop.eup %4106  ;;  %4120 = vrcp.f32 %v912_v44  ;;  %v2826_v60 = vpack.c.bf16 %v2811_v30, %v2810_v39  ;;  %v6501_v30 = vld [vmem:[#allocation22_spill] sm:$0xff] }
 0x386   : > { %v4109_v11 = vpop.eup %4108  ;;  %v915_v36 = vpop.xlane.xlu0 %914  ;;  %v2816_v45 = vsel %vm2792_vm10, %v5978_v3, 0.0 }
 0x387   : > { %v5980_v24 = vpop.eup %4110  ;;  %v1658_v55 = vmul.f32 1.5066739, %v4109_v11  ;;  %4122 = vrcp.f32 %v915_v36  ;;  %3928 = vmatmul.mubr.msk.bf16.gmra.mrb[92].mxu0 %vm750_vm2, %v2826_v60 }
 0x388   : > { %v4113_v32 = vpop.eup %4112  ;;  %v918_v12 = vpop.xlane.xlu1 %917  ;;  %v2817_v7 = vsel %vm2793_vm11, %v5980_v24, 0.0 }
 0x389   : > { %v4115_v31 = vpop.eup %4114  ;;  %v5986_v25 = vmul.f32 %v1658_v55, %v6495_v46  ;;  %v1659_v15 = vmul.f32 1.5066739, %v4113_v32  ;;  %4124 = vrcp.f32 %v918_v12  ;;  %v2829_v54 = vpack.c.bf16 %v2817_v7, %v2816_v45  ;;  %v6502_v55 = vld [vmem:[#allocation25_spill] sm:$0xff] }
 0x38a   : > { %v1660_v59 = vmul.f32 1.5066739, %v4115_v31  ;;  %v921_v34 = vpop.xlane.xlu0 %920  ;;  %v6503_v7 = vld [vmem:[#allocation9_spill] sm:$0xff] }
 0x38b   : > { %v4117_v0 = vpop.eup %4116  ;;  %v5989_v58 = vmul.f32 %v1659_v15, %v6496_v5  ;;  %4126 = vrcp.f32 %v921_v34  ;;  %3946 = vmatmul.mubr.msk.bf16.gmra.mrb[92].mxu1 %vm750_vm2, %v2829_v54  ;;  %v6504_v54 = vld [vmem:[#allocation26_spill] sm:$0xff] }
 0x38c   : > { %v5993_v16 = vmul.f32 %v1660_v59, %v6497_v37  ;;  %v1661_v6 = vmul.f32 1.5066739, %v4117_v0  ;;  %v924_v51 = vpop.xlane.xlu1 %923 }
 0x38d   : > { %v4119_v17 = vpop.eup %4118  ;;  %4128 = vrcp.f32 %v924_v51 }
 0x38e   : > { %v5996_v1 = vmul.f32 %v1661_v6, %v6498_v26  ;;  %v1662_v18 = vmul.f32 1.5066739, %v4119_v17  ;;  %v927_v42 = vpop.xlane.xlu0 %926  ;;  %v6505_v6 = vld [vmem:[#allocation10_spill] sm:$0xff]  ;;  %v6506_v17 = vld [vmem:[#allocation12_spill] sm:$0xff] }
 0x38f   : > { %v4121_v35 = vpop.eup %4120  ;;  %4130 = vrcp.f32 %v927_v42 }
 0x390   : > { %v5999_v57 = vmul.f32 %v1662_v18, %v6499_v38  ;;  %v1663_v27 = vmul.f32 1.5066739, %v4121_v35  ;;  %v930_v20 = vpop.xlane.xlu1 %929  ;;  %v6507_v18 = vld [vmem:[#allocation29_spill] sm:$0xff]  ;;  %v2392_v35 = vsel %vm750_vm2, %v5733_v47, 0.0  ;;  %v2398_v38 = vsel %vm750_vm2, %v5787_v63, 0.0 }
 0x391   : > { %v4123_v13 = vpop.eup %4122  ;;  %4132 = vrcp.f32 %v930_v20  ;;  %v2407_v20 = vsel %vm750_vm2, %v5745_v10, 0.0  ;;  %v2389_v47 = vsel %vm750_vm2, %v5721_v61, 0.0  ;;  %v2452_v63 = vsel %vm750_vm2, %v5959_v22, 0.0 }
 0x392   : > { %v6002_v53 = vmul.f32 %v1663_v27, %v6500_v49  ;;  %v1664_v50 = vmul.f32 1.5066739, %v4123_v13  ;;  %v933_v4 = vpop.xlane.xlu0 %932  ;;  %v2404_v27 = vsel %vm750_vm2, %v5853_v14, 0.0  ;;  %v2425_v49 = vsel %vm750_vm2, %v5898_v48, 0.0 }
 0x393   : > { %v4125_v44 = vpop.eup %4124  ;;  %4134 = vrcp.f32 %v933_v4  ;;  %v2410_v14 = vsel %vm750_vm2, %v5756_v40, 0.0  ;;  %v2458_v10 = vsel %vm750_vm2, %v5980_v24, 0.0  ;;  %v2413_v48 = vsel %vm750_vm2, %v5804_v33, 0.0 }
 0x394   : > { %v1665_v39 = vmul.f32 1.5066739, %v4125_v44  ;;  %v1688_v60 = vmul.f32 %v1664_v50, %v6501_v30  ;;  %v936_v13 = vpop.xlane.xlu1 %935  ;;  %v2395_v61 = vsel %vm750_vm2, %v5773_v21, 0.0  ;;  %v2416_v40 = vsel %vm750_vm2, %v5819_v19, 0.0 }
 0x395   : > { %v4127_v11 = vpop.eup %4126  ;;  %4136 = vrcp.f32 %v936_v13  ;;  %v2419_v24 = vsel %vm750_vm2, %v5867_v41, 0.0  ;;  %v2401_v30 = vsel %vm750_vm2, %v5839_v8, 0.0  ;;  %v2422_v19 = vsel %vm750_vm2, %v5884_v2, 0.0  ;;  %v6509_v8 = vld [vmem:[#allocation16_spill] sm:$0xff] }
 0x396   : > { %v1666_v36 = vmul.f32 1.5066739, %v4127_v11  ;;  %1712 = vrot.lane.b32.xlu0 %v1688_v60, %s4288_s18  ;;  %v1689_v32 = vmul.f32 %v1665_v39, %v6502_v55  ;;  %v2428_v2 = vsel %vm750_vm2, %v5908_v52, 0.0  ;;  %v2455_v13 = vsel %vm750_vm2, %v5978_v3, 0.0 }
 0x397   : > { %v4129_v12 = vpop.eup %4128 }
 0x398   : > { %v1667_v45 = vmul.f32 1.5066739, %v4129_v12  ;;  %1714 = vrot.lane.b32.xlu1 %v1689_v32, %s4288_s18  ;;  %v1690_v31 = vmul.f32 %v1666_v36, %v6503_v7  ;;  %v942_v50 = vpop.xlane.xlu1 %941  ;;  %v6508_v36 = vld [vmem:[#allocation28_spill] sm:$0xff]  ;;  %v2443_v12 = vsel %vm750_vm2, %v5925_v62, 0.0  ;;  %v2446_v62 = vsel %vm750_vm2, %v5929_v43, 0.0 }
 0x399   : > { %v4131_v46 = vpop.eup %4130  ;;  %4138 = vrcp.f32 %v942_v50  ;;  %v2449_v43 = vsel %vm750_vm2, %v5957_v28, 0.0 }
 0x39a   : > { %v1668_v15 = vmul.f32 1.5066739, %v4131_v46  ;;  %1716 = vrot.lane.b32.xlu0 %v1690_v31, %s4288_s18  ;;  %v1691_v59 = vmul.f32 %v1667_v45, %v6504_v54  ;;  %v939_v31 = vpop.xlane.xlu0 %938 }
 0x39b   : > { %v4133_v34 = vpop.eup %4132 }
 0x39c   : > { %v1669_v0 = vmul.f32 1.5066739, %v4133_v34  ;;  %1718 = vrot.lane.b32.xlu1 %v1691_v59, %s4288_s18  ;;  %v1692_v51 = vmul.f32 %v1668_v15, %v6505_v6  ;;  %v948_v4 = vpop.xlane.xlu1 %947  ;;  %v6510_v15 = vld [vmem:[#allocation33_spill] sm:$0xff] }
 0x39d   : > { %v4135_v5 = vpop.eup %4134  ;;  %4140 = vrcp.f32 %v948_v4 }
 0x39e   : > { %v1670_v37 = vmul.f32 1.5066739, %v4135_v5  ;;  %v1693_v26 = vmul.f32 %v1669_v0, %v6506_v17  ;;  %v945_v34 = vpop.xlane.xlu0 %944  ;;  %v6511_v5 = vld [vmem:[#allocation15_spill] sm:$0xff] }
 0x39f   : > { %v4137_v44 = vpop.eup %4136 }
 0x3a0   : > { %1720 = vrot.lane.b32.xlu1 %v1692_v51, %s4288_s18  ;;  %1722 = vrot.lane.b32.xlu0 %v1693_v26, %s4288_s18  ;;  %v1694_v42 = vmul.f32 %v1670_v37, %v6507_v18  ;;  %v954_v22 = vpop.xlane.xlu1 %953  ;;  %v1671_v39 = vmul.f32 1.5066739, %v4137_v44  ;;  %v6512_v51 = vld [vmem:[#allocation31_spill] sm:$0xff]  ;;  %v2431_v26 = vsel %vm750_vm2, %v5943_v56, 0.0  ;;  %v2437_v56 = vsel %vm750_vm2, %v5969_v9, 0.0 }
 0x3a1   : > { %4142 = vrcp.f32 %v954_v22 }
 0x3a2   : > { %v1695_v55 = vmul.f32 %v1671_v39, %v6508_v36  ;;  %v951_v18 = vpop.xlane.xlu0 %950  ;;  %v6516_v39 = vld [vmem:[#allocation13_spill] sm:$0xff] }
 0x3a3   : > { %v4139_v21 = vpop.eup %4138 }
 0x3a4   : > { %1736 = vrot.lane.b32.xlu1 %v1694_v42, %s4289_s8  ;;  %v960_v33 = vpop.xlane.xlu1 %959  ;;  %v1673_v60 = vmul.f32 1.5066739, %v4139_v21  ;;  %v6513_v42 = vld [vmem:[#allocation35_spill] sm:$0xff] }
 0x3a5   : > { %4144 = vrcp.f32 %v960_v33 }
 0x3a6   : > { %v1697_v45 = vmul.f32 %v1673_v60, %v6509_v8 }
 0x3a7   : > { %v4141_v32 = vpop.eup %4140 }
 0x3a8   : > { %v966_v11 = vpop.xlane.xlu1 %965  ;;  %v1675_v41 = vmul.f32 1.5066739, %v4141_v32 }
 0x3a9   : > { %4146 = vrcp.f32 %v966_v11  ;;  %v6517_v11 = vld [vmem:[#allocation30_spill] sm:$0xff] }
 0x3aa   : > { %v1699_v54 = vmul.f32 %v1675_v41, %v6510_v15  ;;  %4148 = vrcp.f32 %v939_v31 }
 0x3ab   : > { %v4143_v7 = vpop.eup %4142  ;;  %4150 = vrcp.f32 %v945_v34 }
 0x3ac   : > { %v1677_v46 = vmul.f32 1.5066739, %v4143_v7  ;;  %4152 = vrcp.f32 %v951_v18 }
 0x3ae   : > { %v1701_v37 = vmul.f32 %v1677_v46, %v6511_v5 }
 0x3af   : > { %v4145_v59 = vpop.eup %4144 }
 0x3b0   : > { %v1679_v0 = vmul.f32 1.5066739, %v4145_v59 }
 0x3b2   : > { %v1703_v52 = vmul.f32 %v1679_v0, %v6512_v51 }
 0x3b3   : > { %v4147_v6 = vpop.eup %4146 }
 0x3b4   : > { %v1681_v17 = vmul.f32 1.5066739, %v4147_v6 }
 0x3bf   : > { %2393 = vadd.xlane.f32.xlu0 %v2392_v35  ;;  %v1705_v35 = vmul.f32 %v1681_v17, %v6513_v42 }
 0x3c3   : > { %2399 = vadd.xlane.f32.xlu0 %v2398_v38  ;;  %v957_v38 = vpop.xlane.xlu0 %956 }
 0x3c4   : > { %4154 = vrcp.f32 %v957_v38 }
 0x3c7   : > { %2405 = vadd.xlane.f32.xlu0 %v2404_v27  ;;  %v2434_v27 = vsel %vm750_vm2, %v5947_v29, 0.0  ;;  %v2440_v29 = vsel %vm750_vm2, %v5971_v23, 0.0  ;;  %vm1791_vm2 = vcmask 785408  }
 0x3c8   : > { %2408 = vadd.xlane.f32.xlu1 %v2407_v20  ;;  %v963_v20 = vpop.xlane.xlu0 %962 }
 0x3c9   : > { %4156 = vrcp.f32 %v963_v20 }
 0x3cb   : > { %2426 = vadd.xlane.f32.xlu0 %v2425_v49 }
 0x3cc   : > { %2390 = vadd.xlane.f32.xlu1 %v2389_v47 }
 0x3cf   : > { %2453 = vadd.xlane.f32.xlu0 %v2452_v63 }
 0x3d0   : > { %2411 = vadd.xlane.f32.xlu1 %v2410_v14  ;;  %v4149_v14 = vpop.eup %4148 }
 0x3d1   : > { %v1672_v23 = vmul.f32 1.5066739, %v4149_v14  ;;  %v4151_v4 = vpop.eup %4150 }
 0x3d2   : > { %v1674_v22 = vmul.f32 1.5066739, %v4151_v4 }
 0x3d3   : > { %2459 = vadd.xlane.f32.xlu0 %v2458_v10 }
 0x3d4   : > { %2414 = vadd.xlane.f32.xlu1 %v2413_v48 }
 0x3d8   : > { %2396 = vadd.xlane.f32.xlu1 %v2395_v61 }
 0x3dc   : > { %2417 = vadd.xlane.f32.xlu1 %v2416_v40  ;;  %v4153_v40 = vpop.eup %4152 }
 0x3dd   : > { %v4155_v33 = vpop.eup %4154 }
 0x3de   : > { %v1678_v21 = vmul.f32 1.5066739, %v4155_v33  ;;  %v4157_v60 = vpop.eup %4156 }
 0x3df   : > { %v1680_v36 = vmul.f32 1.5066739, %v4157_v60 }
 0x3e0   : > { %2420 = vadd.xlane.f32.xlu1 %v2419_v24  ;;  %v6515_v24 = vld [vmem:[#allocation32_spill] sm:$0xff] }
 0x3e1   : > { %v1698_v44 = vmul.f32 %v1674_v22, %v6515_v24 }
 0x3e4   : > { %2402 = vadd.xlane.f32.xlu1 %v2401_v30 }
 0x3e8   : > { %2423 = vadd.xlane.f32.xlu1 %v2422_v19  ;;  %v1702_v19 = vmul.f32 %v1678_v21, %v6517_v11 }
 0x3e9   : > { %1738 = vrot.lane.b32.xlu0 %v1695_v55, %s4289_s8  ;;  %v6518_v55 = vld [vmem:[#allocation34_spill] sm:$0xff] }
 0x3ea   : > { %v1704_v32 = vmul.f32 %v1680_v36, %v6518_v55 }
 0x3ec   : > { %2444 = vadd.xlane.f32.xlu1 %v2443_v12 }
 0x3ed   : > { %1742 = vrot.lane.b32.xlu0 %v1697_v45, %s4289_s8 }
 0x3f0   : > { %2429 = vadd.xlane.f32.xlu1 %v2428_v2 }
 0x3f1   : > { %1746 = vrot.lane.b32.xlu0 %v1699_v54, %s4289_s8 }
 0x3f4   : > { %2447 = vadd.xlane.f32.xlu1 %v2446_v62 }
 0x3f5   : > { %1762 = vrot.lane.b32.xlu0 %v1701_v37, %s4290_s9 }
 0x3f8   : > { %2432 = vadd.xlane.f32.xlu1 %v2431_v26 }
 0x3f9   : > { %1766 = vrot.lane.b32.xlu0 %v1703_v52, %s4290_s9 }
 0x3fc   : > { %2450 = vadd.xlane.f32.xlu1 %v2449_v43 }
 0x3fd   : > { %1770 = vrot.lane.b32.xlu0 %v1705_v35, %s4290_s9 }
 0x400   : > { %2435 = vadd.xlane.f32.xlu1 %v2434_v27 }
 0x404   : > { %2438 = vadd.xlane.f32.xlu1 %v2437_v56 }
 0x408   : > { %v1713_v49 = vpop.permute.xlu0 %1712  ;;  %2456 = vadd.xlane.f32.xlu1 %v2455_v13 }
 0x409   : > { %v1778_v28 = vsel %vm449_vm1, %v5986_v25, %v1713_v49 }
 0x40a   : > { %v6078_v47 = vpop.permute.xlu1 %1714 }
 0x40c   : > { %v1717_v63 = vpop.permute.xlu0 %1716  ;;  %2441 = vadd.xlane.f32.xlu1 %v2440_v29 }
 0x40d   : > { %v6084_v9 = vsel %vm449_vm1, %v5993_v16, %v1717_v63  ;;  %v6514_v16 = vld [vmem:[#allocation14_spill] sm:$0xff] }
 0x40e   : > { %v6086_v50 = vpop.permute.xlu1 %1718  ;;  %v1696_v61 = vmul.f32 %v1672_v23, %v6514_v16 }
 0x412   : > { %v1721_v3 = vpop.permute.xlu1 %1720  ;;  %v6121_v42 = vpop.permute.xlu0 %1722 }
 0x413   : > { %v6090_v25 = vsel %vm449_vm1, %v5999_v57, %v1721_v3  ;;  %v1676_v57 = vmul.f32 1.5066739, %v4153_v40 }
 0x415   : > { %v1700_v30 = vmul.f32 %v1676_v57, %v6516_v39 }
 0x416   : > { %v1737_v10 = vpop.permute.xlu1 %1736 }
 0x417   : > { %v6093_v48 = vsel %vm1784_vm0, %v1778_v28, %v1737_v10 }
 0x41d   : > { %1740 = vrot.lane.b32.xlu1 %v1696_v61, %s4289_s8 }
 0x421   : > { %1744 = vrot.lane.b32.xlu1 %v1698_v44, %s4289_s8 }
 0x425   : > { %1760 = vrot.lane.b32.xlu1 %v1700_v30, %s4290_s9 }
 0x429   : > { %1764 = vrot.lane.b32.xlu1 %v1702_v19, %s4290_s9 }
 0x42d   : > { %1768 = vrot.lane.b32.xlu1 %v1704_v32, %s4290_s9 }
 0x432   : > { %v6105_v41 = vpop.f32.mrb[72].mxu0 }
 0x433   : > { %v3885_v12 = vpop.f32.mrb[73].mxu0 }
 0x434   : > { %v2876_v8 = vpop.f32.mrb[74].mxu0 }
 0x435   : > { %v3886_v45 = vpop.f32.mrb[75].mxu0 }
 0x436   : > { %v6107_v7 = vpop.f32.mrb[72].mxu1 }
 0x437   : > { %v3903_v31 = vpop.f32.mrb[73].mxu1 }
 0x438   : > { %v6109_v46 = vpop.f32.mrb[74].mxu1 }
 0x439   : > { %v3904_v2 = vpop.f32.mrb[75].mxu1 }
 0x43a   : > { %v6111_v15 = vpop.f32.mrb[76].mxu0 }
 0x43b   : > { %v3889_v54 = vpop.f32.mrb[77].mxu0 }
 0x43c   : > { %v2884_v59 = vpop.f32.mrb[78].mxu0 }
 0x43d   : > { %v3890_v34 = vpop.f32.mrb[79].mxu0 }
 0x43e   : > { %v6113_v0 = vpop.f32.mrb[76].mxu1 }
 0x43f   : > { %v3907_v62 = vpop.f32.mrb[77].mxu1 }
 0x440   : > { %v6115_v5 = vpop.f32.mrb[78].mxu1 }
 0x441   : > { %v3908_v37 = vpop.f32.mrb[79].mxu1 }
 0x442   : > { %v6117_v6 = vpop.f32.mrb[80].mxu0 }
 0x443   : > { %v3893_v51 = vpop.f32.mrb[81].mxu0 }
 0x444   : > { %v2892_v52 = vpop.f32.mrb[82].mxu0 }
 0x445   : > { %v3894_v17 = vpop.f32.mrb[83].mxu0 }
 0x446   : > { %v6119_v26 = vpop.f32.mrb[80].mxu1 }
 0x447   : > { %v3911_v18 = vpop.f32.mrb[81].mxu1 }
 0x448   : > { %v6123_v35 = vpop.f32.mrb[82].mxu1 }
 0x449   : > { %v3912_v43 = vpop.f32.mrb[83].mxu1 }
 0x44a   : > { %v6125_v38 = vpop.f32.mrb[84].mxu0 }
 0x44b   : > { %v3921_v27 = vpop.f32.mrb[85].mxu0 }
 0x44c   : > { %v2394_v56 = vpop.xlane.xlu0 %2393  ;;  %v6127_v20 = vpop.f32.mrb[86].mxu0 }
 0x44d   : > { %4158 = vrcp.f32 %v2394_v56  ;;  %v3922_v13 = vpop.f32.mrb[87].mxu0 }
 0x44e   : > { %v6129_v49 = vpop.f32.mrb[84].mxu1 }
 0x44f   : > { %v3939_v28 = vpop.f32.mrb[85].mxu1 }
 0x450   : > { %v6131_v29 = vpop.f32.mrb[86].mxu1  ;;  %v2400_v63 = vpop.xlane.xlu0 %2399 }
 0x451   : > { %4160 = vrcp.f32 %v2400_v63  ;;  %v3940_v3 = vpop.f32.mrb[87].mxu1 }
 0x452   : > { %v6133_v14 = vpop.f32.mrb[88].mxu0 }
 0x453   : > { %v3925_v10 = vpop.f32.mrb[89].mxu0 }
 0x454   : > { %v2406_v23 = vpop.xlane.xlu0 %2405  ;;  %v6135_v4 = vpop.f32.mrb[90].mxu0 }
 0x455   : > { %4162 = vrcp.f32 %v2406_v23  ;;  %v2409_v16 = vpop.xlane.xlu1 %2408  ;;  %v3926_v61 = vpop.f32.mrb[91].mxu0 }
 0x456   : > { %4164 = vrcp.f32 %v2409_v16  ;;  %v6137_v22 = vpop.f32.mrb[88].mxu1 }
 0x457   : > { %v4159_v40 = vpop.eup %4158  ;;  %v3943_v24 = vpop.f32.mrb[89].mxu1 }
 0x458   : > { %v3143_v44 = vmul.f32 1.5066739, %v4159_v40  ;;  %v6139_v57 = vpop.f32.mrb[90].mxu1  ;;  %v2427_v33 = vpop.xlane.xlu0 %2426 }
 0x459   : > { %v3944_v39 = vpop.f32.mrb[91].mxu1  ;;  %v2391_v30 = vpop.xlane.xlu1 %2390 }
 0x45a   : > { %v6141_v21 = vmul.f32 %v3143_v44, %v2876_v8  ;;  %4166 = vrcp.f32 %v2391_v30  ;;  %v6143_v60 = vpop.f32.mrb[92].mxu0 }
 0x45b   : > { %v4161_v11 = vpop.eup %4160  ;;  %v3929_v19 = vpop.f32.mrb[93].mxu0 }
 0x45c   : > { %v3145_v36 = vmul.f32 1.5066739, %v4161_v11  ;;  %v6145_v55 = vpop.xlane.xlu0 %2453  ;;  %v6147_v32 = vpop.f32.mrb[94].mxu0 }
 0x45d   : > { %v2412_v12 = vpop.xlane.xlu1 %2411  ;;  %v3930_v45 = vpop.f32.mrb[95].mxu0 }
 0x45e   : > { %v6149_v31 = vmul.f32 %v3145_v36, %v2884_v59  ;;  %4168 = vrcp.f32 %v2412_v12  ;;  %v6151_v2 = vpop.f32.mrb[92].mxu1 }
 0x45f   : > { %v4163_v54 = vpop.eup %4162  ;;  %v3947_v8 = vpop.f32.mrb[93].mxu1 }
 0x460   : > { %v4165_v34 = vpop.eup %4164  ;;  %v3147_v62 = vmul.f32 1.5066739, %v4163_v54  ;;  %v6153_v37 = vpop.f32.mrb[94].mxu1 }
 0x461   : > { %v6155_v51 = vpop.xlane.xlu0 %2459  ;;  %v3148_v17 = vmul.f32 1.5066739, %v4165_v34  ;;  %v3948_v18 = vpop.f32.mrb[95].mxu1 }
 0x462   : > { %v2415_v43 = vpop.xlane.xlu1 %2414  ;;  %v6157_v27 = vmul.f32 %v3147_v62, %v2892_v52 }
 0x463   : > { %4170 = vrcp.f32 %v2415_v43  ;;  %v3172_v59 = vmul.f32 %v3148_v17, %v6107_v7  ;;  %v1783_v17 = vsel %vm449_vm1, %v6002_v53, %v6121_v42 }
 0x464   : > { %v4167_v56 = vpop.eup %4166 }
 0x465   : > { %v1739_v13 = vpop.permute.xlu0 %1738  ;;  %v3142_v28 = vmul.f32 1.5066739, %v4167_v56  ;;  %3196 = vrot.lane.b32.xlu1 %v3172_v59, %s4288_s18 }
 0x466   : > { %v2397_v63 = vpop.xlane.xlu1 %2396 }
 0x467   : > { %4172 = vrcp.f32 %v2397_v63  ;;  %v6162_v3 = vmul.f32 %v3142_v28, %v6105_v41  ;;  %v1779_v41 = vsel %vm449_vm1, %v5989_v58, %v6078_v47  ;;  %v1781_v58 = vsel %vm449_vm1, %v5996_v1, %v6086_v50 }
 0x468   : > { %v4169_v10 = vpop.eup %4168 }
 0x469   : > { %v1743_v23 = vpop.permute.xlu0 %1742  ;;  %v3149_v16 = vmul.f32 1.5066739, %v4169_v10 }
 0x46a   : > { %v2418_v52 = vpop.xlane.xlu1 %2417  ;;  %v1788_v12 = vsel %vm1784_vm0, %v1781_v58, %v1743_v23 }
 0x46b   : > { %4174 = vrcp.f32 %v2418_v52  ;;  %v3173_v61 = vmul.f32 %v3149_v16, %v6109_v46  ;;  %v1786_v46 = vsel %vm1784_vm0, %v1779_v41, %v1739_v13 }
 0x46c   : > { %4176 = vrcp.f32 %v2427_v33 }
 0x46d   : > { %v4171_v7 = vpop.eup %4170  ;;  %v1747_v40 = vpop.permute.xlu0 %1746  ;;  %3198 = vrot.lane.b32.xlu0 %v3173_v61, %s4288_s18 }
 0x46e   : > { %v3150_v24 = vmul.f32 1.5066739, %v4171_v7  ;;  %v2421_v44 = vpop.xlane.xlu1 %2420 }
 0x46f   : > { %4178 = vrcp.f32 %v2421_v44 }
 0x470   : > { %v3174_v39 = vmul.f32 %v3150_v24, %v6113_v0 }
 0x471   : > { %v4173_v30 = vpop.eup %4172  ;;  %v1763_v11 = vpop.permute.xlu0 %1762 }
 0x472   : > { %v3144_v19 = vmul.f32 1.5066739, %v4173_v30  ;;  %v1793_v36 = vsel %vm1791_vm2, %v1786_v46, %v1763_v11  ;;  %3200 = vrot.lane.b32.xlu1 %v3174_v39, %s4288_s18  ;;  %v2403_v33 = vpop.xlane.xlu1 %2402 }
 0x473   : > { %1799 = vst [vmem:[%s6176_s13 + $0x8] sm:$0xff] %v1793_v36  ;;  %4180 = vrcp.f32 %v2403_v33 }
 0x474   : > { %v6183_v47 = vmul.f32 %v3144_v19, %v6111_v15  ;;  %v1790_v15 = vsel %vm1784_vm0, %v1783_v17, %v1747_v40 }
 0x475   : > { %v4175_v0 = vpop.eup %4174  ;;  %v1767_v45 = vpop.permute.xlu0 %1766 }
 0x476   : > { %v3151_v54 = vmul.f32 1.5066739, %v4175_v0  ;;  %v1795_v8 = vsel %vm1791_vm2, %v1788_v12, %v1767_v45  ;;  %v2424_v34 = vpop.xlane.xlu1 %2423  ;;  %v4177_v62 = vpop.eup %4176 }
 0x477   : > { %1801 = vst [vmem:[%s6176_s13 + $0x18] sm:$0xff] %v1795_v8  ;;  %4182 = vrcp.f32 %v2424_v34  ;;  %v3154_v13 = vmul.f32 1.5066739, %v4177_v62 }
 0x478   : > { %v3175_v1 = vmul.f32 %v3151_v54, %v6115_v5 }
 0x479   : > { %v4179_v50 = vpop.eup %4178  ;;  %v1771_v18 = vpop.permute.xlu0 %1770  ;;  %v3178_v5 = vmul.f32 %v3154_v13, %v6125_v38 }
 0x47a   : > { %v3152_v43 = vmul.f32 1.5066739, %v4179_v50  ;;  %v1797_v59 = vsel %vm1791_vm2, %v1790_v15, %v1771_v18  ;;  %3202 = vrot.lane.b32.xlu0 %v3175_v1, %s4288_s18  ;;  %v2445_v56 = vpop.xlane.xlu1 %2444 }
 0x47b   : > { %1803 = vst [vmem:[%s6176_s13 + $0x28] sm:$0xff] %v1797_v59  ;;  %4184 = vrcp.f32 %v2445_v56 }
 0x47c   : > { %v3176_v28 = vmul.f32 %v3152_v43, %v6119_v26 }
 0x47d   : > { %v4181_v63 = vpop.eup %4180 }
 0x47e   : > { %v3146_v10 = vmul.f32 1.5066739, %v4181_v63  ;;  %3204 = vrot.lane.b32.xlu1 %v3176_v28, %s4288_s18  ;;  %v2430_v53 = vpop.xlane.xlu1 %2429 }
 0x47f   : > { %4186 = vrcp.f32 %v2430_v53 }
 0x480   : > { %v6200_v42 = vmul.f32 %v3146_v10, %v6117_v6 }
 0x481   : > { %v4183_v23 = vpop.eup %4182 }
 0x482   : > { %v3153_v16 = vmul.f32 1.5066739, %v4183_v23  ;;  %v2448_v52 = vpop.xlane.xlu1 %2447  ;;  %3220 = vrot.lane.b32.xlu1 %v3178_v5, %s4289_s8 }
 0x483   : > { %4188 = vrcp.f32 %v2448_v52 }
 0x484   : > { %v3177_v61 = vmul.f32 %v3153_v16, %v6123_v35 }
 0x485   : > { %v4185_v26 = vpop.eup %4184 }
 0x486   : > { %v3160_v7 = vmul.f32 1.5066739, %v4185_v26  ;;  %3206 = vrot.lane.b32.xlu0 %v3177_v61, %s4288_s18  ;;  %v2433_v40 = vpop.xlane.xlu1 %2432 }
 0x487   : > { %4190 = vrcp.f32 %v2433_v40 }
 0x488   : > { %v3184_v24 = vmul.f32 %v3160_v7, %v6129_v49 }
 0x489   : > { %v4187_v38 = vpop.eup %4186 }
 0x48a   : > { %v3155_v44 = vmul.f32 1.5066739, %v4187_v38  ;;  %v2451_v6 = vpop.xlane.xlu1 %2450  ;;  %3244 = vrot.lane.b32.xlu1 %v3184_v24, %s4290_s9 }
 0x48b   : > { %4192 = vrcp.f32 %v2451_v6 }
 0x48c   : > { %v3179_v41 = vmul.f32 %v3155_v44, %v6127_v20  ;;  %4194 = vrcp.f32 %v6145_v55 }
 0x48d   : > { %v4189_v39 = vpop.eup %4188 }
 0x48e   : > { %v3161_v35 = vmul.f32 1.5066739, %v4189_v39  ;;  %v2436_v30 = vpop.xlane.xlu1 %2435  ;;  %3222 = vrot.lane.b32.xlu0 %v3179_v41, %s4289_s8 }
 0x48f   : > { %4196 = vrcp.f32 %v2436_v30 }
 0x490   : > { %v3185_v46 = vmul.f32 %v3161_v35, %v6131_v29 }
 0x491   : > { %v4191_v11 = vpop.eup %4190 }
 0x492   : > { %v3156_v49 = vmul.f32 1.5066739, %v4191_v11  ;;  %v2439_v19 = vpop.xlane.xlu1 %2438  ;;  %3246 = vrot.lane.b32.xlu0 %v3185_v46, %s4290_s9 }
 0x493   : > { %4198 = vrcp.f32 %v2439_v19 }
 0x494   : > { %v3180_v36 = vmul.f32 %v3156_v49, %v6133_v14 }
 0x495   : > { %v4193_v33 = vpop.eup %4192 }
 0x496   : > { %v3162_v20 = vmul.f32 1.5066739, %v4193_v33  ;;  %v2457_v58 = vpop.xlane.xlu1 %2456  ;;  %3224 = vrot.lane.b32.xlu1 %v3180_v36, %s4289_s8  ;;  %v4195_v55 = vpop.eup %4194 }
 0x497   : > { %4200 = vrcp.f32 %v2457_v58  ;;  %v3163_v54 = vmul.f32 1.5066739, %v4195_v55 }
 0x498   : > { %v3186_v0 = vmul.f32 %v3162_v20, %v6137_v22  ;;  %4202 = vrcp.f32 %v6155_v51 }
 0x499   : > { %v4197_v12 = vpop.eup %4196  ;;  %v3187_v17 = vmul.f32 %v3163_v54, %v6139_v57 }
 0x49a   : > { %v3157_v29 = vmul.f32 1.5066739, %v4197_v12  ;;  %v2442_v45 = vpop.xlane.xlu1 %2441  ;;  %3248 = vrot.lane.b32.xlu1 %v3186_v0, %s4290_s9 }
 0x49b   : > { %4204 = vrcp.f32 %v2442_v45 }
 0x49c   : > { %v3181_v14 = vmul.f32 %v3157_v29, %v6135_v4 }
 0x49d   : > { %v4199_v8 = vpop.eup %4198 }
 0x49e   : > { %v3158_v34 = vmul.f32 1.5066739, %v4199_v8  ;;  %v1741_v62 = vpop.permute.xlu1 %1740  ;;  %3226 = vrot.lane.b32.xlu0 %v3181_v14, %s4289_s8 }
 0x49f   : > { %v1787_v13 = vsel %vm1784_vm0, %v6084_v9, %v1741_v62 }
 0x4a0   : > { %v3182_v22 = vmul.f32 %v3158_v34, %v6143_v60 }
 0x4a1   : > { %v4201_v1 = vpop.eup %4200 }
 0x4a2   : > { %v3164_v51 = vmul.f32 1.5066739, %v4201_v1  ;;  %v1745_v50 = vpop.permute.xlu1 %1744  ;;  %3250 = vrot.lane.b32.xlu0 %v3187_v17, %s4290_s9  ;;  %3228 = vrot.lane.b32.xlu1 %v3182_v22, %s4289_s8  ;;  %v4203_v15 = vpop.eup %4202 }
 0x4a3   : > { %v3165_v60 = vmul.f32 1.5066739, %v4203_v15  ;;  %v1789_v10 = vsel %vm1784_vm0, %v6090_v25, %v1745_v50 }
 0x4a4   : > { %v3188_v4 = vmul.f32 %v3164_v51, %v6151_v2 }
 0x4a5   : > { %v4205_v18 = vpop.eup %4204  ;;  %v3189_v63 = vmul.f32 %v3165_v60, %v6153_v37 }
 0x4a6   : > { %v3159_v43 = vmul.f32 1.5066739, %v4205_v18  ;;  %v1761_v59 = vpop.permute.xlu1 %1760  ;;  %3252 = vrot.lane.b32.xlu1 %v3188_v4, %s4290_s9 }
 0x4a7   : > { %v1792_v57 = vsel %vm1791_vm2, %v6093_v48, %v1761_v59 }
 0x4a8   : > { %v3183_v56 = vmul.f32 %v3159_v43, %v6147_v32  ;;  %1798 = vst [vmem:[%s6176_s13] sm:$0xff] %v1792_v57 }
 0x4aa   : > { %v1765_v28 = vpop.permute.xlu1 %1764  ;;  %3230 = vrot.lane.b32.xlu0 %v3183_v56, %s4289_s8 }
 0x4ab   : > { %v1794_v2 = vsel %vm1791_vm2, %v1787_v13, %v1765_v28 }
 0x4ac   : > { %1800 = vst [vmem:[%s6176_s13 + $0x10] sm:$0xff] %v1794_v2 }
 0x4ae   : > { %v1769_v48 = vpop.permute.xlu1 %1768  ;;  %3254 = vrot.lane.b32.xlu0 %v3189_v63, %s4290_s9 }
 0x4af   : > { %v1796_v32 = vsel %vm1791_vm2, %v1789_v10, %v1769_v48 }
 0x4b0   : > { %1802 = vst [vmem:[%s6176_s13 + $0x20] sm:$0xff] %v1796_v32 }
 0x4d7   : > { %v3197_v53 = vpop.permute.xlu1 %3196 }
 0x4d8   : > { %v3262_v37 = vsel %vm449_vm1, %v6162_v3, %v3197_v53 }
 0x4df   : > { %v3199_v23 = vpop.permute.xlu0 %3198 }
 0x4e0   : > { %v3263_v24 = vsel %vm449_vm1, %v6141_v21, %v3199_v23 }
 0x4e4   : > { %v3201_v9 = vpop.permute.xlu1 %3200 }
 0x4e5   : > { %v3264_v41 = vsel %vm449_vm1, %v6183_v47, %v3201_v9 }
 0x4ec   : > { %v3203_v16 = vpop.permute.xlu0 %3202 }
 0x4ed   : > { %v3265_v46 = vsel %vm449_vm1, %v6149_v31, %v3203_v16 }
 0x4f0   : > { %v3205_v5 = vpop.permute.xlu1 %3204 }
 0x4f1   : > { %v3266_v47 = vsel %vm449_vm1, %v6200_v42, %v3205_v5 }
 0x4f4   : > { %v3221_v52 = vpop.permute.xlu1 %3220 }
 0x4f5   : > { %v3268_v61 = vsel %vm1784_vm0, %v3262_v37, %v3221_v52 }
 0x4f8   : > { %v3207_v25 = vpop.permute.xlu0 %3206 }
 0x4f9   : > { %v3267_v55 = vsel %vm449_vm1, %v6157_v27, %v3207_v25 }
 0x4fc   : > { %v3245_v26 = vpop.permute.xlu1 %3244 }
 0x4fd   : > { %v3274_v7 = vsel %vm1791_vm2, %v3268_v61, %v3245_v26 }
 0x4fe   : > { %3556 = vst [vmem:[%s6176_s13 + $0x30] sm:$0xff] %v3274_v7 }
 0x500   : > { %v3223_v40 = vpop.permute.xlu0 %3222 }
 0x501   : > { %v3269_v38 = vsel %vm1784_vm0, %v3263_v24, %v3223_v40 }
 0x504   : > { %v3247_v44 = vpop.permute.xlu0 %3246 }
 0x505   : > { %v3275_v6 = vsel %vm1791_vm2, %v3269_v38, %v3247_v44 }
 0x506   : > { %3557 = vst [vmem:[%s6176_s13 + $0x38] sm:$0xff] %v3275_v6 }
 0x508   : > { %v3225_v3 = vpop.permute.xlu1 %3224 }
 0x509   : > { %v3270_v39 = vsel %vm1784_vm0, %v3264_v41, %v3225_v3 }
 0x50c   : > { %v3249_v35 = vpop.permute.xlu1 %3248 }
 0x50d   : > { %v3276_v30 = vsel %vm1791_vm2, %v3270_v39, %v3249_v35 }
 0x50e   : > { %3558 = vst [vmem:[%s6176_s13 + $0x40] sm:$0xff] %v3276_v30 }
 0x510   : > { %v3227_v21 = vpop.permute.xlu0 %3226 }
 0x511   : > { %v3271_v11 = vsel %vm1784_vm0, %v3265_v46, %v3227_v21 }
 0x514   : > { %v3251_v49 = vpop.permute.xlu0 %3250  ;;  %v3229_v19 = vpop.permute.xlu1 %3228 }
 0x515   : > { %v3277_v36 = vsel %vm1791_vm2, %v3271_v11, %v3251_v49  ;;  %v3272_v33 = vsel %vm1784_vm0, %v3266_v47, %v3229_v19 }
 0x516   : > { %3559 = vst [vmem:[%s6176_s13 + $0x48] sm:$0xff] %v3277_v36 }
 0x518   : > { %v3253_v20 = vpop.permute.xlu1 %3252 }
 0x519   : > { %v3278_v58 = vsel %vm1791_vm2, %v3272_v33, %v3253_v20 }
 0x51a   : > { %3560 = vst [vmem:[%s6176_s13 + $0x50] sm:$0xff] %v3278_v58 }
 0x51c   : > { %v3231_v31 = vpop.permute.xlu0 %3230 }
 0x51d   : > { %v3273_v42 = vsel %vm1784_vm0, %v3267_v55, %v3231_v31 }
 0x520   : > { %v3255_v0 = vpop.permute.xlu0 %3254 }
 0x521   : > { %v3279_v12 = vsel %vm1791_vm2, %v3273_v42, %v3255_v0 }
 0x522   : > { %3561 = vst [vmem:[%s6176_s13 + $0x58] sm:$0xff] %v3279_v12 }
 0x523   : > { %4219 = shalt.err (!%p4216_p5)
}
 0x524   : > { %s4220_s30 = scalar_lea.hbm %s6275_s19, 1536  ;;  %s4224_s9 = scalar_lea.hbm %s6332_s5, 3072 }
 0x525   : > { %p4221_p6 = scmp.ne.s32.totalorder %s6275_s19, %s4220_s30  ;;  %p4225_p10 = scmp.lt.u32.totalorder %s6275_s19, %s6332_s5 }
 0x526   : > { %p4226_p11 = scmp.lt.u32.totalorder %s4224_s9, %s4220_s30  ;;  %p4228_p13 = scmp.lt.u32.totalorder %s4220_s30, %s6275_s19 }
 0x527   : > { %p4222_p7 = pnand %p4221_p6, %p4367_p4 }
 0x528   : > { %p4227_p12 = por %p4226_p11, %p4225_p10 }
 0x529   : > { %p4223_p9 = pneg %p4222_p7 }
 0x52a   : > { %p4229_p0 = por %p4228_p13, %p4227_p12 }
 0x52c   : > { %p4230_p1 = pnand %p4229_p0, %p4223_p9 }
 0x52e   : > { %4233 = shalt.err (!%p4230_p1)
}
 0x52f   : > { %s4292_s13 = smov 128   ;;  %s4293_s14 = smov 8  }
 0x530   : > { %3952 = dma.vmem_to_hbm [thread:$0]  (%p4367_p4), %s6269_s12, 1536, %s6275_s19, %s6281_s23, %s4292_s13, %s4292_s13, %s4293_s14  }
 0x531 PF: > { %p3958_p2 = scmp.ge.s32.totalorder %s4284_s25, 2  ;;  %s3319_s15 = sand.u32 1, %s4264_s20  }
 0x532   : > { %s3320_s16 = scalar_lea.sflag [#allocation5], %s3319_s15 }
 0x533   : > { %p3955_p3 = pnand %p3958_p2, %p4374_p8 }
 0x535   : > { %4259 = dma.done.wait (!%p3955_p3), %s3320_s16, 1536  }
 0x536   : > { %4261 = vsyncadd (!%p3955_p3), %s3320_s16, 4294965760  ;;  %s19_s25 = sadd.s32 1, %s4284_s25   ;;  %s6519_s20 = smov %s4268_s21 }
 0x537   : > { %p16_p5 = scmp.ge.s32.totalorder %s19_s25, 4   ;;  %s6520_s21 = smov %s4272_s22 }
 0x538   : > { %s6521_s22 = smov %s4380_s7  ;;  %s6522_s23 = smov %s4280_s24 }
 0x539   : > { %s6523_s24 = smov %s6525_s27  ;;  %18 = sbr.rel (!%p16_p5) target bundleno = 6 (0x6), region = 81 }
 0x540   :  { %3325 = vsyncpa [#allocation5], 1 }
 0x541   :  { %3327 = vsyncpa [#allocation5 + $0x1], 1 }

</bundles_post_ra>
